<compile_context>
chip_gen: v7x
topology: tpu7x:2x2x1
jax: 0.10.0
libtpu: 0.0.40
codegen_flags: <defaults>
</compile_context>

<pallas_src>
import functools

import jax
import jax.numpy as jnp
from jax.experimental import pallas as pl
from jax.experimental.pallas import tpu as pltpu

EPS = 1e-5
LANE = 128
VMEM_LIMIT_BYTES = 48 * 1024 * 1024   # explicit scoped-VMEM budget (review)


def _round_up(x, m):
    return (x + m - 1) // m * m


def _pick_band_rows(h, w):
    """Largest divisor R of h with R*w <= 512 (MXU M-dim target ~256-512)."""
    target = max(1, 512 // max(w, 1))
    r = 1
    for d in range(1, h + 1):
        if h % d == 0 and d <= target:
            r = d
    return r


def _pick_cout_tile(cout_p):
    """Cout tile (multiple of 128, <=512) dividing cout_p; bounds weight VMEM."""
    if cout_p <= 512:
        return cout_p
    for cand in (512, 384, 256, 128):
        if cout_p % cand == 0:
            return cand
    return cout_p


# --------------------------------------------------------------------------
# Conv3x3 band kernel: halo'd band -> in-VMEM im2col -> one MXU matmul,
# with optional fused input BN scale/shift + ReLU and BN stat partials.
# --------------------------------------------------------------------------
def _conv3x3_band_kernel(xm_ref, xt_ref, xb_ref, w_ref, sc_ref, sh_ref,
                         y_ref, ps_ref, band_ref,
                         *, R, W, cin, ck, tcout, nb, fuse_input_bn_relu):
    """One (R, W) output row band x one Cout tile per grid step.

    xm_ref: (1, R, W, cin)   main input band (rows b*R .. b*R+R-1)
    xt_ref: (1, 1, W, cin)   row above the band (clamped; masked when b == 0)
    xb_ref: (1, 1, W, cin)   row below the band (clamped; masked at last band)
    w_ref:  (9*ck, tcout)    conv weights, (kh, kw, cin) flattened along K
    sc_ref/sh_ref: (1, cin)  fused input BN scale/shift (stage 2 only)
    y_ref:  (1, R, W, tcout) unnormalized conv output band
    ps_ref: (1, 1, 8, tcout) packed partials: row 0 = sum, row 1 = sumsq
    band_ref: VMEM (R+2, W+2, ck) zero-padded, input-activated band
    """
    b = pl.program_id(2)

    def act(v):
        v = v.astype(jnp.float32)
        if fuse_input_bn_relu:
            s = sc_ref[0, :]
            t = sh_ref[0, :]
            v = jnp.maximum(v * s[None, None, :] + t[None, None, :], 0.0)
        return v

    # Rebuild the halo'd band in VMEM.  The memset keeps the 1-pixel spatial
    # border and the lanes >= cin exactly zero (no spatially padded HBM copy).
    band_ref[...] = jnp.zeros_like(band_ref)
    band_ref[1:R + 1, 1:W + 1, 0:cin] = act(xm_ref[0])
    top_ok = (b > 0).astype(jnp.float32)        # zero-pad row above the image
    bot_ok = (b < nb - 1).astype(jnp.float32)   # zero-pad row below the image
    band_ref[0:1, 1:W + 1, 0:cin] = act(xt_ref[0]) * top_ok
    band_ref[R + 1:R + 2, 1:W + 1, 0:cin] = act(xb_ref[0]) * bot_ok

    # In-VMEM im2col: 9 ref-sliced shifted slabs, lane-aligned concat
    # (ck % 128 == 0), one deep MXU matmul instead of 9 shallow ones.
    slabs = []
    for kh in range(3):
        for kw in range(3):
            slabs.append(band_ref[kh:kh + R, kw:kw + W, :].reshape(R * W, ck))
    lhs = jnp.concatenate(slabs, axis=1)                         # (R*W, 9*ck)
    y = jnp.dot(lhs, w_ref[...], preferred_element_type=jnp.float32)

    y_ref[0] = y.reshape(R, W, tcout)

    # BatchNorm partials ride under the MXU; packed to 8 sublanes so the
    # store is not a sublane-sparse masked vst.
    s = jnp.sum(y, axis=0, keepdims=True)
    sq = jnp.sum(y * y, axis=0, keepdims=True)
    ps_ref[0, 0] = jnp.concatenate(
        [s, sq, jnp.zeros((6, tcout), jnp.float32)], axis=0)


def _conv3x3_bn_stats(x_nhwc, w_oihw, in_scale=None, in_shift=None):
    """3x3/pad=1 conv (+optional fused input scale/shift/ReLU) + BN partials.

    Returns (y, ch_sum, ch_sumsq); y has Cout zero-padded to a multiple of 128
    (lane-dense stores).  The conv bias is intentionally omitted: it cancels
    exactly under training-mode (batch-stat) BatchNorm.
    """
    N, H, W, Cin = x_nhwc.shape
    Cout, Wcin = w_oihw.shape[0], w_oihw.shape[1]
    ck = _round_up(Cin, LANE)          # lane padding only inside VMEM
    cout_p = _round_up(Cout, LANE)
    tcout = _pick_cout_tile(cout_p)
    num_co = cout_p // tcout
    R = _pick_band_rows(H, W)
    nb = H // R
    KK = 9 * ck

    # (Cout, Cin, 3, 3) -> (3, 3, ck, cout_p) -> (9*ck, cout_p), zero padded.
    wk = jnp.transpose(w_oihw, (2, 3, 1, 0)).astype(jnp.float32)
    wk = jnp.pad(wk, ((0, 0), (0, 0), (0, ck - Wcin), (0, cout_p - Cout)))
    wk = wk.reshape(KK, cout_p)

    fuse = in_scale is not None
    if fuse:
        in_scale = in_scale.reshape(1, Cin).astype(jnp.float32)
        in_shift = in_shift.reshape(1, Cin).astype(jnp.float32)
    else:
        in_scale = jnp.zeros((1, Cin), jnp.float32)    # ignored (static flag)
        in_shift = jnp.zeros((1, Cin), jnp.float32)

    kernel = functools.partial(
        _conv3x3_band_kernel, R=R, W=W, cin=Cin, ck=ck, tcout=tcout, nb=nb,
        fuse_input_bn_relu=fuse)

    y, ps = pl.pallas_call(
        kernel,
        out_shape=(
            jax.ShapeDtypeStruct((N, H, W, cout_p), jnp.float32),
            jax.ShapeDtypeStruct((N, nb, 8, cout_p), jnp.float32),
        ),
        grid=(N, num_co, nb),
        in_specs=[
            # Main band: each input row read once per Cout tile ...
            pl.BlockSpec((1, R, W, Cin), lambda n, co, b: (n, b, 0, 0)),
            # ... plus two 1-row halos (clamped index; masked in-kernel):
            # (R+2)/R read amplification instead of 3x.
            pl.BlockSpec((1, 1, W, Cin),
                         lambda n, co, b: (n, jnp.maximum(b * R - 1, 0), 0, 0)),
            pl.BlockSpec((1, 1, W, Cin),
                         lambda n, co, b: (n, jnp.minimum(b * R + R, H - 1), 0, 0)),
            # Weight tile: constant across the band axis -> stays resident.
            pl.BlockSpec((KK, tcout), lambda n, co, b: (0, co)),
            pl.BlockSpec((1, Cin), lambda n, co, b: (0, 0)),
            pl.BlockSpec((1, Cin), lambda n, co, b: (0, 0)),
        ],
        out_specs=(
            pl.BlockSpec((1, R, W, tcout), lambda n, co, b: (n, b, 0, co)),
            pl.BlockSpec((1, 1, 8, tcout), lambda n, co, b: (n, b, 0, co)),
        ),
        scratch_shapes=[pltpu.VMEM((R + 2, W + 2, ck), jnp.float32)],
        compiler_params=pltpu.CompilerParams(
            dimension_semantics=("parallel", "parallel", "parallel"),
            vmem_limit_bytes=VMEM_LIMIT_BYTES),
    )(x_nhwc, x_nhwc, x_nhwc, wk, in_scale, in_shift)

    ch_sum = jnp.sum(ps[:, :, 0, :], axis=(0, 1))
    ch_sumsq = jnp.sum(ps[:, :, 1, :], axis=(0, 1))
    return y, ch_sum, ch_sumsq


def _bn_scale_shift(ch_sum, ch_sumsq, count, gamma, beta, cout_p):
    """Fold batch-stat BatchNorm into per-channel scale/shift (biased var)."""
    cout = gamma.shape[0]
    mean = ch_sum / count
    var = jnp.maximum(ch_sumsq / count - mean * mean, 0.0)
    g = jnp.pad(gamma.astype(jnp.float32), (0, cout_p - cout))
    bt = jnp.pad(beta.astype(jnp.float32), (0, cout_p - cout))
    scale = g * jax.lax.rsqrt(var + EPS)      # padded channels: gamma=0 -> 0
    shift = bt - mean * scale
    return scale, shift


def double_conv_forward(x_nchw, params):
    """Pallas DoubleConv forward. x_nchw: (N, Cin, H, W) -> (N, Cout, H, W)."""
    N, Cin, H, W = x_nchw.shape
    Cmid = params["w1"].shape[0]
    Cout = params["w2"].shape[0]
    cmid_p = _round_up(Cmid, LANE)
    cout_p = _round_up(Cout, LANE)
    count = N * H * W

    # TODO(synk): NCHW<->NHWC transposes kept only for PyTorch I/O parity.
    x = jnp.transpose(x_nchw, (0, 2, 3, 1)).astype(jnp.float32)

    # Stage 1: conv + batch stats (conv bias cancels under batch-stat BN).
    y1, s1, q1 = _conv3x3_bn_stats(x, params["w1"])
    scale1, shift1 = _bn_scale_shift(s1, q1, count,
                                     params["g1"], params["beta1"], cmid_p)

    # Stage 2: conv with stage-1 BN+ReLU fused into its input path.
    y2, s2, q2 = _conv3x3_bn_stats(y1, params["w2"],
                                   in_scale=scale1, in_shift=shift1)
    scale2, shift2 = _bn_scale_shift(s2, q2, count,
                                     params["g2"], params["beta2"], cout_p)

    # Stage-2 BN + ReLU fused with the final channel slice / NCHW transpose
    # (single XLA elementwise+transpose pass; no dedicated HBM round trip).
    a2 = jnp.maximum(y2 * scale2[None, None, None, :]
                     + shift2[None, None, None, :], 0.0)
    return jnp.transpose(a2[..., :Cout], (0, 3, 1, 2))


# --------------------------------------------------------------------------
# Plain-JAX reference matching PyTorch training-mode forward (with biases).
# --------------------------------------------------------------------------
def double_conv_reference(x_nchw, params):
    def conv(x, w, b):
        y = jax.lax.conv_general_dilated(
            x, w, window_strides=(1, 1), padding="SAME",
            dimension_numbers=("NCHW", "OIHW", "NCHW"))
        return y + b[None, :, None, None]

    def bn_relu(y, g, beta):
        mean = y.mean(axis=(0, 2, 3), keepdims=True)
        var = ((y - mean) ** 2).mean(axis=(0, 2, 3), keepdims=True)
        yhat = (y - mean) / jnp.sqrt(var + EPS)
        return jnp.maximum(yhat * g[None, :, None, None]
                           + beta[None, :, None, None], 0.0)

    y = bn_relu(conv(x_nchw, params["w1"], params["b1"]),
                params["g1"], params["beta1"])
    y = bn_relu(conv(y, params["w2"], params["b2"]),
                params["g2"], params["beta2"])
    return y


def init_params(key, in_channels, out_channels, mid_channels=None):
    if not mid_channels:
        mid_channels = out_channels
    k1, k2, k3, k4 = jax.random.split(key, 4)
    return {
        "w1": 0.1 * jax.random.normal(k1, (mid_channels, in_channels, 3, 3),
                                      jnp.float32),
        "b1": 0.1 * jax.random.normal(k2, (mid_channels,), jnp.float32),
        "g1": jnp.ones((mid_channels,), jnp.float32),
        "beta1": jnp.zeros((mid_channels,), jnp.float32),
        "w2": 0.1 * jax.random.normal(k3, (out_channels, mid_channels, 3, 3),
                                      jnp.float32),
        "b2": 0.1 * jax.random.normal(k4, (out_channels,), jnp.float32),
        "g2": jnp.ones((out_channels,), jnp.float32),
        "beta2": jnp.zeros((out_channels,), jnp.float32),
    }


if __name__ == "__main__":
    key = jax.random.PRNGKey(0)
    k_x, k_p = jax.random.split(key)

    N, Cin, H, W = 2, 4, 16, 16
    Cout = 8
    x = jax.random.normal(k_x, (N, Cin, H, W), jnp.float32)
    params = init_params(k_p, Cin, Cout)

    out = jax.jit(double_conv_forward)(x, params)
    out = jax.block_until_ready(out)

    ref = double_conv_reference(x, params)
    assert out.shape == (N, Cout, H, W), out.shape
    assert jnp.allclose(out, ref, atol=1e-4, rtol=1e-4), \
        float(jnp.max(jnp.abs(out - ref)))

    print("KERNEL_OK")
</pallas_src>

<mosaic_0001>
module attributes {stable_mosaic.version = 11 : i64} {
  func.func @_conv3x3_band_kernel(%arg0: i32, %arg1: i32, %arg2: i32, %arg3: memref<1x16x16x4xf32, #tpu.memory_space<vmem>>, %arg4: memref<1x1x16x4xf32, #tpu.memory_space<vmem>>, %arg5: memref<1x1x16x4xf32, #tpu.memory_space<vmem>>, %arg6: memref<1152x128xf32, #tpu.memory_space<vmem>>, %arg7: memref<1x4xf32, #tpu.memory_space<vmem>>, %arg8: memref<1x4xf32, #tpu.memory_space<vmem>>, %arg9: memref<1x16x16x128xf32, #tpu.memory_space<vmem>>, %arg10: memref<1x1x8x128xf32, #tpu.memory_space<vmem>>, %arg11: memref<18x18x128xf32, #tpu.memory_space<vmem>>) attributes {dimension_semantics = [#tpu.dimension_semantics<parallel>, #tpu.dimension_semantics<parallel>, #tpu.dimension_semantics<parallel>], iteration_bounds = array<i64: 2, 1, 1>, scalar_prefetch = 0 : i64, scratch_operands = 1 : i64, tpu.core_type = #tpu.core_type<tc>, window_params = [{transform_indices = @transform_0, window_bounds = array<i64: 1, 16, 16, 4>}, {transform_indices = @transform_1, window_bounds = array<i64: 1, 1, 16, 4>}, {transform_indices = @transform_2, window_bounds = array<i64: 1, 1, 16, 4>}, {transform_indices = @transform_3, window_bounds = array<i64: 1152, 128>}, {pipeline_mode = #tpu.pipeline_mode<synchronous>, transform_indices = @transform_4, window_bounds = array<i64: 1, 4>}, {pipeline_mode = #tpu.pipeline_mode<synchronous>, transform_indices = @transform_5, window_bounds = array<i64: 1, 4>}, {transform_indices = @transform_6, window_bounds = array<i64: 1, 16, 16, 128>}, {transform_indices = @transform_7, window_bounds = array<i64: 1, 1, 8, 128>}]} {
    %cst = arith.constant 0.000000e+00 : f32
    %0 = vector.broadcast %cst : f32 to vector<18x18x128xf32>
    %c0 = arith.constant 0 : index
    %c0_0 = arith.constant 0 : index
    %c0_1 = arith.constant 0 : index
    %1 = vector.load %arg11[%c0, %c0_0, %c0_1] : memref<18x18x128xf32, #tpu.memory_space<vmem>>, vector<18x18x128xf32>
    tpu.vector_store %arg11[%c0, %c0_0, %c0_1], %0 {strides = array<i32>} : memref<18x18x128xf32, #tpu.memory_space<vmem>>, vector<18x18x128xf32>,
    %c0_2 = arith.constant 0 : index
    %c0_3 = arith.constant 0 : index
    %c0_4 = arith.constant 0 : index
    %c0_5 = arith.constant 0 : index
    %2 = vector.load %arg3[%c0_2, %c0_3, %c0_4, %c0_5] : memref<1x16x16x4xf32, #tpu.memory_space<vmem>>, vector<1x16x16x4xf32>
    %3 = vector.shape_cast %2 : vector<1x16x16x4xf32> to vector<16x16x4xf32>
    %c1 = arith.constant 1 : index
    %c1_6 = arith.constant 1 : index
    %c0_7 = arith.constant 0 : index
    %4 = vector.load %arg11[%c1, %c1_6, %c0_7] : memref<18x18x128xf32, #tpu.memory_space<vmem>>, vector<16x16x4xf32>
    tpu.vector_store %arg11[%c1, %c1_6, %c0_7], %3 {strides = array<i32>} : memref<18x18x128xf32, #tpu.memory_space<vmem>>, vector<16x16x4xf32>,
    %c0_i32 = arith.constant 0 : i32
    %5 = arith.cmpi sgt, %arg2, %c0_i32 : i32
    %6 = arith.extui %5 : i1 to i32
    %7 = arith.sitofp %6 : i32 to f32
    %c0_i32_8 = arith.constant 0 : i32
    %8 = arith.cmpi slt, %arg2, %c0_i32_8 : i32
    %9 = arith.extui %8 : i1 to i32
    %10 = arith.sitofp %9 : i32 to f32
    %c0_9 = arith.constant 0 : index
    %c0_10 = arith.constant 0 : index
    %c0_11 = arith.constant 0 : index
    %c0_12 = arith.constant 0 : index
    %11 = vector.load %arg4[%c0_9, %c0_10, %c0_11, %c0_12] : memref<1x1x16x4xf32, #tpu.memory_space<vmem>>, vector<1x1x16x4xf32>
    %12 = vector.shape_cast %11 : vector<1x1x16x4xf32> to vector<1x16x4xf32>
    %13 = vector.broadcast %7 : f32 to vector<1x16x4xf32>
    %14 = arith.mulf %12, %13 : vector<1x16x4xf32>
    %c0_13 = arith.constant 0 : index
    %c1_14 = arith.constant 1 : index
    %c0_15 = arith.constant 0 : index
    %15 = vector.load %arg11[%c0_13, %c1_14, %c0_15] : memref<18x18x128xf32, #tpu.memory_space<vmem>>, vector<1x16x4xf32>
    tpu.vector_store %arg11[%c0_13, %c1_14, %c0_15], %14 {strides = array<i32>} : memref<18x18x128xf32, #tpu.memory_space<vmem>>, vector<1x16x4xf32>,
    %c0_16 = arith.constant 0 : index
    %c0_17 = arith.constant 0 : index
    %c0_18 = arith.constant 0 : index
    %c0_19 = arith.constant 0 : index
    %16 = vector.load %arg5[%c0_16, %c0_17, %c0_18, %c0_19] : memref<1x1x16x4xf32, #tpu.memory_space<vmem>>, vector<1x1x16x4xf32>
    %17 = vector.shape_cast %16 : vector<1x1x16x4xf32> to vector<1x16x4xf32>
    %18 = vector.broadcast %10 : f32 to vector<1x16x4xf32>
    %19 = arith.mulf %17, %18 : vector<1x16x4xf32>
    %c17 = arith.constant 17 : index
    %c1_20 = arith.constant 1 : index
    %c0_21 = arith.constant 0 : index
    %20 = vector.load %arg11[%c17, %c1_20, %c0_21] : memref<18x18x128xf32, #tpu.memory_space<vmem>>, vector<1x16x4xf32>
    tpu.vector_store %arg11[%c17, %c1_20, %c0_21], %19 {strides = array<i32>} : memref<18x18x128xf32, #tpu.memory_space<vmem>>, vector<1x16x4xf32>,
    %c0_22 = arith.constant 0 : index
    %c0_23 = arith.constant 0 : index
    %c0_24 = arith.constant 0 : index
    %21 = vector.load %arg11[%c0_22, %c0_23, %c0_24] : memref<18x18x128xf32, #tpu.memory_space<vmem>>, vector<16x16x128xf32>
    %22 = vector.shape_cast %21 : vector<16x16x128xf32> to vector<256x128xf32>
    %c0_25 = arith.constant 0 : index
    %c1_26 = arith.constant 1 : index
    %c0_27 = arith.constant 0 : index
    %23 = vector.load %arg11[%c0_25, %c1_26, %c0_27] : memref<18x18x128xf32, #tpu.memory_space<vmem>>, vector<16x16x128xf32>
    %24 = vector.shape_cast %23 : vector<16x16x128xf32> to vector<256x128xf32>
    %c0_28 = arith.constant 0 : index
    %c2 = arith.constant 2 : index
    %c0_29 = arith.constant 0 : index
    %25 = vector.load %arg11[%c0_28, %c2, %c0_29] : memref<18x18x128xf32, #tpu.memory_space<vmem>>, vector<16x16x128xf32>
    %26 = vector.shape_cast %25 : vector<16x16x128xf32> to vector<256x128xf32>
    %c1_30 = arith.constant 1 : index
    %c0_31 = arith.constant 0 : index
    %c0_32 = arith.constant 0 : index
    %27 = vector.load %arg11[%c1_30, %c0_31, %c0_32] : memref<18x18x128xf32, #tpu.memory_space<vmem>>, vector<16x16x128xf32>
    %28 = vector.shape_cast %27 : vector<16x16x128xf32> to vector<256x128xf32>
    %c1_33 = arith.constant 1 : index
    %c1_34 = arith.constant 1 : index
    %c0_35 = arith.constant 0 : index
    %29 = vector.load %arg11[%c1_33, %c1_34, %c0_35] : memref<18x18x128xf32, #tpu.memory_space<vmem>>, vector<16x16x128xf32>
    %30 = vector.shape_cast %29 : vector<16x16x128xf32> to vector<256x128xf32>
    %c1_36 = arith.constant 1 : index
    %c2_37 = arith.constant 2 : index
    %c0_38 = arith.constant 0 : index
    %31 = vector.load %arg11[%c1_36, %c2_37, %c0_38] : memref<18x18x128xf32, #tpu.memory_space<vmem>>, vector<16x16x128xf32>
    %32 = vector.shape_cast %31 : vector<16x16x128xf32> to vector<256x128xf32>
    %c2_39 = arith.constant 2 : index
    %c0_40 = arith.constant 0 : index
    %c0_41 = arith.constant 0 : index
    %33 = vector.load %arg11[%c2_39, %c0_40, %c0_41] : memref<18x18x128xf32, #tpu.memory_space<vmem>>, vector<16x16x128xf32>
    %34 = vector.shape_cast %33 : vector<16x16x128xf32> to vector<256x128xf32>
    %c2_42 = arith.constant 2 : index
    %c1_43 = arith.constant 1 : index
    %c0_44 = arith.constant 0 : index
    %35 = vector.load %arg11[%c2_42, %c1_43, %c0_44] : memref<18x18x128xf32, #tpu.memory_space<vmem>>, vector<16x16x128xf32>
    %36 = vector.shape_cast %35 : vector<16x16x128xf32> to vector<256x128xf32>
    %c2_45 = arith.constant 2 : index
    %c2_46 = arith.constant 2 : index
    %c0_47 = arith.constant 0 : index
    %37 = vector.load %arg11[%c2_45, %c2_46, %c0_47] : memref<18x18x128xf32, #tpu.memory_space<vmem>>, vector<16x16x128xf32>
    %38 = vector.shape_cast %37 : vector<16x16x128xf32> to vector<256x128xf32>
    %39 = tpu.concatenate %22, %24, %26, %28, %30, %32, %34, %36, %38 in 1 : vector<256x128xf32>, vector<256x128xf32>, vector<256x128xf32>, vector<256x128xf32>, vector<256x128xf32>, vector<256x128xf32>, vector<256x128xf32>, vector<256x128xf32>, vector<256x128xf32> -> vector<256x1152xf32>
    %c0_48 = arith.constant 0 : index
    %c0_49 = arith.constant 0 : index
    %40 = vector.load %arg6[%c0_48, %c0_49] : memref<1152x128xf32, #tpu.memory_space<vmem>>, vector<1152x128xf32>
    %cst_50 = arith.constant dense<0.000000e+00> : vector<256x128xf32>
    %41 = tpu.matmul %39, %40, %cst_50 {dimension_numbers = #tpu.dot_dimension_numbers<[1], [0], [0], [1], [0, 0, 1, 1], [], []>} : vector<256x1152xf32>, vector<1152x128xf32>, vector<256x128xf32> -> vector<256x128xf32>
    %42 = vector.shape_cast %41 : vector<256x128xf32> to vector<16x16x128xf32>
    %c0_51 = arith.constant 0 : index
    %c0_52 = arith.constant 0 : index
    %c0_53 = arith.constant 0 : index
    %c0_54 = arith.constant 0 : index
    %43 = vector.load %arg9[%c0_51, %c0_52, %c0_53, %c0_54] : memref<1x16x16x128xf32, #tpu.memory_space<vmem>>, vector<1x16x16x128xf32>
    %44 = vector.shape_cast %43 : vector<1x16x16x128xf32> to vector<16x16x128xf32>
    %45 = vector.shape_cast %42 : vector<16x16x128xf32> to vector<1x16x16x128xf32>
    tpu.vector_store %arg9[%c0_51, %c0_52, %c0_53, %c0_54], %45 {strides = array<i32>} : memref<1x16x16x128xf32, #tpu.memory_space<vmem>>, vector<1x16x16x128xf32>,
    %cst_55 = arith.constant dense<0.000000e+00> : vector<128xf32>
    %46 = vector.multi_reduction <add>, %41, %cst_55 [0] : vector<256x128xf32> to vector<128xf32>
    %47 = vector.shape_cast %46 : vector<128xf32> to vector<1x128xf32>
    %48 = arith.mulf %41, %41 : vector<256x128xf32>
    %cst_56 = arith.constant dense<0.000000e+00> : vector<128xf32>
    %49 = vector.multi_reduction <add>, %48, %cst_56 [0] : vector<256x128xf32> to vector<128xf32>
    %50 = vector.shape_cast %49 : vector<128xf32> to vector<1x128xf32>
    %cst_57 = arith.constant 0.000000e+00 : f32
    %51 = vector.broadcast %cst_57 : f32 to vector<6x128xf32>
    %52 = tpu.concatenate %47, %50, %51 in 0 : vector<1x128xf32>, vector<1x128xf32>, vector<6x128xf32> -> vector<8x128xf32>
    %c0_58 = arith.constant 0 : index
    %c0_59 = arith.constant 0 : index
    %c0_60 = arith.constant 0 : index
    %c0_61 = arith.constant 0 : index
    %53 = vector.load %arg10[%c0_58, %c0_59, %c0_60, %c0_61] : memref<1x1x8x128xf32, #tpu.memory_space<vmem>>, vector<1x1x8x128xf32>
    %54 = vector.shape_cast %53 : vector<1x1x8x128xf32> to vector<8x128xf32>
    %55 = vector.shape_cast %52 : vector<8x128xf32> to vector<1x1x8x128xf32>
    tpu.vector_store %arg10[%c0_58, %c0_59, %c0_60, %c0_61], %55 {strides = array<i32>} : memref<1x1x8x128xf32, #tpu.memory_space<vmem>>, vector<1x1x8x128xf32>,
    return
  }
  func.func @transform_0(%arg0: i32, %arg1: i32, %arg2: i32) -> (i32, i32, i32, i32) {
    %c0_i32 = arith.constant 0 : i32
    %c0_i32_0 = arith.constant 0 : i32
    %c0_i32_1 = arith.constant 0 : i32
    return %arg0, %arg2, %c0_i32, %c0_i32_0 : i32, i32, i32, i32
  }
  func.func @transform_1(%arg0: i32, %arg1: i32, %arg2: i32) -> (i32, i32, i32, i32) {
    %c16_i32 = arith.constant 16 : i32
    %0 = arith.muli %arg2, %c16_i32 : i32
    %c1_i32 = arith.constant 1 : i32
    %1 = arith.subi %0, %c1_i32 : i32
    %c0_i32 = arith.constant 0 : i32
    %2 = arith.maxsi %1, %c0_i32 : i32
    %c0_i32_0 = arith.constant 0 : i32
    %c0_i32_1 = arith.constant 0 : i32
    %c0_i32_2 = arith.constant 0 : i32
    return %arg0, %2, %c0_i32_0, %c0_i32_1 : i32, i32, i32, i32
  }
  func.func @transform_2(%arg0: i32, %arg1: i32, %arg2: i32) -> (i32, i32, i32, i32) {
    %c16_i32 = arith.constant 16 : i32
    %0 = arith.muli %arg2, %c16_i32 : i32
    %c16_i32_0 = arith.constant 16 : i32
    %1 = arith.addi %0, %c16_i32_0 : i32
    %c15_i32 = arith.constant 15 : i32
    %2 = arith.minsi %1, %c15_i32 : i32
    %c0_i32 = arith.constant 0 : i32
    %c0_i32_1 = arith.constant 0 : i32
    %c0_i32_2 = arith.constant 0 : i32
    return %arg0, %2, %c0_i32, %c0_i32_1 : i32, i32, i32, i32
  }
  func.func @transform_3(%arg0: i32, %arg1: i32, %arg2: i32) -> (i32, i32) {
    %c0_i32 = arith.constant 0 : i32
    %c0_i32_0 = arith.constant 0 : i32
    return %c0_i32, %arg1 : i32, i32
  }
  func.func @transform_4(%arg0: i32, %arg1: i32, %arg2: i32) -> (i32, i32) {
    %c0_i32 = arith.constant 0 : i32
    %c0_i32_0 = arith.constant 0 : i32
    %c0_i32_1 = arith.constant 0 : i32
    return %c0_i32, %c0_i32_0 : i32, i32
  }
  func.func @transform_5(%arg0: i32, %arg1: i32, %arg2: i32) -> (i32, i32) {
    %c0_i32 = arith.constant 0 : i32
    %c0_i32_0 = arith.constant 0 : i32
    %c0_i32_1 = arith.constant 0 : i32
    return %c0_i32, %c0_i32_0 : i32, i32
  }
  func.func @transform_6(%arg0: i32, %arg1: i32, %arg2: i32) -> (i32, i32, i32, i32) {
    %c0_i32 = arith.constant 0 : i32
    %c0_i32_0 = arith.constant 0 : i32
    return %arg0, %arg2, %c0_i32, %arg1 : i32, i32, i32, i32
  }
  func.func @transform_7(%arg0: i32, %arg1: i32, %arg2: i32) -> (i32, i32, i32, i32) {
    %c0_i32 = arith.constant 0 : i32
    %c0_i32_0 = arith.constant 0 : i32
    return %arg0, %arg2, %c0_i32, %arg1 : i32, i32, i32, i32
  }
}

module attributes {stable_mosaic.version = 11 : i64} {
  func.func @_conv3x3_band_kernel(%arg0: i32, %arg1: i32, %arg2: i32, %arg3: memref<1x16x16x128xf32, #tpu.memory_space<vmem>>, %arg4: memref<1x1x16x128xf32, #tpu.memory_space<vmem>>, %arg5: memref<1x1x16x128xf32, #tpu.memory_space<vmem>>, %arg6: memref<1152x128xf32, #tpu.memory_space<vmem>>, %arg7: memref<1x128xf32, #tpu.memory_space<vmem>>, %arg8: memref<1x128xf32, #tpu.memory_space<vmem>>, %arg9: memref<1x16x16x128xf32, #tpu.memory_space<vmem>>, %arg10: memref<1x1x8x128xf32, #tpu.memory_space<vmem>>, %arg11: memref<18x18x128xf32, #tpu.memory_space<vmem>>) attributes {dimension_semantics = [#tpu.dimension_semantics<parallel>, #tpu.dimension_semantics<parallel>, #tpu.dimension_semantics<parallel>], iteration_bounds = array<i64: 2, 1, 1>, scalar_prefetch = 0 : i64, scratch_operands = 1 : i64, tpu.core_type = #tpu.core_type<tc>, window_params = [{transform_indices = @transform_0, window_bounds = array<i64: 1, 16, 16, 128>}, {transform_indices = @transform_1, window_bounds = array<i64: 1, 1, 16, 128>}, {transform_indices = @transform_2, window_bounds = array<i64: 1, 1, 16, 128>}, {transform_indices = @transform_3, window_bounds = array<i64: 1152, 128>}, {pipeline_mode = #tpu.pipeline_mode<synchronous>, transform_indices = @transform_4, window_bounds = array<i64: 1, 128>}, {pipeline_mode = #tpu.pipeline_mode<synchronous>, transform_indices = @transform_5, window_bounds = array<i64: 1, 128>}, {transform_indices = @transform_6, window_bounds = array<i64: 1, 16, 16, 128>}, {transform_indices = @transform_7, window_bounds = array<i64: 1, 1, 8, 128>}]} {
    %cst = arith.constant 0.000000e+00 : f32
    %0 = vector.broadcast %cst : f32 to vector<18x18x128xf32>
    %c0 = arith.constant 0 : index
    %c0_0 = arith.constant 0 : index
    %c0_1 = arith.constant 0 : index
    %1 = vector.load %arg11[%c0, %c0_0, %c0_1] : memref<18x18x128xf32, #tpu.memory_space<vmem>>, vector<18x18x128xf32>
    tpu.vector_store %arg11[%c0, %c0_0, %c0_1], %0 {strides = array<i32>} : memref<18x18x128xf32, #tpu.memory_space<vmem>>, vector<18x18x128xf32>,
    %c0_2 = arith.constant 0 : index
    %c0_3 = arith.constant 0 : index
    %c0_4 = arith.constant 0 : index
    %c0_5 = arith.constant 0 : index
    %2 = vector.load %arg3[%c0_2, %c0_3, %c0_4, %c0_5] : memref<1x16x16x128xf32, #tpu.memory_space<vmem>>, vector<1x16x16x128xf32>
    %3 = vector.shape_cast %2 : vector<1x16x16x128xf32> to vector<16x16x128xf32>
    %c0_6 = arith.constant 0 : index
    %c0_7 = arith.constant 0 : index
    %4 = vector.load %arg7[%c0_6, %c0_7] : memref<1x128xf32, #tpu.memory_space<vmem>>, vector<1x128xf32>
    %5 = vector.shape_cast %4 : vector<1x128xf32> to vector<128xf32>
    %c0_8 = arith.constant 0 : index
    %c0_9 = arith.constant 0 : index
    %6 = vector.load %arg8[%c0_8, %c0_9] : memref<1x128xf32, #tpu.memory_space<vmem>>, vector<1x128xf32>
    %7 = vector.shape_cast %6 : vector<1x128xf32> to vector<128xf32>
    %8 = vector.shape_cast %5 : vector<128xf32> to vector<1x1x128xf32>
    %9 = vector.broadcast %8 : vector<1x1x128xf32> to vector<16x16x128xf32>
    %10 = arith.mulf %3, %9 : vector<16x16x128xf32>
    %11 = vector.shape_cast %7 : vector<128xf32> to vector<1x1x128xf32>
    %12 = vector.broadcast %11 : vector<1x1x128xf32> to vector<16x16x128xf32>
    %13 = arith.addf %10, %12 : vector<16x16x128xf32>
    %cst_10 = arith.constant 0.000000e+00 : f32
    %14 = vector.broadcast %cst_10 : f32 to vector<16x16x128xf32>
    %15 = arith.maximumf %13, %14 : vector<16x16x128xf32>
    %c1 = arith.constant 1 : index
    %c1_11 = arith.constant 1 : index
    %c0_12 = arith.constant 0 : index
    %16 = vector.load %arg11[%c1, %c1_11, %c0_12] : memref<18x18x128xf32, #tpu.memory_space<vmem>>, vector<16x16x128xf32>
    tpu.vector_store %arg11[%c1, %c1_11, %c0_12], %15 {strides = array<i32>} : memref<18x18x128xf32, #tpu.memory_space<vmem>>, vector<16x16x128xf32>,
    %c0_i32 = arith.constant 0 : i32
    %17 = arith.cmpi sgt, %arg2, %c0_i32 : i32
    %18 = arith.extui %17 : i1 to i32
    %19 = arith.sitofp %18 : i32 to f32
    %c0_i32_13 = arith.constant 0 : i32
    %20 = arith.cmpi slt, %arg2, %c0_i32_13 : i32
    %21 = arith.extui %20 : i1 to i32
    %22 = arith.sitofp %21 : i32 to f32
    %c0_14 = arith.constant 0 : index
    %c0_15 = arith.constant 0 : index
    %c0_16 = arith.constant 0 : index
    %c0_17 = arith.constant 0 : index
    %23 = vector.load %arg4[%c0_14, %c0_15, %c0_16, %c0_17] : memref<1x1x16x128xf32, #tpu.memory_space<vmem>>, vector<1x1x16x128xf32>
    %24 = vector.shape_cast %23 : vector<1x1x16x128xf32> to vector<1x16x128xf32>
    %c0_18 = arith.constant 0 : index
    %c0_19 = arith.constant 0 : index
    %25 = vector.load %arg7[%c0_18, %c0_19] : memref<1x128xf32, #tpu.memory_space<vmem>>, vector<1x128xf32>
    %26 = vector.shape_cast %25 : vector<1x128xf32> to vector<128xf32>
    %c0_20 = arith.constant 0 : index
    %c0_21 = arith.constant 0 : index
    %27 = vector.load %arg8[%c0_20, %c0_21] : memref<1x128xf32, #tpu.memory_space<vmem>>, vector<1x128xf32>
    %28 = vector.shape_cast %27 : vector<1x128xf32> to vector<128xf32>
    %29 = vector.shape_cast %26 : vector<128xf32> to vector<1x1x128xf32>
    %30 = vector.broadcast %29 : vector<1x1x128xf32> to vector<1x16x128xf32>
    %31 = arith.mulf %24, %30 : vector<1x16x128xf32>
    %32 = vector.shape_cast %28 : vector<128xf32> to vector<1x1x128xf32>
    %33 = vector.broadcast %32 : vector<1x1x128xf32> to vector<1x16x128xf32>
    %34 = arith.addf %31, %33 : vector<1x16x128xf32>
    %cst_22 = arith.constant 0.000000e+00 : f32
    %35 = vector.broadcast %cst_22 : f32 to vector<1x16x128xf32>
    %36 = arith.maximumf %34, %35 : vector<1x16x128xf32>
    %37 = vector.broadcast %19 : f32 to vector<1x16x128xf32>
    %38 = arith.mulf %36, %37 : vector<1x16x128xf32>
    %c0_23 = arith.constant 0 : index
    %c1_24 = arith.constant 1 : index
    %c0_25 = arith.constant 0 : index
    %39 = vector.load %arg11[%c0_23, %c1_24, %c0_25] : memref<18x18x128xf32, #tpu.memory_space<vmem>>, vector<1x16x128xf32>
    tpu.vector_store %arg11[%c0_23, %c1_24, %c0_25], %38 {strides = array<i32>} : memref<18x18x128xf32, #tpu.memory_space<vmem>>, vector<1x16x128xf32>,
    %c0_26 = arith.constant 0 : index
    %c0_27 = arith.constant 0 : index
    %c0_28 = arith.constant 0 : index
    %c0_29 = arith.constant 0 : index
    %40 = vector.load %arg5[%c0_26, %c0_27, %c0_28, %c0_29] : memref<1x1x16x128xf32, #tpu.memory_space<vmem>>, vector<1x1x16x128xf32>
    %41 = vector.shape_cast %40 : vector<1x1x16x128xf32> to vector<1x16x128xf32>
    %c0_30 = arith.constant 0 : index
    %c0_31 = arith.constant 0 : index
    %42 = vector.load %arg7[%c0_30, %c0_31] : memref<1x128xf32, #tpu.memory_space<vmem>>, vector<1x128xf32>
    %43 = vector.shape_cast %42 : vector<1x128xf32> to vector<128xf32>
    %c0_32 = arith.constant 0 : index
    %c0_33 = arith.constant 0 : index
    %44 = vector.load %arg8[%c0_32, %c0_33] : memref<1x128xf32, #tpu.memory_space<vmem>>, vector<1x128xf32>
    %45 = vector.shape_cast %44 : vector<1x128xf32> to vector<128xf32>
    %46 = vector.shape_cast %43 : vector<128xf32> to vector<1x1x128xf32>
    %47 = vector.broadcast %46 : vector<1x1x128xf32> to vector<1x16x128xf32>
    %48 = arith.mulf %41, %47 : vector<1x16x128xf32>
    %49 = vector.shape_cast %45 : vector<128xf32> to vector<1x1x128xf32>
    %50 = vector.broadcast %49 : vector<1x1x128xf32> to vector<1x16x128xf32>
    %51 = arith.addf %48, %50 : vector<1x16x128xf32>
    %cst_34 = arith.constant 0.000000e+00 : f32
    %52 = vector.broadcast %cst_34 : f32 to vector<1x16x128xf32>
    %53 = arith.maximumf %51, %52 : vector<1x16x128xf32>
    %54 = vector.broadcast %22 : f32 to vector<1x16x128xf32>
    %55 = arith.mulf %53, %54 : vector<1x16x128xf32>
    %c17 = arith.constant 17 : index
    %c1_35 = arith.constant 1 : index
    %c0_36 = arith.constant 0 : index
    %56 = vector.load %arg11[%c17, %c1_35, %c0_36] : memref<18x18x128xf32, #tpu.memory_space<vmem>>, vector<1x16x128xf32>
    tpu.vector_store %arg11[%c17, %c1_35, %c0_36], %55 {strides = array<i32>} : memref<18x18x128xf32, #tpu.memory_space<vmem>>, vector<1x16x128xf32>,
    %c0_37 = arith.constant 0 : index
    %c0_38 = arith.constant 0 : index
    %c0_39 = arith.constant 0 : index
    %57 = vector.load %arg11[%c0_37, %c0_38, %c0_39] : memref<18x18x128xf32, #tpu.memory_space<vmem>>, vector<16x16x128xf32>
    %58 = vector.shape_cast %57 : vector<16x16x128xf32> to vector<256x128xf32>
    %c0_40 = arith.constant 0 : index
    %c1_41 = arith.constant 1 : index
    %c0_42 = arith.constant 0 : index
    %59 = vector.load %arg11[%c0_40, %c1_41, %c0_42] : memref<18x18x128xf32, #tpu.memory_space<vmem>>, vector<16x16x128xf32>
    %60 = vector.shape_cast %59 : vector<16x16x128xf32> to vector<256x128xf32>
    %c0_43 = arith.constant 0 : index
    %c2 = arith.constant 2 : index
    %c0_44 = arith.constant 0 : index
    %61 = vector.load %arg11[%c0_43, %c2, %c0_44] : memref<18x18x128xf32, #tpu.memory_space<vmem>>, vector<16x16x128xf32>
    %62 = vector.shape_cast %61 : vector<16x16x128xf32> to vector<256x128xf32>
    %c1_45 = arith.constant 1 : index
    %c0_46 = arith.constant 0 : index
    %c0_47 = arith.constant 0 : index
    %63 = vector.load %arg11[%c1_45, %c0_46, %c0_47] : memref<18x18x128xf32, #tpu.memory_space<vmem>>, vector<16x16x128xf32>
    %64 = vector.shape_cast %63 : vector<16x16x128xf32> to vector<256x128xf32>
    %c1_48 = arith.constant 1 : index
    %c1_49 = arith.constant 1 : index
    %c0_50 = arith.constant 0 : index
    %65 = vector.load %arg11[%c1_48, %c1_49, %c0_50] : memref<18x18x128xf32, #tpu.memory_space<vmem>>, vector<16x16x128xf32>
    %66 = vector.shape_cast %65 : vector<16x16x128xf32> to vector<256x128xf32>
    %c1_51 = arith.constant 1 : index
    %c2_52 = arith.constant 2 : index
    %c0_53 = arith.constant 0 : index
    %67 = vector.load %arg11[%c1_51, %c2_52, %c0_53] : memref<18x18x128xf32, #tpu.memory_space<vmem>>, vector<16x16x128xf32>
    %68 = vector.shape_cast %67 : vector<16x16x128xf32> to vector<256x128xf32>
    %c2_54 = arith.constant 2 : index
    %c0_55 = arith.constant 0 : index
    %c0_56 = arith.constant 0 : index
    %69 = vector.load %arg11[%c2_54, %c0_55, %c0_56] : memref<18x18x128xf32, #tpu.memory_space<vmem>>, vector<16x16x128xf32>
    %70 = vector.shape_cast %69 : vector<16x16x128xf32> to vector<256x128xf32>
    %c2_57 = arith.constant 2 : index
    %c1_58 = arith.constant 1 : index
    %c0_59 = arith.constant 0 : index
    %71 = vector.load %arg11[%c2_57, %c1_58, %c0_59] : memref<18x18x128xf32, #tpu.memory_space<vmem>>, vector<16x16x128xf32>
    %72 = vector.shape_cast %71 : vector<16x16x128xf32> to vector<256x128xf32>
    %c2_60 = arith.constant 2 : index
    %c2_61 = arith.constant 2 : index
    %c0_62 = arith.constant 0 : index
    %73 = vector.load %arg11[%c2_60, %c2_61, %c0_62] : memref<18x18x128xf32, #tpu.memory_space<vmem>>, vector<16x16x128xf32>
    %74 = vector.shape_cast %73 : vector<16x16x128xf32> to vector<256x128xf32>
    %75 = tpu.concatenate %58, %60, %62, %64, %66, %68, %70, %72, %74 in 1 : vector<256x128xf32>, vector<256x128xf32>, vector<256x128xf32>, vector<256x128xf32>, vector<256x128xf32>, vector<256x128xf32>, vector<256x128xf32>, vector<256x128xf32>, vector<256x128xf32> -> vector<256x1152xf32>
    %c0_63 = arith.constant 0 : index
    %c0_64 = arith.constant 0 : index
    %76 = vector.load %arg6[%c0_63, %c0_64] : memref<1152x128xf32, #tpu.memory_space<vmem>>, vector<1152x128xf32>
    %cst_65 = arith.constant dense<0.000000e+00> : vector<256x128xf32>
    %77 = tpu.matmul %75, %76, %cst_65 {dimension_numbers = #tpu.dot_dimension_numbers<[1], [0], [0], [1], [0, 0, 1, 1], [], []>} : vector<256x1152xf32>, vector<1152x128xf32>, vector<256x128xf32> -> vector<256x128xf32>
    %78 = vector.shape_cast %77 : vector<256x128xf32> to vector<16x16x128xf32>
    %c0_66 = arith.constant 0 : index
    %c0_67 = arith.constant 0 : index
    %c0_68 = arith.constant 0 : index
    %c0_69 = arith.constant 0 : index
    %79 = vector.load %arg9[%c0_66, %c0_67, %c0_68, %c0_69] : memref<1x16x16x128xf32, #tpu.memory_space<vmem>>, vector<1x16x16x128xf32>
    %80 = vector.shape_cast %79 : vector<1x16x16x128xf32> to vector<16x16x128xf32>
    %81 = vector.shape_cast %78 : vector<16x16x128xf32> to vector<1x16x16x128xf32>
    tpu.vector_store %arg9[%c0_66, %c0_67, %c0_68, %c0_69], %81 {strides = array<i32>} : memref<1x16x16x128xf32, #tpu.memory_space<vmem>>, vector<1x16x16x128xf32>,
    %cst_70 = arith.constant dense<0.000000e+00> : vector<128xf32>
    %82 = vector.multi_reduction <add>, %77, %cst_70 [0] : vector<256x128xf32> to vector<128xf32>
    %83 = vector.shape_cast %82 : vector<128xf32> to vector<1x128xf32>
    %84 = arith.mulf %77, %77 : vector<256x128xf32>
    %cst_71 = arith.constant dense<0.000000e+00> : vector<128xf32>
    %85 = vector.multi_reduction <add>, %84, %cst_71 [0] : vector<256x128xf32> to vector<128xf32>
    %86 = vector.shape_cast %85 : vector<128xf32> to vector<1x128xf32>
    %cst_72 = arith.constant 0.000000e+00 : f32
    %87 = vector.broadcast %cst_72 : f32 to vector<6x128xf32>
    %88 = tpu.concatenate %83, %86, %87 in 0 : vector<1x128xf32>, vector<1x128xf32>, vector<6x128xf32> -> vector<8x128xf32>
    %c0_73 = arith.constant 0 : index
    %c0_74 = arith.constant 0 : index
    %c0_75 = arith.constant 0 : index
    %c0_76 = arith.constant 0 : index
    %89 = vector.load %arg10[%c0_73, %c0_74, %c0_75, %c0_76] : memref<1x1x8x128xf32, #tpu.memory_space<vmem>>, vector<1x1x8x128xf32>
    %90 = vector.shape_cast %89 : vector<1x1x8x128xf32> to vector<8x128xf32>
    %91 = vector.shape_cast %88 : vector<8x128xf32> to vector<1x1x8x128xf32>
    tpu.vector_store %arg10[%c0_73, %c0_74, %c0_75, %c0_76], %91 {strides = array<i32>} : memref<1x1x8x128xf32, #tpu.memory_space<vmem>>, vector<1x1x8x128xf32>,
    return
  }
  func.func @transform_0(%arg0: i32, %arg1: i32, %arg2: i32) -> (i32, i32, i32, i32) {
    %c0_i32 = arith.constant 0 : i32
    %c0_i32_0 = arith.constant 0 : i32
    %c0_i32_1 = arith.constant 0 : i32
    return %arg0, %arg2, %c0_i32, %c0_i32_0 : i32, i32, i32, i32
  }
  func.func @transform_1(%arg0: i32, %arg1: i32, %arg2: i32) -> (i32, i32, i32, i32) {
    %c16_i32 = arith.constant 16 : i32
    %0 = arith.muli %arg2, %c16_i32 : i32
    %c1_i32 = arith.constant 1 : i32
    %1 = arith.subi %0, %c1_i32 : i32
    %c0_i32 = arith.constant 0 : i32
    %2 = arith.maxsi %1, %c0_i32 : i32
    %c0_i32_0 = arith.constant 0 : i32
    %c0_i32_1 = arith.constant 0 : i32
    %c0_i32_2 = arith.constant 0 : i32
    return %arg0, %2, %c0_i32_0, %c0_i32_1 : i32, i32, i32, i32
  }
  func.func @transform_2(%arg0: i32, %arg1: i32, %arg2: i32) -> (i32, i32, i32, i32) {
    %c16_i32 = arith.constant 16 : i32
    %0 = arith.muli %arg2, %c16_i32 : i32
    %c16_i32_0 = arith.constant 16 : i32
    %1 = arith.addi %0, %c16_i32_0 : i32
    %c15_i32 = arith.constant 15 : i32
    %2 = arith.minsi %1, %c15_i32 : i32
    %c0_i32 = arith.constant 0 : i32
    %c0_i32_1 = arith.constant 0 : i32
    %c0_i32_2 = arith.constant 0 : i32
    return %arg0, %2, %c0_i32, %c0_i32_1 : i32, i32, i32, i32
  }
  func.func @transform_3(%arg0: i32, %arg1: i32, %arg2: i32) -> (i32, i32) {
    %c0_i32 = arith.constant 0 : i32
    %c0_i32_0 = arith.constant 0 : i32
    return %c0_i32, %arg1 : i32, i32
  }
  func.func @transform_4(%arg0: i32, %arg1: i32, %arg2: i32) -> (i32, i32) {
    %c0_i32 = arith.constant 0 : i32
    %c0_i32_0 = arith.constant 0 : i32
    %c0_i32_1 = arith.constant 0 : i32
    return %c0_i32, %c0_i32_0 : i32, i32
  }
  func.func @transform_5(%arg0: i32, %arg1: i32, %arg2: i32) -> (i32, i32) {
    %c0_i32 = arith.constant 0 : i32
    %c0_i32_0 = arith.constant 0 : i32
    %c0_i32_1 = arith.constant 0 : i32
    return %c0_i32, %c0_i32_0 : i32, i32
  }
  func.func @transform_6(%arg0: i32, %arg1: i32, %arg2: i32) -> (i32, i32, i32, i32) {
    %c0_i32 = arith.constant 0 : i32
    %c0_i32_0 = arith.constant 0 : i32
    return %arg0, %arg2, %c0_i32, %arg1 : i32, i32, i32, i32
  }
  func.func @transform_7(%arg0: i32, %arg1: i32, %arg2: i32) -> (i32, i32, i32, i32) {
    %c0_i32 = arith.constant 0 : i32
    %c0_i32_0 = arith.constant 0 : i32
    return %arg0, %arg2, %c0_i32, %arg1 : i32, i32, i32, i32
  }
}

</mosaic_0001>

<bundles_post_ra>
// kernel: double_conv_forward.2
= control target key start
LH: loop header
LB: loop body
LE: loop exit
PB: predicated region body
PF: predicated region fallthrough
CT: control target
= control target key end

     0   :  { %s3200_s24 = smov 0   ;;  %s3202_s25 = smov 0   ;;  %s4716_s0 = inlined_call_operand.vmem [shape: f32[2,16,16,4], index: 0, kind: input, shape index: {}, may-alias: {0,1,2}]   ;;  %s4717_s1 = inlined_call_operand.vmem [shape: f32[2,16,16,4], index: 1, kind: input, shape index: {}, may-alias: {0,1,2}]   ;;  %s4718_s2 = inlined_call_operand.vmem [shape: f32[2,16,16,4], index: 2, kind: input, shape index: {}, may-alias: {0,1,2}]   ;;  %s4719_s3 = inlined_call_operand.vmem [shape: f32[1152,128], index: 3, kind: input, shape index: {}]   ;;  %s4720_s4 = inlined_call_operand.vmem [shape: f32[1,4], index: 4, kind: input, shape index: {}, may-alias: {4,5}]   ;;  %s4721_s5 = inlined_call_operand.vmem [shape: f32[1,4], index: 5, kind: input, shape index: {}, may-alias: {4,5}]   ;;  %s4722_s6 = inlined_call_operand.vmem [shape: f32[2,16,16,128], index: 6, kind: output, shape index: {0}]   ;;  %s4723_s7 = inlined_call_operand.vmem [shape: f32[2,1,8,128], index: 7, kind: output, shape index: {1}]  }
   0x1   :  { %s3204_s26 = smov 0  }
   0x2 LB: > { %s37_s4 = sadd.s32 1, %s3152_s25  ;;  %p2570_p0 = scmp.ge.s32.totalorder %s3156_s26, 1  ;;  %s3156_s26 = sphi %s3204_s26, %s18_s26   ;;  %s3152_s25 = sphi %s3202_s25, %s4863_s25   ;;  %s3148_s24 = sphi %s3200_s24, %s4862_s24  }
   0x3   : > { %p39_p1 = scmp.ge.s32.totalorder %s37_s4, 2  ;;  %p348_p2 = scmp.lt.s32.totalorder %s3156_s26, 3 }
   0x5   : > { %s4865_s4 = smov (%p39_p1, %s37_s4), 0  ;;  %p349_p3 = pnand %p2570_p0, %p348_p2 }
   0x7   : > { %352 = sbr.rel (%p349_p3) target bundleno = 648 (0x288), region = 44 }
   0xe   : > { %v3223_v0 = vld [vmem:[%s4719_s3] sm:$0xff]  ;;  %v3228_v1 = vld [vmem:[%s4719_s3 + $0x8] sm:$0xff]  ;;  %v4724_v3 = vmov 0.0|0.0   ;;  %v3247_v6 = vld [vmem:[%s4719_s3 + $0x10] sm:$0xff]  ;;  %v3159_v8 = vmov 0.0   ;;  %p434_p4 = scmp.lt.s32.totalorder %s3148_s24, 1 }
   0xf   : > { %v3233_v2 = vld [vmem:[%s4719_s3 + $0x100] sm:$0xff]  ;;  %2716 = vmatprep.subr.bf16.mxu1 %v4724_v3  ;;  %2764 = vmatprep.subr.bf16.mxu0 %v4724_v3  ;;  %v2717_v4 = vpack.c.bf16 %v3228_v1, %v3223_v0  ;;  %v3242_v5 = vld [vmem:[%s4719_s3 + $0x108] sm:$0xff]  ;;  %v3252_v7 = vld [vmem:[%s4719_s3 + $0x18] sm:$0xff]  ;;  %506 = vst [vmem:[#allocation2] sm:$0xff] %v3159_v8  ;;  %vm593_vm0 = vcmask 31744   ;;  %vm2343_vm1 = vcmask 1040384  }
  0x10   : > { %507 = vst [vmem:[#allocation2 + $0x8] sm:$0xff] %v3159_v8  ;;  %508 = vst [vmem:[#allocation2 + $0x10] sm:$0x3] %v3159_v8  ;;  %v2765_v9 = vpack.c.bf16 %v3242_v5, %v3233_v2  ;;  %v970_v10 = vld [vmem:[%s4719_s3 + $0x110] sm:$0xff]  ;;  %v971_v11 = vld [vmem:[%s4719_s3 + $0x118] sm:$0xff]  ;;  %v2720_v12 = vpack.c.bf16 %v3252_v7, %v3247_v6  ;;  %s4867_s24 = smov (!%p434_p4, %s3148_s24), 1 }
  0x11   : > { %509 = vst [vmem:[#allocation2 + $0x18] sm:$0xff] %v3159_v8  ;;  %510 = vst [vmem:[#allocation2 + $0x20] sm:$0xff] %v3159_v8  ;;  %2718 = vmatpush1.bf16.msra.mxu1 %v2717_v4  ;;  %v2768_v13 = vpack.c.bf16 %v971_v11, %v970_v10  ;;  %v940_v14 = vld [vmem:[%s4719_s3 + $0x20] sm:$0xff]  ;;  %v941_v15 = vld [vmem:[%s4719_s3 + $0x28] sm:$0xff]  ;;  %s3311_s22 = sshll.u32 %s4867_s24, 8  ;;  %vm2345_vm2 = vcmask 1041408  }
  0x12   : > { %511 = vst [vmem:[#allocation2 + $0x28] sm:$0x3] %v3159_v8  ;;  %512 = vst [vmem:[#allocation2 + $0x30] sm:$0xff] %v3159_v8  ;;  %2766 = vmatpush1.bf16.msra.mxu0 %v2765_v9  ;;  %2719 = vmatprep.subr.bf16.mxu1 %v4724_v3  ;;  %v972_v16 = vld [vmem:[%s4719_s3 + $0x120] sm:$0xff]  ;;  %v973_v17 = vld [vmem:[%s4719_s3 + $0x128] sm:$0xff]  ;;  %v2723_v18 = vpack.c.bf16 %v941_v15, %v940_v14  ;;  %s3331_s12 = scalar_lea.vmem %s4716_s0, %s3311_s22  ;;  %s456_s15 = scalar_lea.vmem %s4717_s1, %s3311_s22 }
  0x13   : > { %513 = vst [vmem:[#allocation2 + $0x38] sm:$0xff] %v3159_v8  ;;  %514 = vst [vmem:[#allocation2 + $0x40] sm:$0x3] %v3159_v8  ;;  %2767 = vmatprep.subr.bf16.mxu0 %v4724_v3  ;;  %v2771_v19 = vpack.c.bf16 %v973_v17, %v972_v16  ;;  %v942_v20 = vld [vmem:[%s4719_s3 + $0x30] sm:$0xff]  ;;  %v943_v21 = vld [vmem:[%s4719_s3 + $0x38] sm:$0xff]  ;;  %s4468_s8 = scalar_lea.vmem %s4722_s6, %s3311_s22 }
  0x14   : > { %515 = vst [vmem:[#allocation2 + $0x48] sm:$0xff] %v3159_v8  ;;  %516 = vst [vmem:[#allocation2 + $0x50] sm:$0xff] %v3159_v8  ;;  %v974_v22 = vld [vmem:[%s4719_s3 + $0x130] sm:$0xff]  ;;  %v975_v23 = vld [vmem:[%s4719_s3 + $0x138] sm:$0xff]  ;;  %v2726_v24 = vpack.c.bf16 %v943_v21, %v942_v20 }
  0x15   : > { %517 = vst [vmem:[#allocation2 + $0x58] sm:$0x3] %v3159_v8  ;;  %518 = vst [vmem:[#allocation2 + $0x60] sm:$0xff] %v3159_v8  ;;  %2721 = vmatpush1.bf16.msra.mxu1 %v2720_v12  ;;  %v2774_v25 = vpack.c.bf16 %v975_v23, %v974_v22  ;;  %v944_v26 = vld [vmem:[%s4719_s3 + $0x40] sm:$0xff]  ;;  %v945_v27 = vld [vmem:[%s4719_s3 + $0x48] sm:$0xff] }
  0x16   : > { %519 = vst [vmem:[#allocation2 + $0x68] sm:$0xff] %v3159_v8  ;;  %520 = vst [vmem:[#allocation2 + $0x70] sm:$0x3] %v3159_v8  ;;  %2769 = vmatpush1.bf16.msra.mxu0 %v2768_v13  ;;  %2722 = vmatprep.subr.bf16.mxu1 %v4724_v3  ;;  %v976_v28 = vld [vmem:[%s4719_s3 + $0x140] sm:$0xff]  ;;  %v977_v29 = vld [vmem:[%s4719_s3 + $0x148] sm:$0xff]  ;;  %v2729_v30 = vpack.c.bf16 %v945_v27, %v944_v26 }
  0x17   : > { %521 = vst [vmem:[#allocation2 + $0x78] sm:$0xff] %v3159_v8  ;;  %522 = vst [vmem:[#allocation2 + $0x80] sm:$0xff] %v3159_v8  ;;  %2770 = vmatprep.subr.bf16.mxu0 %v4724_v3  ;;  %v2777_v31 = vpack.c.bf16 %v977_v29, %v976_v28  ;;  %v946_v32 = vld [vmem:[%s4719_s3 + $0x50] sm:$0xff]  ;;  %v947_v33 = vld [vmem:[%s4719_s3 + $0x58] sm:$0xff] }
  0x18   : > { %523 = vst [vmem:[#allocation2 + $0x88] sm:$0x3] %v3159_v8  ;;  %524 = vst [vmem:[#allocation2 + $0x90] sm:$0xff] %v3159_v8  ;;  %v978_v34 = vld [vmem:[%s4719_s3 + $0x150] sm:$0xff]  ;;  %v979_v35 = vld [vmem:[%s4719_s3 + $0x158] sm:$0xff]  ;;  %v2732_v36 = vpack.c.bf16 %v947_v33, %v946_v32 }
  0x19   : > { %525 = vst [vmem:[#allocation2 + $0x98] sm:$0xff] %v3159_v8  ;;  %526 = vst [vmem:[#allocation2 + $0xa0] sm:$0x3] %v3159_v8  ;;  %2724 = vmatpush1.bf16.msra.mxu1 %v2723_v18  ;;  %v2780_v37 = vpack.c.bf16 %v979_v35, %v978_v34  ;;  %v948_v38 = vld [vmem:[%s4719_s3 + $0x60] sm:$0xff]  ;;  %v949_v39 = vld [vmem:[%s4719_s3 + $0x68] sm:$0xff] }
  0x1a   : > { %527 = vst [vmem:[#allocation2 + $0xa8] sm:$0xff] %v3159_v8  ;;  %528 = vst [vmem:[#allocation2 + $0xb0] sm:$0xff] %v3159_v8  ;;  %2772 = vmatpush1.bf16.msra.mxu0 %v2771_v19  ;;  %2725 = vmatprep.subr.bf16.mxu1 %v4724_v3  ;;  %v980_v40 = vld [vmem:[%s4719_s3 + $0x160] sm:$0xff]  ;;  %v981_v41 = vld [vmem:[%s4719_s3 + $0x168] sm:$0xff]  ;;  %v2735_v46 = vpack.c.bf16 %v949_v39, %v948_v38 }
  0x1b   : > { %529 = vst [vmem:[#allocation2 + $0xb8] sm:$0x3] %v3159_v8  ;;  %530 = vst [vmem:[#allocation2 + $0xc0] sm:$0xff] %v3159_v8  ;;  %2773 = vmatprep.subr.bf16.mxu0 %v4724_v3  ;;  %v632_v42 = vld [vmem:[%s456_s15] sm:$0xff]  ;;  %v633_v45 = vld [vmem:[%s456_s15 + $0x8] sm:$0xff]  ;;  %v2783_v51 = vpack.c.bf16 %v981_v41, %v980_v40 }
  0x1c   : > { %531 = vst [vmem:[#allocation2 + $0xc8] sm:$0xff] %v3159_v8  ;;  %532 = vst [vmem:[#allocation2 + $0xd0] sm:$0x3] %v3159_v8  ;;  %v560_v43 = vld [vmem:[%s3331_s12] sm:$0xff]  ;;  %v635_v44 = vmul.f32 0.0, %v632_v42  ;;  %v950_v47 = vld [vmem:[%s4719_s3 + $0x70] sm:$0xff] }
  0x1d   : > { %533 = vst [vmem:[#allocation2 + $0xd8] sm:$0xff] %v3159_v8  ;;  %534 = vst [vmem:[#allocation2 + $0xe0] sm:$0xff] %v3159_v8  ;;  %2727 = vmatpush1.bf16.msra.mxu1 %v2726_v24  ;;  %v636_v48 = vmul.f32 0.0, %v633_v45  ;;  %v561_v49 = vld [vmem:[%s3331_s12 + $0x8] sm:$0xff]  ;;  %v562_v50 = vld [vmem:[%s3331_s12 + $0x10] sm:$0xff] }
  0x1e   : > { %535 = vst [vmem:[#allocation2 + $0xe8] sm:$0x3] %v3159_v8  ;;  %536 = vst [vmem:[#allocation2 + $0xf0] sm:$0xff] %v3159_v8  ;;  %2775 = vmatpush1.bf16.msra.mxu0 %v2774_v25  ;;  %2728 = vmatprep.subr.bf16.mxu1 %v4724_v3  ;;  %v951_v52 = vld [vmem:[%s4719_s3 + $0x78] sm:$0xff]  ;;  %v564_v54 = vld [vmem:[%s3331_s12 + $0x20] sm:$0xff] }
  0x1f   : > { %537 = vst [vmem:[#allocation2 + $0xf8] sm:$0xff] %v3159_v8  ;;  %538 = vst [vmem:[#allocation2 + $0x100] sm:$0x3] %v3159_v8  ;;  %2776 = vmatprep.subr.bf16.mxu0 %v4724_v3  ;;  %v563_v53 = vld [vmem:[%s3331_s12 + $0x18] sm:$0xff]  ;;  %v982_v55 = vld [vmem:[%s4719_s3 + $0x170] sm:$0xff]  ;;  %v2738_v59 = vpack.c.bf16 %v951_v52, %v950_v47 }
  0x20   : > { %539 = vst [vmem:[#allocation2 + $0x108] sm:$0xff] %v3159_v8  ;;  %540 = vst [vmem:[#allocation2 + $0x110] sm:$0xff] %v3159_v8  ;;  %v983_v56 = vld [vmem:[%s4719_s3 + $0x178] sm:$0xff]  ;;  %v565_v57 = vld [vmem:[%s3331_s12 + $0x28] sm:$0xff] }
  0x21   : > { %541 = vst [vmem:[#allocation2 + $0x118] sm:$0x3] %v3159_v8  ;;  %542 = vst [vmem:[#allocation2 + $0x120] sm:$0xff] %v3159_v8  ;;  %2730 = vmatpush1.bf16.msra.mxu1 %v2729_v30  ;;  %v566_v58 = vld [vmem:[%s3331_s12 + $0x30] sm:$0xff]  ;;  %v952_v60 = vld [vmem:[%s4719_s3 + $0x80] sm:$0xff]  ;;  %v2786_v63 = vpack.c.bf16 %v983_v56, %v982_v55 }
  0x22   : > { %543 = vst [vmem:[#allocation2 + $0x128] sm:$0xff] %v3159_v8  ;;  %544 = vst [vmem:[#allocation2 + $0x130] sm:$0x3] %v3159_v8  ;;  %2778 = vmatpush1.bf16.msra.mxu0 %v2777_v31  ;;  %2731 = vmatprep.subr.bf16.mxu1 %v4724_v3  ;;  %v567_v61 = vld [vmem:[%s3331_s12 + $0x38] sm:$0xff]  ;;  %v568_v62 = vld [vmem:[%s3331_s12 + $0x40] sm:$0xff] }
  0x23   : > { %545 = vst [vmem:[#allocation2 + $0x138] sm:$0xff] %v3159_v8  ;;  %546 = vst [vmem:[#allocation2 + $0x140] sm:$0xff] %v3159_v8  ;;  %2779 = vmatprep.subr.bf16.mxu0 %v4724_v3  ;;  %v953_v0 = vld [vmem:[%s4719_s3 + $0x88] sm:$0xff]  ;;  %v570_v2 = vld [vmem:[%s3331_s12 + $0x50] sm:$0xff] }
  0x24   : > { %547 = vst [vmem:[#allocation2 + $0x148] sm:$0x3] %v3159_v8  ;;  %548 = vst [vmem:[#allocation2 + $0x150] sm:$0xff] %v3159_v8  ;;  %v569_v1 = vld [vmem:[%s3331_s12 + $0x48] sm:$0xff]  ;;  %v984_v4 = vld [vmem:[%s4719_s3 + $0x180] sm:$0xff]  ;;  %v2741_v9 = vpack.c.bf16 %v953_v0, %v952_v60 }
  0x25   : > { %549 = vst [vmem:[#allocation2 + $0x158] sm:$0xff] %v3159_v8  ;;  %550 = vst [vmem:[#allocation2 + $0x160] sm:$0x3] %v3159_v8  ;;  %2733 = vmatpush1.bf16.msra.mxu1 %v2732_v36  ;;  %v985_v5 = vld [vmem:[%s4719_s3 + $0x188] sm:$0xff]  ;;  %v571_v7 = vld [vmem:[%s3331_s12 + $0x58] sm:$0xff] }
  0x26   : > { %551 = vst [vmem:[#allocation2 + $0x168] sm:$0xff] %v3159_v8  ;;  %552 = vst [vmem:[#allocation2 + $0x170] sm:$0xff] %v3159_v8  ;;  %2781 = vmatpush1.bf16.msra.mxu0 %v2780_v37  ;;  %2734 = vmatprep.subr.bf16.mxu1 %v4724_v3  ;;  %v2789_v11 = vpack.c.bf16 %v985_v5, %v984_v4  ;;  %v954_v12 = vld [vmem:[%s4719_s3 + $0x90] sm:$0xff]  ;;  %v955_v13 = vld [vmem:[%s4719_s3 + $0x98] sm:$0xff] }
  0x27   : > { %553 = vst [vmem:[#allocation2 + $0x178] sm:$0x3] %v3159_v8  ;;  %554 = vst [vmem:[#allocation2 + $0x180] sm:$0xff] %v3159_v8  ;;  %2782 = vmatprep.subr.bf16.mxu0 %v4724_v3  ;;  %v986_v14 = vld [vmem:[%s4719_s3 + $0x190] sm:$0xff]  ;;  %v987_v15 = vld [vmem:[%s4719_s3 + $0x198] sm:$0xff]  ;;  %v2744_v16 = vpack.c.bf16 %v955_v13, %v954_v12 }
  0x28   : > { %555 = vst [vmem:[#allocation2 + $0x188] sm:$0xff] %v3159_v8  ;;  %556 = vst [vmem:[#allocation2 + $0x190] sm:$0x3] %v3159_v8  ;;  %v2792_v17 = vpack.c.bf16 %v987_v15, %v986_v14  ;;  %v956_v18 = vld [vmem:[%s4719_s3 + $0xa0] sm:$0xff]  ;;  %v957_v19 = vld [vmem:[%s4719_s3 + $0xa8] sm:$0xff] }
  0x29   : > { %557 = vst [vmem:[#allocation2 + $0x198] sm:$0xff] %v3159_v8  ;;  %558 = vst [vmem:[#allocation2 + $0x1a0] sm:$0xff] %v3159_v8  ;;  %2736 = vmatpush1.bf16.msra.mxu1 %v2735_v46  ;;  %v988_v20 = vld [vmem:[%s4719_s3 + $0x1a0] sm:$0xff]  ;;  %v989_v21 = vld [vmem:[%s4719_s3 + $0x1a8] sm:$0xff]  ;;  %v2747_v22 = vpack.c.bf16 %v957_v19, %v956_v18 }
  0x2a   : > { %559 = vst [vmem:[#allocation2 + $0x1a8] sm:$0x3] %v3159_v8  ;;  %594 = vst.msk [vmem:[#allocation2 + $0x19] sm:$0xff] %vm593_vm0, %v560_v43  ;;  %2784 = vmatpush1.bf16.msra.mxu0 %v2783_v51  ;;  %2737 = vmatprep.subr.bf16.mxu1 %v4724_v3  ;;  %v572_v8 = vld [vmem:[%s3331_s12 + $0x60] sm:$0xff]  ;;  %v2795_v23 = vpack.c.bf16 %v989_v21, %v988_v20  ;;  %v958_v24 = vld [vmem:[%s4719_s3 + $0xb0] sm:$0xff] }
  0x2b   : > { %637 = vst.msk [vmem:[#allocation2 + $0x1] sm:$0xff] %vm593_vm0, %v635_v44  ;;  %595 = vst.msk [vmem:[#allocation2 + $0x21] sm:$0xff] %vm593_vm0, %v561_v49  ;;  %2785 = vmatprep.subr.bf16.mxu0 %v4724_v3  ;;  %v959_v25 = vld [vmem:[%s4719_s3 + $0xb8] sm:$0xff]  ;;  %v990_v26 = vld [vmem:[%s4719_s3 + $0x1b0] sm:$0xff] }
  0x2c   : > { %596 = vst.msk [vmem:[#allocation2 + $0x31] sm:$0xff] %vm593_vm0, %v562_v50  ;;  %638 = vst.msk [vmem:[#allocation2 + $0x9] sm:$0xff] %vm593_vm0, %v636_v48  ;;  %v991_v27 = vld [vmem:[%s4719_s3 + $0x1b8] sm:$0xff]  ;;  %v2750_v28 = vpack.c.bf16 %v959_v25, %v958_v24  ;;  %v960_v30 = vld [vmem:[%s4719_s3 + $0xc0] sm:$0xff] }
  0x2d   : > { %597 = vst.msk [vmem:[#allocation2 + $0x39] sm:$0xff] %vm593_vm0, %v563_v53  ;;  %598 = vst.msk [vmem:[#allocation2 + $0x49] sm:$0xff] %vm593_vm0, %v564_v54  ;;  %2739 = vmatpush1.bf16.msra.mxu1 %v2738_v59  ;;  %v2798_v29 = vpack.c.bf16 %v991_v27, %v990_v26  ;;  %v961_v31 = vld [vmem:[%s4719_s3 + $0xc8] sm:$0xff]  ;;  %v992_v32 = vld [vmem:[%s4719_s3 + $0x1c0] sm:$0xff] }
  0x2e   : > { %599 = vst.msk [vmem:[#allocation2 + $0x51] sm:$0xff] %vm593_vm0, %v565_v57  ;;  %600 = vst.msk [vmem:[#allocation2 + $0x61] sm:$0xff] %vm593_vm0, %v566_v58  ;;  %2787 = vmatpush1.bf16.msra.mxu0 %v2786_v63  ;;  %2740 = vmatprep.subr.bf16.mxu1 %v4724_v3  ;;  %v993_v33 = vld [vmem:[%s4719_s3 + $0x1c8] sm:$0xff]  ;;  %v574_v35 = vld [vmem:[%s3331_s12 + $0x70] sm:$0xff]  ;;  %v2753_v36 = vpack.c.bf16 %v961_v31, %v960_v30 }
  0x2f   : > { %601 = vst.msk [vmem:[#allocation2 + $0x69] sm:$0xff] %vm593_vm0, %v567_v61  ;;  %602 = vst.msk [vmem:[#allocation2 + $0x79] sm:$0xff] %vm593_vm0, %v568_v62  ;;  %2788 = vmatprep.subr.bf16.mxu0 %v4724_v3  ;;  %v573_v34 = vld [vmem:[%s3331_s12 + $0x68] sm:$0xff]  ;;  %v962_v37 = vld [vmem:[%s4719_s3 + $0xd0] sm:$0xff]  ;;  %v2801_v38 = vpack.c.bf16 %v993_v33, %v992_v32 }
  0x30   : > { %603 = vst.msk [vmem:[#allocation2 + $0x81] sm:$0xff] %vm593_vm0, %v569_v1  ;;  %604 = vst.msk [vmem:[#allocation2 + $0x91] sm:$0xff] %vm593_vm0, %v570_v2  ;;  %v963_v39 = vld [vmem:[%s4719_s3 + $0xd8] sm:$0xff]  ;;  %v576_v41 = vld [vmem:[%s3331_s12 + $0x80] sm:$0xff] }
  0x31   : > { %v3401_v6 = vld [vmem:[#allocation2 + $0x18] sm:$0xff]  ;;  %605 = vst.msk [vmem:[#allocation2 + $0x99] sm:$0xff] %vm593_vm0, %v571_v7  ;;  %606 = vst.msk [vmem:[#allocation2 + $0xa9] sm:$0xff] %vm593_vm0, %v572_v8  ;;  %2742 = vmatpush1.bf16.msra.mxu1 %v2741_v9  ;;  %v994_v42 = vld [vmem:[%s4719_s3 + $0x1d0] sm:$0xff]  ;;  %v2756_v46 = vpack.c.bf16 %v963_v39, %v962_v37 }
  0x32   : > { %1369 = vmatprep.mubr.f32.mxu0 %v3401_v6  ;;  %v679_v10 = vld [vmem:[#allocation2 + $0x1] sm:$0xff]  ;;  %2790 = vmatpush1.bf16.msra.mxu0 %v2789_v11  ;;  %607 = vst.msk [vmem:[#allocation2 + $0xb1] sm:$0xff] %vm593_vm0, %v573_v34  ;;  %608 = vst.msk [vmem:[#allocation2 + $0xc1] sm:$0xff] %vm593_vm0, %v574_v35  ;;  %v575_v40 = vld [vmem:[%s3331_s12 + $0x78] sm:$0xff] }
  0x33   : > { %1144 = vmatprep.mubr.f32.mxu1 %v679_v10  ;;  %2743 = vmatprep.subr.bf16.mxu1 %v4724_v3  ;;  %v995_v43 = vld [vmem:[%s4719_s3 + $0x1d8] sm:$0xff]  ;;  %609 = vst.msk [vmem:[#allocation2 + $0xc9] sm:$0xff] %vm593_vm0, %v575_v40  ;;  %610 = vst.msk [vmem:[#allocation2 + $0xd9] sm:$0xff] %vm593_vm0, %v576_v41  ;;  %v577_v44 = vld [vmem:[%s3331_s12 + $0x88] sm:$0xff] }
  0x34   : > { %2791 = vmatprep.subr.bf16.mxu0 %v4724_v3  ;;  %v578_v45 = vld [vmem:[%s3331_s12 + $0x90] sm:$0xff]  ;;  %v964_v47 = vld [vmem:[%s4719_s3 + $0xe0] sm:$0xff]  ;;  %611 = vst.msk [vmem:[#allocation2 + $0xe1] sm:$0xff] %vm593_vm0, %v577_v44  ;;  %v2804_v48 = vpack.c.bf16 %v995_v43, %v994_v42  ;;  %v965_v49 = vld [vmem:[%s4719_s3 + $0xe8] sm:$0xff] }
  0x35   : > { %2745 = vmatpush1.bf16.msra.mxu1 %v2744_v16  ;;  %612 = vst.msk [vmem:[#allocation2 + $0xf1] sm:$0xff] %vm593_vm0, %v578_v45  ;;  %v579_v50 = vld [vmem:[%s3331_s12 + $0x98] sm:$0xff]  ;;  %v580_v51 = vld [vmem:[%s3331_s12 + $0xa0] sm:$0xff]  ;;  %v997_v53 = vld [vmem:[%s4719_s3 + $0x1e8] sm:$0xff]  ;;  %v2759_v54 = vpack.c.bf16 %v965_v49, %v964_v47 }
  0x36   : > { %2793 = vmatpush1.bf16.msra.mxu0 %v2792_v17  ;;  %2746 = vmatprep.subr.bf16.mxu1 %v4724_v3  ;;  %v996_v52 = vld [vmem:[%s4719_s3 + $0x1e0] sm:$0xff]  ;;  %613 = vst.msk [vmem:[#allocation2 + $0xf9] sm:$0xff] %vm593_vm0, %v579_v50  ;;  %614 = vst.msk [vmem:[#allocation2 + $0x109] sm:$0xff] %vm593_vm0, %v580_v51  ;;  %v966_v56 = vld [vmem:[%s4719_s3 + $0xf0] sm:$0xff] }
  0x37   : > { %2794 = vmatprep.subr.bf16.mxu0 %v4724_v3  ;;  %v2807_v55 = vpack.c.bf16 %v997_v53, %v996_v52  ;;  %v967_v57 = vld [vmem:[%s4719_s3 + $0xf8] sm:$0xff]  ;;  %v998_v58 = vld [vmem:[%s4719_s3 + $0x1f0] sm:$0xff]  ;;  %v1000_v62 = vld [vmem:[%s4719_s3 + $0x200] sm:$0xff] }
  0x38   : > { %v999_v59 = vld [vmem:[%s4719_s3 + $0x1f8] sm:$0xff]  ;;  %v2762_v60 = vpack.c.bf16 %v967_v57, %v966_v56  ;;  %v1001_v63 = vld [vmem:[%s4719_s3 + $0x208] sm:$0xff]  ;;  %v1032_v1 = vld [vmem:[%s4719_s3 + $0x300] sm:$0xff] }
  0x39   : > { %2748 = vmatpush1.bf16.msra.mxu1 %v2747_v22  ;;  %v2810_v61 = vpack.c.bf16 %v999_v59, %v998_v58  ;;  %v581_v0 = vld [vmem:[%s3331_s12 + $0xa8] sm:$0xff]  ;;  %v647_v4 = vld [vmem:[#allocation2] sm:$0xff]  ;;  %v582_v5 = vld [vmem:[%s3331_s12 + $0xb0] sm:$0xff]  ;;  %v2813_v8 = vpack.c.bf16 %v1001_v63, %v1000_v62 }
  0x3a   : > { %2796 = vmatpush1.bf16.msra.mxu0 %v2795_v23  ;;  %2749 = vmatprep.subr.bf16.mxu1 %v4724_v3  ;;  %v1033_v2 = vld [vmem:[%s4719_s3 + $0x308] sm:$0xff]  ;;  %615 = vst.msk [vmem:[#allocation2 + $0x111] sm:$0xff] %vm593_vm0, %v581_v0  ;;  %v1002_v10 = vld [vmem:[%s4719_s3 + $0x210] sm:$0xff]  ;;  %616 = vst.msk [vmem:[#allocation2 + $0x121] sm:$0xff] %vm593_vm0, %v582_v5 }
  0x3b   : > { %2797 = vmatprep.subr.bf16.mxu0 %v4724_v3  ;;  %v711_v7 = vld [vmem:[#allocation2 + $0x2] sm:$0xff]  ;;  %v1003_v12 = vld [vmem:[%s4719_s3 + $0x218] sm:$0xff]  ;;  %v3552_v13 = vpack.c.bf16 %v1033_v2, %v1032_v1  ;;  %v1034_v15 = vld [vmem:[%s4719_s3 + $0x310] sm:$0xff] }
  0x3c   : > { %v680_v9 = vld [vmem:[#allocation2 + $0x9] sm:$0xff]  ;;  %v3547_v11 = vld [vmem:[#allocation2 + $0x20] sm:$0xff]  ;;  %v583_v14 = vld [vmem:[%s3331_s12 + $0xb8] sm:$0xff]  ;;  %v2816_v22 = vpack.c.bf16 %v1003_v12, %v1002_v10 }
  0x3d   : > { %2751 = vmatpush1.bf16.msra.mxu1 %v2750_v28  ;;  %v1035_v16 = vld [vmem:[%s4719_s3 + $0x318] sm:$0xff]  ;;  %617 = vst.msk [vmem:[#allocation2 + $0x129] sm:$0xff] %vm593_vm0, %v583_v14  ;;  %v584_v17 = vld [vmem:[%s3331_s12 + $0xc0] sm:$0xff]  ;;  %v648_v18 = vld [vmem:[#allocation2 + $0x8] sm:$0xff] }
  0x3e   : > { %2799 = vmatpush1.bf16.msra.mxu0 %v2798_v29  ;;  %2752 = vmatprep.subr.bf16.mxu1 %v4724_v3  ;;  %618 = vst.msk [vmem:[#allocation2 + $0x139] sm:$0xff] %vm593_vm0, %v584_v17  ;;  %v585_v19 = vld [vmem:[%s3331_s12 + $0xc8] sm:$0xff]  ;;  %v3566_v21 = vld [vmem:[#allocation2 + $0x19] sm:$0xff]  ;;  %v586_v23 = vld [vmem:[%s3331_s12 + $0xd0] sm:$0xff]  ;;  %v3580_v27 = vpack.c.bf16 %v1035_v16, %v1034_v15 }
  0x3f   : > { %2800 = vmatprep.subr.bf16.mxu0 %v4724_v3  ;;  %v712_v20 = vld [vmem:[#allocation2 + $0xa] sm:$0xff]  ;;  %619 = vst.msk [vmem:[#allocation2 + $0x141] sm:$0xff] %vm593_vm0, %v585_v19  ;;  %v1004_v25 = vld [vmem:[%s4719_s3 + $0x220] sm:$0xff]  ;;  %620 = vst.msk [vmem:[#allocation2 + $0x151] sm:$0xff] %vm593_vm0, %v586_v23 }
  0x40   : > { %v3570_v24 = vld [vmem:[#allocation2 + $0x30] sm:$0xff]  ;;  %v1005_v26 = vld [vmem:[%s4719_s3 + $0x228] sm:$0xff]  ;;  %v1036_v28 = vld [vmem:[%s4719_s3 + $0x320] sm:$0xff] }
  0x41   : > { %2754 = vmatpush1.bf16.msra.mxu1 %v2753_v36  ;;  %v1037_v29 = vld [vmem:[%s4719_s3 + $0x328] sm:$0xff]  ;;  %v3592_v30 = vld [vmem:[#allocation2 + $0x1a] sm:$0xff]  ;;  %v2819_v32 = vpack.c.bf16 %v1005_v26, %v1004_v25  ;;  %v1006_v35 = vld [vmem:[%s4719_s3 + $0x230] sm:$0xff] }
  0x42   : > { %2802 = vmatpush1.bf16.msra.mxu0 %v2801_v38  ;;  %2755 = vmatprep.subr.bf16.mxu1 %v4724_v3  ;;  %v3594_v31 = vld [vmem:[#allocation2 + $0x21] sm:$0xff]  ;;  %v587_v33 = vld [vmem:[%s3331_s12 + $0xd8] sm:$0xff]  ;;  %v3607_v37 = vpack.c.bf16 %v1037_v29, %v1036_v28  ;;  %v1038_v38 = vld [vmem:[%s4719_s3 + $0x330] sm:$0xff] }
  0x43   : > { %2803 = vmatprep.subr.bf16.mxu0 %v4724_v3  ;;  %v3597_v34 = vld [vmem:[#allocation2 + $0x38] sm:$0xff]  ;;  %621 = vst.msk [vmem:[#allocation2 + $0x159] sm:$0xff] %vm593_vm0, %v587_v33  ;;  %v3621_v40 = vld [vmem:[#allocation2 + $0x22] sm:$0xff]  ;;  %v1010_v53 = vld [vmem:[%s4719_s3 + $0x250] sm:$0xff] }
  0x44   : > { %v1007_v36 = vld [vmem:[%s4719_s3 + $0x238] sm:$0xff]  ;;  %v1008_v42 = vld [vmem:[%s4719_s3 + $0x240] sm:$0xff]  ;;  %v3628_v43 = vld [vmem:[#allocation2 + $0x48] sm:$0xff] }
  0x45   : > { %2757 = vmatpush1.bf16.msra.mxu1 %v2756_v46  ;;  %v1039_v39 = vld [vmem:[%s4719_s3 + $0x338] sm:$0xff]  ;;  %v2822_v41 = vpack.c.bf16 %v1007_v36, %v1006_v35  ;;  %v1009_v44 = vld [vmem:[%s4719_s3 + $0x248] sm:$0xff]  ;;  %v588_v46 = vld [vmem:[%s3331_s12 + $0xe0] sm:$0xff] }
  0x46   : > { %2805 = vmatpush1.bf16.msra.mxu0 %v2804_v48  ;;  %2758 = vmatprep.subr.bf16.mxu1 %v4724_v3  ;;  %v3635_v45 = vpack.c.bf16 %v1039_v39, %v1038_v38  ;;  %v1040_v47 = vld [vmem:[%s4719_s3 + $0x340] sm:$0xff]  ;;  %v1041_v48 = vld [vmem:[%s4719_s3 + $0x348] sm:$0xff]  ;;  %622 = vst.msk [vmem:[#allocation2 + $0x169] sm:$0xff] %vm593_vm0, %v588_v46  ;;  %v3651_v50 = vld [vmem:[#allocation2 + $0x32] sm:$0xff]  ;;  %v2825_v52 = vpack.c.bf16 %v1009_v44, %v1008_v42 }
  0x47   : > { %2806 = vmatprep.subr.bf16.mxu0 %v4724_v3  ;;  %v589_v49 = vld [vmem:[%s3331_s12 + $0xe8] sm:$0xff]  ;;  %v3653_v51 = vld [vmem:[#allocation2 + $0x39] sm:$0xff]  ;;  %v3664_v56 = vpack.c.bf16 %v1041_v48, %v1040_v47  ;;  %v590_v57 = vld [vmem:[%s3331_s12 + $0xf0] sm:$0xff] }
  0x48   : > { %623 = vst.msk [vmem:[#allocation2 + $0x171] sm:$0xff] %vm593_vm0, %v589_v49  ;;  %v1042_v58 = vld [vmem:[%s4719_s3 + $0x350] sm:$0xff]  ;;  %v1043_v59 = vld [vmem:[%s4719_s3 + $0x358] sm:$0xff]  ;;  %624 = vst.msk [vmem:[#allocation2 + $0x181] sm:$0xff] %vm593_vm0, %v590_v57 }
  0x49   : > { %2760 = vmatpush1.bf16.msra.mxu1 %v2759_v54  ;;  %v748_v54 = vld [vmem:[#allocation2 + $0x50] sm:$0xff]  ;;  %v749_v0 = vld [vmem:[#allocation2 + $0x60] sm:$0xff]  ;;  %v1013_v2 = vld [vmem:[%s4719_s3 + $0x268] sm:$0xff] }
  0x4a   : > { %2808 = vmatpush1.bf16.msra.mxu0 %v2807_v55  ;;  %2761 = vmatprep.subr.bf16.mxu1 %v4724_v3  ;;  %v1011_v55 = vld [vmem:[%s4719_s3 + $0x258] sm:$0xff]  ;;  %v3681_v62 = vld [vmem:[#allocation2 + $0x49] sm:$0xff]  ;;  %v1012_v1 = vld [vmem:[%s4719_s3 + $0x260] sm:$0xff] }
  0x4b   : > { %2809 = vmatprep.subr.bf16.mxu0 %v4724_v3  ;;  %v2828_v63 = vpack.c.bf16 %v1011_v55, %v1010_v53  ;;  %v1044_v5 = vld [vmem:[%s4719_s3 + $0x360] sm:$0xff]  ;;  %v2831_v10 = vpack.c.bf16 %v1013_v2, %v1012_v1  ;;  %v1014_v12 = vld [vmem:[%s4719_s3 + $0x270] sm:$0xff]  ;;  %v1015_v14 = vld [vmem:[%s4719_s3 + $0x278] sm:$0xff] }
  0x4c   : > { %v1046_v16 = vld [vmem:[%s4719_s3 + $0x370] sm:$0xff]  ;;  %v1047_v17 = vld [vmem:[%s4719_s3 + $0x378] sm:$0xff]  ;;  %v3730_v19 = vld [vmem:[#allocation2 + $0x61] sm:$0xff] }
  0x4d   : > { %2763 = vmatpush1.bf16.msra.mxu1 %v2762_v60  ;;  %v591_v60 = vld [vmem:[%s3331_s12 + $0xf8] sm:$0xff]  ;;  %v1016_v23 = vld [vmem:[%s4719_s3 + $0x280] sm:$0xff]  ;;  %v3740_v25 = vpack.c.bf16 %v1047_v17, %v1046_v16  ;;  %v1049_v28 = vld [vmem:[%s4719_s3 + $0x388] sm:$0xff]  ;;  %s2585_s12 = sadd.s32 240, %s3311_s22  ;;  %s2579_s22 = sshll.u32 %s4867_s24, 3 }
  0x4e   : > { %2811 = vmatpush1.bf16.msra.mxu0 %v2810_v61  ;;  %2940 = vmatprep.subr.bf16.mxu1 %v4724_v3  ;;  %v3679_v61 = vld [vmem:[#allocation2 + $0x3a] sm:$0xff]  ;;  %625 = vst.msk [vmem:[#allocation2 + $0x189] sm:$0xff] %vm593_vm0, %v591_v60  ;;  %v3751_v29 = vld [vmem:[#allocation2 + $0x62] sm:$0xff]  ;;  %v1018_v35 = vld [vmem:[%s4719_s3 + $0x290] sm:$0xff]  ;;  %s473_s17 = scalar_lea.vmem %s4718_s2, %s2585_s12  ;;  %s505_s11 = scalar_lea.vmem %s4723_s7, %s2579_s22 }
  0x4f   : > { %2812 = vmatprep.subr.bf16.mxu0 %v4724_v3  ;;  %v1048_v26 = vld [vmem:[%s4719_s3 + $0x380] sm:$0xff]  ;;  %v1019_v36 = vld [vmem:[%s4719_s3 + $0x298] sm:$0xff]  ;;  %v1050_v39 = vld [vmem:[%s4719_s3 + $0x390] sm:$0xff] }
  0x50   : > { %1145 = vmatmul.mubr.f32.vlgmr.msra.gmra.mrb[0].mxu1 %v647_v4  ;;  %v3692_v4 = vpack.c.bf16 %v1043_v59, %v1042_v58  ;;  %v3763_v38 = vpack.c.bf16 %v1049_v28, %v1048_v26  ;;  %v3774_v42 = vld [vmem:[#allocation2 + $0x6a] sm:$0xff]  ;;  %v2840_v44 = vpack.c.bf16 %v1019_v36, %v1018_v35  ;;  %v1020_v47 = vld [vmem:[%s4719_s3 + $0x2a0] sm:$0xff]  ;;  %v3804_v58 = vld [vmem:[#allocation2 + $0x98] sm:$0xff] }
  0x51   : > { %1370 = vmatmul.mubr.f32.vlgmr.msra.gmra.mrb[0].mxu0 %v711_v7  ;;  %1149 = vmatprep.mubr.f32.mxu1 %v680_v9  ;;  %v1045_v7 = vld [vmem:[%s4719_s3 + $0x368] sm:$0xff]  ;;  %v3706_v9 = vld [vmem:[#allocation2 + $0x51] sm:$0xff]  ;;  %v1056_v16 = vld [vmem:[%s4719_s3 + $0x3c0] sm:$0xff] }
  0x52   : > { %2814 = vmatpush1.bf16.msra.mxu0 %v2813_v8  ;;  %1374 = vmatprep.mubr.f32.mxu0 %v3547_v11  ;;  %v3704_v8 = vld [vmem:[#allocation2 + $0x4a] sm:$0xff]  ;;  %v3716_v15 = vpack.c.bf16 %v1045_v7, %v1044_v5  ;;  %v3802_v55 = vld [vmem:[#allocation2 + $0x81] sm:$0xff]  ;;  %v1023_v60 = vld [vmem:[%s4719_s3 + $0x2b8] sm:$0xff] }
  0x53   : > { %2815 = vmatprep.subr.bf16.mxu0 %v4724_v3  ;;  %2956 = vmatpush1.bf16.msra.mxu1 %v3552_v13  ;;  %v3778_v46 = vld [vmem:[#allocation2 + $0x90] sm:$0xff]  ;;  %v1021_v48 = vld [vmem:[%s4719_s3 + $0x2a8] sm:$0xff]  ;;  %v1055_v1 = vld [vmem:[%s4719_s3 + $0x3b8] sm:$0xff] }
  0x54   : > { %1150 = vmatmul.mubr.f32.gmra.mrb[2].mxu1 %v648_v18  ;;  %2941 = vmatprep.subr.bf16.mxu1 %v4724_v3  ;;  %v3728_v18 = vld [vmem:[#allocation2 + $0x52] sm:$0xff]  ;;  %v1053_v53 = vld [vmem:[%s4719_s3 + $0x3a8] sm:$0xff]  ;;  %v2843_v57 = vpack.c.bf16 %v1021_v48, %v1020_v47  ;;  %v3879_v36 = vld [vmem:[#allocation2 + $0x9a] sm:$0xff] }
  0x55   : > { %1375 = vmatmul.mubr.f32.gmra.mrb[2].mxu0 %v712_v20  ;;  %1154 = vmatprep.mubr.f32.mxu1 %v3566_v21  ;;  %v2834_v20 = vpack.c.bf16 %v1015_v14, %v1014_v12  ;;  %v1022_v59 = vld [vmem:[%s4719_s3 + $0x2b0] sm:$0xff]  ;;  %v3826_v2 = vld [vmem:[#allocation2 + $0x82] sm:$0xff]  ;;  %v1027_v28 = vld [vmem:[%s4719_s3 + $0x2d8] sm:$0xff]  ;;  %4784 = vst [vmem:[#allocation6_spill] sm:$0xff] %v3879_v36 }
  0x56   : > { %1379 = vmatprep.mubr.f32.mxu0 %v3570_v24  ;;  %2817 = vmatpush1.bf16.msra.mxu0 %v2816_v22  ;;  %v751_v22 = vld [vmem:[#allocation2 + $0x78] sm:$0xff]  ;;  %v2846_v7 = vpack.c.bf16 %v1023_v60, %v1022_v59  ;;  %v1025_v12 = vld [vmem:[%s4719_s3 + $0x2c8] sm:$0xff]  ;;  %v1026_v26 = vld [vmem:[%s4719_s3 + $0x2d0] sm:$0xff] }
  0x57   : > { %2818 = vmatprep.subr.bf16.mxu0 %v4724_v3  ;;  %2957 = vmatpush1.bf16.msra.mxu1 %v3580_v27  ;;  %v3828_v5 = vld [vmem:[#allocation2 + $0x91] sm:$0xff]  ;;  %v1057_v17 = vld [vmem:[%s4719_s3 + $0x3c8] sm:$0xff]  ;;  %v1028_v47 = vld [vmem:[%s4719_s3 + $0x2e0] sm:$0xff] }
  0x58   : > { %1155 = vmatmul.mubr.f32.gmra.mrb[4].mxu1 %v3401_v6  ;;  %2942 = vmatprep.subr.bf16.mxu1 %v4724_v3  ;;  %v3623_v6 = vld [vmem:[#allocation2 + $0x31] sm:$0xff]  ;;  %v1029_v48 = vld [vmem:[%s4719_s3 + $0x2e8] sm:$0xff] }
  0x59   : > { %1380 = vmatmul.mubr.f32.gmra.mrb[4].mxu0 %v3592_v30  ;;  %1159 = vmatprep.mubr.f32.mxu1 %v3594_v31  ;;  %v1059_v35 = vld [vmem:[%s4719_s3 + $0x3d8] sm:$0xff]  ;;  %v3906_v59 = vld [vmem:[#allocation2 + $0xaa] sm:$0xff] }
  0x5a   : > { %1384 = vmatprep.mubr.f32.mxu0 %v3597_v34  ;;  %2820 = vmatpush1.bf16.msra.mxu0 %v2819_v32  ;;  %v3753_v32 = vld [vmem:[#allocation2 + $0x69] sm:$0xff]  ;;  %4786 = vst [vmem:[#allocation8_spill] sm:$0xff] %v3906_v59  ;;  %v3908_v60 = vld [vmem:[#allocation2 + $0xb1] sm:$0xff] }
  0x5b   : > { %2821 = vmatprep.subr.bf16.mxu0 %v4724_v3  ;;  %2958 = vmatpush1.bf16.msra.mxu1 %v3607_v37 }
  0x5c   : > { %1160 = vmatmul.mubr.f32.gmra.mrb[6].mxu1 %v3547_v11  ;;  %2943 = vmatprep.subr.bf16.mxu1 %v4724_v3  ;;  %v750_v11 = vld [vmem:[#allocation2 + $0x68] sm:$0xff] }
  0x5d   : > { %1385 = vmatmul.mubr.f32.gmra.mrb[6].mxu0 %v3621_v40  ;;  %1164 = vmatprep.mubr.f32.mxu1 %v3623_v6 }
  0x5e   : > { %1389 = vmatprep.mubr.f32.mxu0 %v3628_v43  ;;  %2823 = vmatpush1.bf16.msra.mxu0 %v2822_v41  ;;  %v1051_v41 = vld [vmem:[%s4719_s3 + $0x398] sm:$0xff] }
  0x5f   : > { %2824 = vmatprep.subr.bf16.mxu0 %v4724_v3  ;;  %2959 = vmatpush1.bf16.msra.mxu1 %v3635_v45  ;;  %v3788_v49 = vpack.c.bf16 %v1051_v41, %v1050_v39  ;;  %v3881_v39 = vld [vmem:[#allocation2 + $0xa9] sm:$0xff]  ;;  %v2852_v41 = vpack.c.bf16 %v1027_v28, %v1026_v26  ;;  %v3939_v28 = vld [vmem:[#allocation2 + $0xb2] sm:$0xff] }
  0x60   : > { %1165 = vmatmul.mubr.f32.gmra.mrb[8].mxu1 %v3570_v24  ;;  %2944 = vmatprep.subr.bf16.mxu1 %v4724_v3  ;;  %v1017_v24 = vld [vmem:[%s4719_s3 + $0x288] sm:$0xff]  ;;  %4788 = vst [vmem:[#allocation10_spill] sm:$0xff] %v3939_v28 }
  0x61   : > { %1390 = vmatmul.mubr.f32.gmra.mrb[8].mxu0 %v3651_v50  ;;  %1169 = vmatprep.mubr.f32.mxu1 %v3653_v51  ;;  %v2837_v33 = vpack.c.bf16 %v1017_v24, %v1016_v23  ;;  %v3856_v24 = vld [vmem:[#allocation2 + $0xb0] sm:$0xff]  ;;  %v1065_v26 = vld [vmem:[%s4719_s3 + $0x408] sm:$0xff] }
  0x62   : > { %1394 = vmatprep.mubr.f32.mxu0 %v748_v54  ;;  %2826 = vmatpush1.bf16.msra.mxu0 %v2825_v52  ;;  %v1052_v52 = vld [vmem:[%s4719_s3 + $0x3a0] sm:$0xff] }
  0x63   : > { %2827 = vmatprep.subr.bf16.mxu0 %v4724_v3  ;;  %2960 = vmatpush1.bf16.msra.mxu1 %v3664_v56 }
  0x64   : > { %1170 = vmatmul.mubr.f32.gmra.mrb[10].mxu1 %v3597_v34  ;;  %2945 = vmatprep.subr.bf16.mxu1 %v4724_v3  ;;  %v752_v34 = vld [vmem:[#allocation2 + $0x80] sm:$0xff] }
  0x65   : > { %1395 = vmatmul.mubr.f32.gmra.mrb[10].mxu0 %v3679_v61  ;;  %1174 = vmatprep.mubr.f32.mxu1 %v3681_v62 }
  0x66   : > { %1399 = vmatprep.mubr.f32.mxu0 %v749_v0  ;;  %2829 = vmatpush1.bf16.msra.mxu0 %v2828_v63  ;;  %v3814_v63 = vpack.c.bf16 %v1053_v53, %v1052_v52  ;;  %v1060_v53 = vld [vmem:[%s4719_s3 + $0x3e0] sm:$0xff] }
  0x67   : > { %2830 = vmatprep.subr.bf16.mxu0 %v4724_v3  ;;  %2961 = vmatpush1.bf16.msra.mxu1 %v3692_v4 }
  0x68   : > { %1175 = vmatmul.mubr.f32.gmra.mrb[12].mxu1 %v3628_v43  ;;  %2946 = vmatprep.subr.bf16.mxu1 %v4724_v3  ;;  %v3776_v43 = vld [vmem:[#allocation2 + $0x79] sm:$0xff]  ;;  %4781 = vst [vmem:[#allocation3_spill] sm:$0xff] %v3814_v63 }
  0x69   : > { %1400 = vmatmul.mubr.f32.gmra.mrb[12].mxu0 %v3704_v8  ;;  %1179 = vmatprep.mubr.f32.mxu1 %v3706_v9 }
  0x6a   : > { %1404 = vmatprep.mubr.f32.mxu0 %v750_v11  ;;  %2832 = vmatpush1.bf16.msra.mxu0 %v2831_v10  ;;  %v3830_v10 = vld [vmem:[#allocation2 + $0xa8] sm:$0xff] }
  0x6b   : > { %2833 = vmatprep.subr.bf16.mxu0 %v4724_v3  ;;  %2962 = vmatpush1.bf16.msra.mxu1 %v3716_v15 }
  0x6c   : > { %1180 = vmatmul.mubr.f32.gmra.mrb[14].mxu1 %v748_v54  ;;  %2947 = vmatprep.subr.bf16.mxu1 %v4724_v3  ;;  %v3800_v54 = vld [vmem:[#allocation2 + $0x7a] sm:$0xff] }
  0x6d   : > { %1405 = vmatmul.mubr.f32.gmra.mrb[14].mxu0 %v3728_v18  ;;  %1184 = vmatprep.mubr.f32.mxu1 %v3730_v19 }
  0x6e   : > { %1409 = vmatprep.mubr.f32.mxu0 %v751_v22  ;;  %2835 = vmatpush1.bf16.msra.mxu0 %v2834_v20  ;;  %v3852_v20 = vld [vmem:[#allocation2 + $0x92] sm:$0xff] }
  0x6f   : > { %2836 = vmatprep.subr.bf16.mxu0 %v4724_v3  ;;  %2963 = vmatpush1.bf16.msra.mxu1 %v3740_v25 }
  0x70   : > { %1185 = vmatmul.mubr.f32.gmra.mrb[16].mxu1 %v749_v0  ;;  %2948 = vmatprep.subr.bf16.mxu1 %v4724_v3  ;;  %v1054_v0 = vld [vmem:[%s4719_s3 + $0x3b0] sm:$0xff] }
  0x71   : > { %1410 = vmatmul.mubr.f32.gmra.mrb[16].mxu0 %v3751_v29  ;;  %1189 = vmatprep.mubr.f32.mxu1 %v3753_v32  ;;  %v3840_v14 = vpack.c.bf16 %v1055_v1, %v1054_v0  ;;  %v2855_v0 = vpack.c.bf16 %v1029_v48, %v1028_v47  ;;  %v3910_v1 = vld [vmem:[#allocation2 + $0xc8] sm:$0xff] }
  0x72   : > { %1414 = vmatprep.mubr.f32.mxu0 %v752_v34  ;;  %2838 = vmatpush1.bf16.msra.mxu0 %v2837_v33  ;;  %v3866_v33 = vpack.c.bf16 %v1057_v17, %v1056_v16  ;;  %v1062_v16 = vld [vmem:[%s4719_s3 + $0x3f0] sm:$0xff]  ;;  %v1063_v17 = vld [vmem:[%s4719_s3 + $0x3f8] sm:$0xff] }
  0x73   : > { %2839 = vmatprep.subr.bf16.mxu0 %v4724_v3  ;;  %2964 = vmatpush1.bf16.msra.mxu1 %v3763_v38  ;;  %4782 = vst [vmem:[#allocation4_spill] sm:$0xff] %v3840_v14  ;;  %v3947_v47 = vpack.c.bf16 %v1063_v17, %v1062_v16  ;;  %v3973_v16 = vld [vmem:[#allocation2 + $0xf0] sm:$0xff]  ;;  %v3979_v17 = vld [vmem:[#allocation2 + $0xda] sm:$0xff] }
  0x74   : > { %1190 = vmatmul.mubr.f32.gmra.mrb[18].mxu1 %v750_v11  ;;  %2949 = vmatprep.subr.bf16.mxu1 %v4724_v3  ;;  %v1024_v11 = vld [vmem:[%s4719_s3 + $0x2c0] sm:$0xff]  ;;  %4783 = vst [vmem:[#allocation5_spill] sm:$0xff] %v3866_v33  ;;  %4792 = vst [vmem:[#allocation14_spill] sm:$0xff] %v3979_v17 }
  0x75   : > { %1415 = vmatmul.mubr.f32.gmra.mrb[18].mxu0 %v3774_v42  ;;  %1194 = vmatprep.mubr.f32.mxu1 %v3776_v43  ;;  %v2849_v23 = vpack.c.bf16 %v1025_v12, %v1024_v11  ;;  %v1031_v11 = vld [vmem:[%s4719_s3 + $0x2f8] sm:$0xff]  ;;  %4789 = vst [vmem:[#allocation11_spill] sm:$0xff] %v3947_v47 }
  0x76   : > { %1419 = vmatprep.mubr.f32.mxu0 %v3778_v46  ;;  %2841 = vmatpush1.bf16.msra.mxu0 %v2840_v44  ;;  %v3883_v44 = vld [vmem:[#allocation2 + $0xc0] sm:$0xff] }
  0x77   : > { %2842 = vmatprep.subr.bf16.mxu0 %v4724_v3  ;;  %2965 = vmatpush1.bf16.msra.mxu1 %v3788_v49 }
  0x78   : > { %1195 = vmatmul.mubr.f32.gmra.mrb[20].mxu1 %v751_v22  ;;  %2950 = vmatprep.subr.bf16.mxu1 %v4724_v3  ;;  %v3854_v22 = vld [vmem:[#allocation2 + $0x99] sm:$0xff] }
  0x79   : > { %1420 = vmatmul.mubr.f32.gmra.mrb[20].mxu0 %v3800_v54  ;;  %1199 = vmatprep.mubr.f32.mxu1 %v3802_v55 }
  0x7a   : > { %1424 = vmatprep.mubr.f32.mxu0 %v3804_v58  ;;  %2844 = vmatpush1.bf16.msra.mxu0 %v2843_v57  ;;  %v1061_v57 = vld [vmem:[%s4719_s3 + $0x3e8] sm:$0xff] }
  0x7b   : > { %2845 = vmatprep.subr.bf16.mxu0 %v4724_v3  ;;  %2966 = vmatpush1.bf16.msra.mxu1 %v3814_v63  ;;  %v3920_v12 = vpack.c.bf16 %v1061_v57, %v1060_v53  ;;  %v3956_v53 = vld [vmem:[#allocation2 + $0xc2] sm:$0xff] }
  0x7c   : > { %1200 = vmatmul.mubr.f32.gmra.mrb[22].mxu1 %v752_v34  ;;  %2951 = vmatprep.subr.bf16.mxu1 %v4724_v3  ;;  %v1058_v34 = vld [vmem:[%s4719_s3 + $0x3d0] sm:$0xff]  ;;  %4790 = vst [vmem:[#allocation12_spill] sm:$0xff] %v3956_v53  ;;  %v4045_v63 = vld [vmem:[#allocation2 + $0x122] sm:$0xff] }
  0x7d   : > { %1425 = vmatmul.mubr.f32.gmra.mrb[22].mxu0 %v3826_v2  ;;  %1204 = vmatprep.mubr.f32.mxu1 %v3828_v5  ;;  %v3893_v52 = vpack.c.bf16 %v1059_v35, %v1058_v34  ;;  %4787 = vst [vmem:[#allocation9_spill] sm:$0xff] %v3920_v12  ;;  %v3941_v34 = vld [vmem:[#allocation2 + $0xc1] sm:$0xff]  ;;  %v3958_v57 = vld [vmem:[#allocation2 + $0xc9] sm:$0xff]  ;;  %4803 = vst [vmem:[#allocation25_spill] sm:$0xff] %v4045_v63 }
  0x7e   : > { %1429 = vmatprep.mubr.f32.mxu0 %v3830_v10  ;;  %2847 = vmatpush1.bf16.msra.mxu0 %v2846_v7  ;;  %v1030_v7 = vld [vmem:[%s4719_s3 + $0x2f0] sm:$0xff] }
  0x7f   : > { %2848 = vmatprep.subr.bf16.mxu0 %v4724_v3  ;;  %2967 = vmatpush1.bf16.msra.mxu1 %v3840_v14  ;;  %4785 = vst [vmem:[#allocation7_spill] sm:$0xff] %v3893_v52  ;;  %v2858_v35 = vpack.c.bf16 %v1031_v11, %v1030_v7  ;;  %v3969_v7 = vld [vmem:[#allocation2 + $0xca] sm:$0xff]  ;;  %v3971_v11 = vld [vmem:[#allocation2 + $0xd9] sm:$0xff] }
  0x80   : > { %1205 = vmatmul.mubr.f32.gmra.mrb[24].mxu1 %v3778_v46  ;;  %2952 = vmatprep.subr.bf16.mxu1 %v4724_v3  ;;  %4791 = vst [vmem:[#allocation13_spill] sm:$0xff] %v3969_v7 }
  0x81   : > { %1430 = vmatmul.mubr.f32.gmra.mrb[24].mxu0 %v3852_v20  ;;  %1209 = vmatprep.mubr.f32.mxu1 %v3854_v22 }
  0x82   : > { %1434 = vmatprep.mubr.f32.mxu0 %v3856_v24  ;;  %2850 = vmatpush1.bf16.msra.mxu0 %v2849_v23  ;;  %v1064_v23 = vld [vmem:[%s4719_s3 + $0x400] sm:$0xff] }
  0x83   : > { %2851 = vmatprep.subr.bf16.mxu0 %v4724_v3  ;;  %2968 = vmatpush1.bf16.msra.mxu1 %v3866_v33  ;;  %v3951_v48 = vpack.c.bf16 %v1065_v26, %v1064_v23  ;;  %v3981_v23 = vld [vmem:[#allocation2 + $0xe1] sm:$0xff]  ;;  %v3983_v26 = vld [vmem:[#allocation2 + $0xf8] sm:$0xff] }
  0x84   : > { %1210 = vmatmul.mubr.f32.gmra.mrb[26].mxu1 %v3804_v58  ;;  %2953 = vmatprep.subr.bf16.mxu1 %v4724_v3  ;;  %v4014_v33 = vld [vmem:[#allocation2 + $0xfa] sm:$0xff] }
  0x85   : > { %1435 = vmatmul.mubr.f32.gmra.mrb[26].mxu0 %v3879_v36  ;;  %1214 = vmatprep.mubr.f32.mxu1 %v3881_v39  ;;  %4796 = vst [vmem:[#allocation18_spill] sm:$0xff] %v4014_v33  ;;  %v4049_v36 = vld [vmem:[#allocation2 + $0x140] sm:$0xff] }
  0x86   : > { %1439 = vmatprep.mubr.f32.mxu0 %v3883_v44  ;;  %2853 = vmatpush1.bf16.msra.mxu0 %v2852_v41  ;;  %v3943_v41 = vld [vmem:[#allocation2 + $0xd8] sm:$0xff]  ;;  %4805 = vst [vmem:[#allocation27_spill] sm:$0xff] %v4049_v36 }
  0x87   : > { %2854 = vmatprep.subr.bf16.mxu0 %v4724_v3  ;;  %2969 = vmatpush1.bf16.msra.mxu1 %v3893_v52 }
  0x88   : > { %1215 = vmatmul.mubr.f32.gmra.mrb[28].mxu1 %v3830_v10  ;;  %2954 = vmatprep.subr.bf16.mxu1 %v4724_v3 }
  0x89   : > { %1440 = vmatmul.mubr.f32.gmra.mrb[28].mxu0 %v3906_v59  ;;  %1219 = vmatprep.mubr.f32.mxu1 %v3908_v60  ;;  %v4018_v59 = vld [vmem:[#allocation2 + $0x120] sm:$0xff] }
  0x8a   : > { %1444 = vmatprep.mubr.f32.mxu0 %v3910_v1  ;;  %2856 = vmatpush1.bf16.msra.mxu0 %v2855_v0  ;;  %v3960_v0 = vld [vmem:[#allocation2 + $0xe0] sm:$0xff]  ;;  %4797 = vst [vmem:[#allocation19_spill] sm:$0xff] %v4018_v59 }
  0x8b   : > { %2857 = vmatprep.subr.bf16.mxu0 %v4724_v3  ;;  %2970 = vmatpush1.bf16.msra.mxu1 %v3920_v12  ;;  %v4003_v12 = vld [vmem:[#allocation2 + $0xf2] sm:$0xff] }
  0x8c   : > { %1220 = vmatmul.mubr.f32.gmra.mrb[30].mxu1 %v3856_v24  ;;  %2955 = vmatprep.subr.bf16.mxu1 %v4724_v3  ;;  %4794 = vst [vmem:[#allocation16_spill] sm:$0xff] %v4003_v12 }
  0x8d   : > { %1445 = vmatmul.mubr.f32.gmra.mrb[30].mxu0 %v3939_v28  ;;  %1224 = vmatprep.mubr.f32.mxu1 %v3941_v34  ;;  %v4016_v28 = vld [vmem:[#allocation2 + $0x109] sm:$0xff] }
  0x8e   : > { %1449 = vmatprep.mubr.f32.mxu0 %v3943_v41  ;;  %2859 = vmatpush1.bf16.msra.mxu0 %v2858_v35  ;;  %v3989_v35 = vld [vmem:[#allocation2 + $0xe2] sm:$0xff] }
  0x8f   : > { %2971 = vmatpush1.bf16.msra.mxu1 %v3947_v47  ;;  %2860 = vmatprep.subr.bf16.mxu0 %v4724_v3  ;;  %4793 = vst [vmem:[#allocation15_spill] sm:$0xff] %v3989_v35  ;;  %v3991_v3 = vld [vmem:[#allocation2 + $0xf1] sm:$0xff]  ;;  %v3993_v47 = vld [vmem:[#allocation2 + $0x108] sm:$0xff] }
  0x90   : > { %1225 = vmatmul.mubr.f32.gmra.mrb[32].mxu1 %v3883_v44  ;;  %2909 = vmatprep.subr.bf16.mxu1 %v3951_v48 }
  0x91   : > { %1450 = vmatmul.mubr.f32.gmra.mrb[32].mxu0 %v3956_v53  ;;  %1229 = vmatprep.mubr.f32.mxu1 %v3958_v57  ;;  %v4007_v53 = vld [vmem:[#allocation2 + $0x110] sm:$0xff] }
  0x92   : > { %1454 = vmatprep.mubr.f32.mxu0 %v3960_v0  ;;  %4795 = vst [vmem:[#allocation17_spill] sm:$0xff] %v4007_v53 }
  0x94   : > { %1230 = vmatmul.mubr.f32.gmra.mrb[34].mxu1 %v3910_v1 }
  0x95   : > { %1455 = vmatmul.mubr.f32.gmra.mrb[34].mxu0 %v3969_v7  ;;  %1234 = vmatprep.mubr.f32.mxu1 %v3971_v11  ;;  %v4005_v7 = vld [vmem:[#allocation2 + $0xf9] sm:$0xff] }
  0x96   : > { %1459 = vmatprep.mubr.f32.mxu0 %v3973_v16 }
  0x98   : > { %1235 = vmatmul.mubr.f32.gmra.mrb[36].mxu1 %v3943_v41 }
  0x99   : > { %1460 = vmatmul.mubr.f32.gmra.mrb[36].mxu0 %v3979_v17  ;;  %1239 = vmatprep.mubr.f32.mxu1 %v3981_v23  ;;  %v639_v17 = vld [vmem:[%s473_s17] sm:$0xff] }
  0x9a   : > { %1464 = vmatprep.mubr.f32.mxu0 %v3983_v26  ;;  %v642_v52 = vmul.f32 0.0, %v639_v17  ;;  %v4027_v17 = vld [vmem:[#allocation2 + $0x111] sm:$0xff] }
  0x9c   : > { %1240 = vmatmul.mubr.f32.gmra.mrb[38].mxu1 %v3960_v0  ;;  %645 = vst.msk [vmem:[#allocation2 + $0x199] sm:$0xff] %vm593_vm0, %v642_v52  ;;  %v4025_v52 = vld [vmem:[#allocation2 + $0x10a] sm:$0xff] }
  0x9d   : > { %1465 = vmatmul.mubr.f32.gmra.mrb[38].mxu0 %v3989_v35  ;;  %1244 = vmatprep.mubr.f32.mxu1 %v3991_v3  ;;  %v640_v35 = vld [vmem:[%s473_s17 + $0x8] sm:$0xff]  ;;  %4798 = vst [vmem:[#allocation20_spill] sm:$0xff] %v4025_v52 }
  0x9e   : > { %1469 = vmatprep.mubr.f32.mxu0 %v3993_v47  ;;  %v643_v14 = vmul.f32 0.0, %v640_v35  ;;  %v4037_v35 = vld [vmem:[#allocation2 + $0x121] sm:$0xff] }
  0x9f   : > { %4801 = vst [vmem:[#allocation23_spill] sm:$0xff] %v4037_v35 }
  0xa0   : > { %1245 = vmatmul.mubr.f32.gmra.mrb[40].mxu1 %v3973_v16  ;;  %646 = vst.msk [vmem:[#allocation2 + $0x1a1] sm:$0xff] %vm593_vm0, %v643_v14  ;;  %v4035_v14 = vld [vmem:[#allocation2 + $0x112] sm:$0xff] }
  0xa1   : > { %1470 = vmatmul.mubr.f32.gmra.mrb[40].mxu0 %v4003_v12  ;;  %1249 = vmatprep.mubr.f32.mxu1 %v4005_v7  ;;  %v4029_v12 = vld [vmem:[#allocation2 + $0x128] sm:$0xff]  ;;  %4800 = vst [vmem:[#allocation22_spill] sm:$0xff] %v4035_v14 }
  0xa2   : > { %1474 = vmatprep.mubr.f32.mxu0 %v4007_v53  ;;  %4799 = vst [vmem:[#allocation21_spill] sm:$0xff] %v4029_v12 }
  0xa4   : > { %1250 = vmatmul.mubr.f32.gmra.mrb[42].mxu1 %v3983_v26 }
  0xa5   : > { %1475 = vmatmul.mubr.f32.gmra.mrb[42].mxu0 %v4014_v33  ;;  %1254 = vmatprep.mubr.f32.mxu1 %v4016_v28  ;;  %v4039_v33 = vld [vmem:[#allocation2 + $0x138] sm:$0xff] }
  0xa6   : > { %1479 = vmatprep.mubr.f32.mxu0 %v4018_v59  ;;  %4802 = vst [vmem:[#allocation24_spill] sm:$0xff] %v4039_v33 }
  0xa8   : > { %1255 = vmatmul.mubr.f32.gmra.mrb[44].mxu1 %v3993_v47 }
  0xa9   : > { %1480 = vmatmul.mubr.f32.gmra.mrb[44].mxu0 %v4025_v52  ;;  %1259 = vmatprep.mubr.f32.mxu1 %v4027_v17  ;;  %v4047_v52 = vld [vmem:[#allocation2 + $0x129] sm:$0xff] }
  0xaa   : > { %1484 = vmatprep.mubr.f32.mxu0 %v4029_v12  ;;  %4804 = vst [vmem:[#allocation26_spill] sm:$0xff] %v4047_v52 }
  0xac   : > { %1260 = vmatmul.mubr.f32.gmra.mrb[46].mxu1 %v4007_v53  ;;  %v4055_v53 = vld [vmem:[#allocation2 + $0x12a] sm:$0xff] }
  0xad   : > { %1485 = vmatmul.mubr.f32.gmra.mrb[46].mxu0 %v4035_v14  ;;  %1264 = vmatprep.mubr.f32.mxu1 %v4037_v35  ;;  %4806 = vst [vmem:[#allocation28_spill] sm:$0xff] %v4055_v53  ;;  %v4057_v14 = vld [vmem:[#allocation2 + $0x139] sm:$0xff]  ;;  %v4059_v35 = vld [vmem:[#allocation2 + $0x150] sm:$0xff] }
  0xae   : > { %1489 = vmatprep.mubr.f32.mxu0 %v4039_v33  ;;  %4807 = vst [vmem:[#allocation29_spill] sm:$0xff] %v4057_v14  ;;  %4808 = vst [vmem:[#allocation30_spill] sm:$0xff] %v4059_v35 }
  0xb0   : > { %1265 = vmatmul.mubr.f32.gmra.mrb[48].mxu1 %v4018_v59  ;;  %v4065_v59 = vld [vmem:[#allocation2 + $0x13a] sm:$0xff] }
  0xb1   : > { %1490 = vmatmul.mubr.f32.gmra.mrb[48].mxu0 %v4045_v63  ;;  %1269 = vmatprep.mubr.f32.mxu1 %v4047_v52  ;;  %4809 = vst [vmem:[#allocation31_spill] sm:$0xff] %v4065_v59  ;;  %v4067_v63 = vld [vmem:[#allocation2 + $0x141] sm:$0xff]  ;;  %v4069_v52 = vld [vmem:[#allocation2 + $0x158] sm:$0xff] }
  0xb2   : > { %1494 = vmatprep.mubr.f32.mxu0 %v4049_v36  ;;  %4810 = vst [vmem:[#allocation32_spill] sm:$0xff] %v4067_v63  ;;  %4811 = vst [vmem:[#allocation33_spill] sm:$0xff] %v4069_v52 }
  0xb4   : > { %1270 = vmatmul.mubr.f32.gmra.mrb[50].mxu1 %v4029_v12  ;;  %v4075_v12 = vld [vmem:[#allocation2 + $0x142] sm:$0xff] }
  0xb5   : > { %1495 = vmatmul.mubr.f32.gmra.mrb[50].mxu0 %v4055_v53  ;;  %1274 = vmatprep.mubr.f32.mxu1 %v4057_v14  ;;  %4812 = vst [vmem:[#allocation34_spill] sm:$0xff] %v4075_v12  ;;  %v4077_v53 = vld [vmem:[#allocation2 + $0x151] sm:$0xff]  ;;  %v4079_v14 = vld [vmem:[#allocation2 + $0x168] sm:$0xff] }
  0xb6   : > { %1499 = vmatprep.mubr.f32.mxu0 %v4059_v35  ;;  %4813 = vst [vmem:[#allocation35_spill] sm:$0xff] %v4077_v53 }
  0xb8   : > { %1275 = vmatmul.mubr.f32.gmra.mrb[52].mxu1 %v4039_v33  ;;  %v4085_v33 = vld [vmem:[#allocation2 + $0x152] sm:$0xff] }
  0xb9   : > { %1500 = vmatmul.mubr.f32.gmra.mrb[52].mxu0 %v4065_v59  ;;  %1279 = vmatprep.mubr.f32.mxu1 %v4067_v63  ;;  %4814 = vst [vmem:[#allocation36_spill] sm:$0xff] %v4085_v33  ;;  %v4087_v59 = vld [vmem:[#allocation2 + $0x159] sm:$0xff]  ;;  %v4089_v63 = vld [vmem:[#allocation2 + $0x170] sm:$0xff] }
  0xba   : > { %1504 = vmatprep.mubr.f32.mxu0 %v4069_v52  ;;  %4815 = vst [vmem:[#allocation37_spill] sm:$0xff] %v4087_v59 }
  0xbc   : > { %1280 = vmatmul.mubr.f32.gmra.mrb[54].mxu1 %v4049_v36  ;;  %v4095_v36 = vld [vmem:[#allocation2 + $0x15a] sm:$0xff] }
  0xbd   : > { %1505 = vmatmul.mubr.f32.gmra.mrb[54].mxu0 %v4075_v12  ;;  %1284 = vmatprep.mubr.f32.mxu1 %v4077_v53  ;;  %4816 = vst [vmem:[#allocation38_spill] sm:$0xff] %v4095_v36  ;;  %v4097_v12 = vld [vmem:[#allocation2 + $0x169] sm:$0xff]  ;;  %v4099_v53 = vld [vmem:[#allocation2 + $0x180] sm:$0xff] }
  0xbe   : > { %1509 = vmatprep.mubr.f32.mxu0 %v4079_v14  ;;  %4817 = vst [vmem:[#allocation39_spill] sm:$0xff] %v4099_v53 }
  0xc0   : > { %1285 = vmatmul.mubr.f32.gmra.mrb[56].mxu1 %v4059_v35  ;;  %v4105_v35 = vld [vmem:[#allocation2 + $0x16a] sm:$0xff] }
  0xc1   : > { %1510 = vmatmul.mubr.f32.gmra.mrb[56].mxu0 %v4085_v33  ;;  %1289 = vmatprep.mubr.f32.mxu1 %v4087_v59  ;;  %4818 = vst [vmem:[#allocation40_spill] sm:$0xff] %v4105_v35  ;;  %v4107_v33 = vld [vmem:[#allocation2 + $0x171] sm:$0xff]  ;;  %v4109_v59 = vld [vmem:[#allocation2 + $0x188] sm:$0xff] }
  0xc2   : > { %1514 = vmatprep.mubr.f32.mxu0 %v4089_v63  ;;  %4819 = vst [vmem:[#allocation41_spill] sm:$0xff] %v4109_v59 }
  0xc4   : > { %1290 = vmatmul.mubr.f32.gmra.mrb[58].mxu1 %v4069_v52  ;;  %v4115_v52 = vld [vmem:[#allocation2 + $0x172] sm:$0xff] }
  0xc5   : > { %1515 = vmatmul.mubr.f32.gmra.mrb[58].mxu0 %v4095_v36  ;;  %1294 = vmatprep.mubr.f32.mxu1 %v4097_v12  ;;  %4820 = vst [vmem:[#allocation42_spill] sm:$0xff] %v4115_v52  ;;  %v1066_v36 = vld [vmem:[%s4719_s3 + $0x410] sm:$0xff] }
  0xc6   : > { %1519 = vmatprep.mubr.f32.mxu0 %v4099_v53  ;;  %v1069_v53 = vld [vmem:[%s4719_s3 + $0x428] sm:$0xff] }
  0xc8   : > { %1295 = vmatmul.mubr.f32.gmra.mrb[60].mxu1 %v4079_v14 }
  0xc9   : > { %1520 = vmatmul.mubr.f32.gmra.mrb[60].mxu0 %v4105_v35  ;;  %1299 = vmatprep.mubr.f32.mxu1 %v4107_v33  ;;  %v1067_v35 = vld [vmem:[%s4719_s3 + $0x418] sm:$0xff] }
  0xca   : > { %1524 = vmatprep.mubr.f32.mxu0 %v4109_v59  ;;  %v2912_v59 = vpack.c.bf16 %v1067_v35, %v1066_v36  ;;  %v4842_v36 = vld [vmem:[#allocation14_spill] sm:$0xff]  ;;  %v4855_v35 = vld [vmem:[#allocation28_spill] sm:$0xff] }
  0xcc   : > { %1300 = vmatmul.mubr.f32.gmra.mrb[62].mxu1 %v4089_v63 }
  0xcd   : > { %1525 = vmatmul.mubr.f32.gmra.mrb[62].mxu0 %v4115_v52  ;;  %1859 = vmatprep.mubr.f32.mxu1 %v3828_v5  ;;  %v1068_v52 = vld [vmem:[%s4719_s3 + $0x420] sm:$0xff] }
  0xce   : > { %1594 = vmatprep.mubr.f32.mxu0 %v3592_v30  ;;  %v4821_v30 = vmov 0.0|0.0  }
  0xd0   : > { %1860 = vmatmul.mubr.f32.vlgmr.msra.gmra.mrb[64].mxu1 %v3778_v46  ;;  %v1070_v46 = vld [vmem:[%s4719_s3 + $0x430] sm:$0xff] }
  0xd1   : > { %1595 = vmatmul.mubr.f32.vlgmr.msra.gmra.mrb[0].mxu0 %v3566_v21  ;;  %1864 = vmatprep.mubr.f32.mxu1 %v3854_v22  ;;  %v2916_v21 = vpack.c.bf16 %v1069_v53, %v1068_v52  ;;  %v4277_v53 = vld [vmem:[#allocation2 + $0x189] sm:$0xff] }
  0xd2   : > { %2862 = vmatpush1.bf16.msra.mxu0 %v3552_v13  ;;  %1599 = vmatprep.mubr.f32.mxu0 %v3621_v40  ;;  %v1071_v13 = vld [vmem:[%s4719_s3 + $0x438] sm:$0xff]  ;;  %v1072_v40 = vld [vmem:[%s4719_s3 + $0x440] sm:$0xff] }
  0xd3   : > { %2863 = vmatprep.subr.bf16.mxu0 %v4821_v30  ;;  %2911 = vmatpush3.bf16.msra.mxu1 %v3951_v48  ;;  %v4850_v48 = vld [vmem:[#allocation20_spill] sm:$0xff] }
  0xd4   : > { %1865 = vmatmul.mubr.f32.gmra.mrb[66].mxu1 %v3804_v58  ;;  %2913 = vmatprep.subr.bf16.mxu1 %v2912_v59  ;;  %v4835_v58 = vld [vmem:[#allocation7_spill] sm:$0xff] }
  0xd5   : > { %1600 = vmatmul.mubr.f32.gmra.mrb[2].mxu0 %v3594_v31  ;;  %1869 = vmatprep.mubr.f32.mxu1 %v3881_v39  ;;  %v2920_v31 = vpack.c.bf16 %v1071_v13, %v1070_v46  ;;  %v905_v46 = vld [vmem:[#allocation2 + $0x3a] sm:$0xff]  ;;  %v4856_v13 = vld [vmem:[#allocation31_spill] sm:$0xff] }
  0xd6   : > { %1604 = vmatprep.mubr.f32.mxu0 %v3651_v50  ;;  %2865 = vmatpush1.bf16.msra.mxu0 %v3580_v27  ;;  %v1073_v50 = vld [vmem:[%s4719_s3 + $0x448] sm:$0xff] }
  0xd7   : > { %2866 = vmatprep.subr.bf16.mxu0 %v4821_v30  ;;  %2915 = vmatpush3.bf16.msra.mxu1 %v2912_v59  ;;  %v2924_v27 = vpack.c.bf16 %v1073_v50, %v1072_v40  ;;  %v4845_v59 = vld [vmem:[#allocation37_spill] sm:$0xff] }
  0xd8   : > { %1870 = vmatmul.mubr.f32.gmra.mrb[68].mxu1 %v3830_v10  ;;  %2917 = vmatprep.subr.bf16.mxu1 %v2916_v21  ;;  %v4838_v10 = vld [vmem:[#allocation13_spill] sm:$0xff] }
  0xd9   : > { %1605 = vmatmul.mubr.f32.gmra.mrb[4].mxu0 %v3623_v6  ;;  %1874 = vmatprep.mubr.f32.mxu1 %v3908_v60  ;;  %v1074_v6 = vld [vmem:[%s4719_s3 + $0x450] sm:$0xff] }
  0xda   : > { %1609 = vmatprep.mubr.f32.mxu0 %v3679_v61  ;;  %2868 = vmatpush1.bf16.msra.mxu0 %v3607_v37  ;;  %v1075_v61 = vld [vmem:[%s4719_s3 + $0x458] sm:$0xff] }
  0xdb   : > { %2869 = vmatprep.subr.bf16.mxu0 %v4821_v30  ;;  %2919 = vmatpush3.bf16.msra.mxu1 %v2916_v21  ;;  %v2928_v37 = vpack.c.bf16 %v1075_v61, %v1074_v6  ;;  %v4857_v6 = vld [vmem:[#allocation34_spill] sm:$0xff] }
  0xdc   : > { %1875 = vmatmul.mubr.f32.gmra.mrb[70].mxu1 %v3856_v24  ;;  %2921 = vmatprep.subr.bf16.mxu1 %v2920_v31  ;;  %v4841_v24 = vld [vmem:[#allocation35_spill] sm:$0xff]  ;;  %v908_v61 = vld [vmem:[#allocation2 + $0x62] sm:$0xff] }
  0xdd   : > { %1610 = vmatmul.mubr.f32.gmra.mrb[6].mxu0 %v3653_v51  ;;  %1879 = vmatprep.mubr.f32.mxu1 %v3941_v34  ;;  %v1076_v51 = vld [vmem:[%s4719_s3 + $0x460] sm:$0xff] }
  0xde   : > { %1614 = vmatprep.mubr.f32.mxu0 %v3704_v8  ;;  %2871 = vmatpush1.bf16.msra.mxu0 %v3635_v45  ;;  %v1077_v8 = vld [vmem:[%s4719_s3 + $0x468] sm:$0xff] }
  0xdf   : > { %2872 = vmatprep.subr.bf16.mxu0 %v4821_v30  ;;  %2923 = vmatpush3.bf16.msra.mxu1 %v2920_v31  ;;  %v2932_v45 = vpack.c.bf16 %v1077_v8, %v1076_v51  ;;  %v906_v31 = vld [vmem:[#allocation2 + $0x4a] sm:$0xff] }
  0xe0   : > { %1880 = vmatmul.mubr.f32.gmra.mrb[72].mxu1 %v3883_v44  ;;  %2925 = vmatprep.subr.bf16.mxu1 %v2924_v27  ;;  %v4844_v44 = vld [vmem:[#allocation30_spill] sm:$0xff] }
  0xe1   : > { %1615 = vmatmul.mubr.f32.gmra.mrb[8].mxu0 %v3681_v62  ;;  %1884 = vmatprep.mubr.f32.mxu1 %v3958_v57  ;;  %v1078_v62 = vld [vmem:[%s4719_s3 + $0x470] sm:$0xff] }
  0xe2   : > { %1619 = vmatprep.mubr.f32.mxu0 %v3728_v18  ;;  %2874 = vmatpush1.bf16.msra.mxu0 %v3664_v56  ;;  %v1079_v18 = vld [vmem:[%s4719_s3 + $0x478] sm:$0xff]  ;;  %v909_v8 = vld [vmem:[#allocation2 + $0x6a] sm:$0xff] }
  0xe3   : > { %2875 = vmatprep.subr.bf16.mxu0 %v4821_v30  ;;  %2927 = vmatpush3.bf16.msra.mxu1 %v2924_v27  ;;  %v2936_v56 = vpack.c.bf16 %v1079_v18, %v1078_v62  ;;  %v907_v27 = vld [vmem:[#allocation2 + $0x52] sm:$0xff]  ;;  %v910_v62 = vld [vmem:[#allocation2 + $0x7a] sm:$0xff] }
  0xe4   : > { %1885 = vmatmul.mubr.f32.gmra.mrb[74].mxu1 %v3910_v1  ;;  %2929 = vmatprep.subr.bf16.mxu1 %v2928_v37  ;;  %v4847_v1 = vld [vmem:[#allocation33_spill] sm:$0xff] }
  0xe5   : > { %1620 = vmatmul.mubr.f32.gmra.mrb[10].mxu0 %v3706_v9  ;;  %1889 = vmatprep.mubr.f32.mxu1 %v3971_v11  ;;  %v4823_v9 = vld [vmem:[#allocation3_spill] sm:$0xff] }
  0xe6   : > { %1624 = vmatprep.mubr.f32.mxu0 %v3751_v29  ;;  %2877 = vmatpush1.bf16.msra.mxu0 %v3692_v4  ;;  %v4822_v4 = vld [vmem:[#allocation6_spill] sm:$0xff]  ;;  %v4827_v29 = vld [vmem:[#allocation4_spill] sm:$0xff] }
  0xe7   : > { %2878 = vmatprep.subr.bf16.mxu0 %v4821_v30  ;;  %2931 = vmatpush3.bf16.msra.mxu1 %v2928_v37 }
  0xe8   : > { %1890 = vmatmul.mubr.f32.gmra.mrb[76].mxu1 %v3943_v41  ;;  %2933 = vmatprep.subr.bf16.mxu1 %v2932_v45  ;;  %v4849_v41 = vld [vmem:[#allocation18_spill] sm:$0xff] }
  0xe9   : > { %1625 = vmatmul.mubr.f32.gmra.mrb[12].mxu0 %v3730_v19  ;;  %1894 = vmatprep.mubr.f32.mxu1 %v3981_v23  ;;  %v4825_v19 = vld [vmem:[#allocation23_spill] sm:$0xff] }
  0xea   : > { %1629 = vmatprep.mubr.f32.mxu0 %v3774_v42  ;;  %2880 = vmatpush1.bf16.msra.mxu0 %v3716_v15  ;;  %v4824_v15 = vld [vmem:[#allocation17_spill] sm:$0xff]  ;;  %v4830_v42 = vld [vmem:[#allocation10_spill] sm:$0xff] }
  0xeb   : > { %2881 = vmatprep.subr.bf16.mxu0 %v4821_v30  ;;  %2935 = vmatpush3.bf16.msra.mxu1 %v2932_v45  ;;  %v4858_v45 = vld [vmem:[#allocation36_spill] sm:$0xff] }
  0xec   : > { %1895 = vmatmul.mubr.f32.gmra.mrb[78].mxu1 %v3960_v0  ;;  %2937 = vmatprep.subr.bf16.mxu1 %v2936_v56  ;;  %v902_v0 = vld [vmem:[#allocation2 + $0x199] sm:$0xff] }
  0xed   : > { %1630 = vmatmul.mubr.f32.gmra.mrb[14].mxu0 %v3753_v32  ;;  %1899 = vmatprep.mubr.f32.mxu1 %v3991_v3  ;;  %v4828_v32 = vld [vmem:[#allocation19_spill] sm:$0xff] }
  0xee   : > { %1634 = vmatprep.mubr.f32.mxu0 %v3800_v54  ;;  %2883 = vmatpush1.bf16.msra.mxu0 %v3740_v25  ;;  %v4826_v25 = vld [vmem:[#allocation8_spill] sm:$0xff]  ;;  %v4833_v54 = vld [vmem:[#allocation29_spill] sm:$0xff] }
  0xef   : > { %2884 = vmatprep.subr.bf16.mxu0 %v4821_v30  ;;  %2939 = vmatpush3.bf16.msra.mxu1 %v2936_v56 }
  0xf0   : > { %1900 = vmatmul.mubr.f32.gmra.mrb[80].mxu1 %v3973_v16  ;;  %v870_v16 = vld [vmem:[#allocation2 + $0x198] sm:$0xff] }
  0xf1   : > { %1635 = vmatmul.mubr.f32.gmra.mrb[16].mxu0 %v3776_v43  ;;  %1904 = vmatprep.mubr.f32.mxu1 %v4005_v7  ;;  %v4831_v43 = vld [vmem:[#allocation5_spill] sm:$0xff] }
  0xf2   : > { %1639 = vmatprep.mubr.f32.mxu0 %v3826_v2  ;;  %2886 = vmatpush1.bf16.msra.mxu0 %v3763_v38  ;;  %v4829_v38 = vld [vmem:[#allocation26_spill] sm:$0xff]  ;;  %v4836_v2 = vld [vmem:[#allocation24_spill] sm:$0xff] }
  0xf3   : > { %2887 = vmatprep.subr.bf16.mxu0 %v4821_v30 }
  0xf4   : > { %1905 = vmatmul.mubr.f32.gmra.mrb[82].mxu1 %v3983_v26  ;;  %v903_v26 = vld [vmem:[#allocation2 + $0x1a1] sm:$0xff] }
  0xf5   : > { %1640 = vmatmul.mubr.f32.gmra.mrb[18].mxu0 %v3802_v55  ;;  %1909 = vmatprep.mubr.f32.mxu1 %v4016_v28  ;;  %v4834_v55 = vld [vmem:[#allocation12_spill] sm:$0xff] }
  0xf6   : > { %1644 = vmatprep.mubr.f32.mxu0 %v3852_v20  ;;  %2889 = vmatpush1.bf16.msra.mxu0 %v3788_v49  ;;  %v4832_v49 = vld [vmem:[#allocation21_spill] sm:$0xff] }
  0xf7   : > { %2890 = vmatprep.subr.bf16.mxu0 %v4821_v30  ;;  %v4839_v20 = vld [vmem:[#allocation9_spill] sm:$0xff] }
  0xf8   : > { %1910 = vmatmul.mubr.f32.gmra.mrb[84].mxu1 %v3993_v47  ;;  %v4271_v47 = vld [vmem:[#allocation2 + $0x181] sm:$0xff] }
  0xf9   : > { %1645 = vmatmul.mubr.f32.gmra.mrb[20].mxu0 %v3828_v5  ;;  %1914 = vmatprep.mubr.f32.mxu1 %v4027_v17  ;;  %v4837_v5 = vld [vmem:[#allocation32_spill] sm:$0xff] }
  0xfa   : > { %1649 = vmatprep.mubr.f32.mxu0 %v4822_v4  ;;  %2892 = vmatpush1.bf16.msra.mxu0 %v4823_v9  ;;  %v911_v4 = vld [vmem:[#allocation2 + $0x82] sm:$0xff] }
  0xfb   : > { %2893 = vmatprep.subr.bf16.mxu0 %v4821_v30  ;;  %v4859_v9 = vld [vmem:[#allocation38_spill] sm:$0xff] }
  0xfc   : > { %1915 = vmatmul.mubr.f32.gmra.mrb[86].mxu1 %v4824_v15  ;;  %v912_v15 = vld [vmem:[#allocation2 + $0x92] sm:$0xff] }
  0xfd   : > { %1650 = vmatmul.mubr.f32.gmra.mrb[22].mxu0 %v3854_v22  ;;  %1919 = vmatprep.mubr.f32.mxu1 %v4825_v19  ;;  %v4840_v22 = vld [vmem:[#allocation27_spill] sm:$0xff] }
  0xfe   : > { %1654 = vmatprep.mubr.f32.mxu0 %v4826_v25  ;;  %2895 = vmatpush1.bf16.msra.mxu0 %v4827_v29  ;;  %v913_v29 = vld [vmem:[#allocation2 + $0x9a] sm:$0xff] }
  0xff   : > { %2896 = vmatprep.subr.bf16.mxu0 %v4821_v30 }
 0x100   : > { %1920 = vmatmul.mubr.f32.gmra.mrb[88].mxu1 %v4828_v32  ;;  %v4860_v32 = vld [vmem:[#allocation40_spill] sm:$0xff] }
 0x101   : > { %1655 = vmatmul.mubr.f32.gmra.mrb[24].mxu0 %v3881_v39  ;;  %1924 = vmatprep.mubr.f32.mxu1 %v4829_v38  ;;  %v4843_v39 = vld [vmem:[#allocation11_spill] sm:$0xff] }
 0x102   : > { %1659 = vmatprep.mubr.f32.mxu0 %v4830_v42  ;;  %2898 = vmatpush1.bf16.msra.mxu0 %v4831_v43 }
 0x103   : > { %2899 = vmatprep.subr.bf16.mxu0 %v4821_v30 }
 0x104   : > { %1925 = vmatmul.mubr.f32.gmra.mrb[90].mxu1 %v4832_v49  ;;  %v915_v49 = vld [vmem:[#allocation2 + $0xb2] sm:$0xff] }
 0x105   : > { %1660 = vmatmul.mubr.f32.gmra.mrb[26].mxu0 %v3908_v60  ;;  %1929 = vmatprep.mubr.f32.mxu1 %v4833_v54  ;;  %v4846_v60 = vld [vmem:[#allocation15_spill] sm:$0xff] }
 0x106   : > { %1664 = vmatprep.mubr.f32.mxu0 %v4834_v55  ;;  %2901 = vmatpush1.bf16.msra.mxu0 %v4835_v58  ;;  %v916_v55 = vld [vmem:[#allocation2 + $0xc2] sm:$0xff] }
 0x107   : > { %2902 = vmatprep.subr.bf16.mxu0 %v4821_v30  ;;  %v4316_v58 = vld [vmem:[#allocation2 + $0x182] sm:$0xff] }
 0x108   : > { %1930 = vmatmul.mubr.f32.gmra.mrb[92].mxu1 %v4836_v2 }
 0x109   : > { %1665 = vmatmul.mubr.f32.gmra.mrb[28].mxu0 %v3941_v34  ;;  %1934 = vmatprep.mubr.f32.mxu1 %v4837_v5  ;;  %v4848_v34 = vld [vmem:[#allocation16_spill] sm:$0xff] }
 0x10a   : > { %1669 = vmatprep.mubr.f32.mxu0 %v4838_v10  ;;  %2904 = vmatpush1.bf16.msra.mxu0 %v4839_v20  ;;  %v917_v10 = vld [vmem:[#allocation2 + $0xca] sm:$0xff]  ;;  %v918_v20 = vld [vmem:[#allocation2 + $0xda] sm:$0xff] }
 0x10b   : > { %2905 = vmatprep.subr.bf16.mxu0 %v4821_v30  ;;  %v904_v30 = vld [vmem:[#allocation2 + $0x32] sm:$0xff] }
 0x10c   : > { %1935 = vmatmul.mubr.f32.gmra.mrb[94].mxu1 %v4840_v22  ;;  %v4322_v22 = vld [vmem:[#allocation2 + $0x18a] sm:$0xff] }
 0x10d   : > { %1670 = vmatmul.mubr.f32.gmra.mrb[30].mxu0 %v3958_v57  ;;  %1939 = vmatprep.mubr.f32.mxu1 %v4841_v24  ;;  %v4851_v57 = vld [vmem:[#allocation39_spill] sm:$0xff] }
 0x10e   : > { %1674 = vmatprep.mubr.f32.mxu0 %v4842_v36  ;;  %2907 = vmatpush1.bf16.msra.mxu0 %v4843_v39  ;;  %v919_v36 = vld [vmem:[#allocation2 + $0xe2] sm:$0xff]  ;;  %v920_v39 = vld [vmem:[#allocation2 + $0xf2] sm:$0xff] }
 0x110   : > { %1940 = vmatmul.mubr.f32.gmra.mrb[96].mxu1 %v4844_v44  ;;  %v872_v44 = vld [vmem:[#allocation2 + $0x31] sm:$0xff] }
 0x111   : > { %1675 = vmatmul.mubr.f32.gmra.mrb[32].mxu0 %v3971_v11  ;;  %1944 = vmatprep.mubr.f32.mxu1 %v4845_v59 }
 0x112   : > { %1679 = vmatprep.mubr.f32.mxu0 %v4846_v60  ;;  %v921_v60 = vld [vmem:[#allocation2 + $0xfa] sm:$0xff] }
 0x114   : > { %1945 = vmatmul.mubr.f32.gmra.mrb[98].mxu1 %v4847_v1  ;;  %v840_v1 = vld [vmem:[#allocation2 + $0x30] sm:$0xff] }
 0x115   : > { %1680 = vmatmul.mubr.f32.gmra.mrb[34].mxu0 %v3981_v23  ;;  %1949 = vmatprep.mubr.f32.mxu1 %v4097_v12  ;;  %v4854_v23 = vld [vmem:[#allocation25_spill] sm:$0xff] }
 0x116   : > { %1684 = vmatprep.mubr.f32.mxu0 %v4848_v34  ;;  %v922_v34 = vld [vmem:[#allocation2 + $0x10a] sm:$0xff] }
 0x118   : > { %1950 = vmatmul.mubr.f32.gmra.mrb[100].mxu1 %v4079_v14  ;;  %v871_v14 = vld [vmem:[#allocation2 + $0x1a0] sm:$0xff] }
 0x119   : > { %1685 = vmatmul.mubr.f32.gmra.mrb[36].mxu0 %v3991_v3  ;;  %1954 = vmatprep.mubr.f32.mxu1 %v4107_v33  ;;  %v4852_v3 = vld [vmem:[#allocation22_spill] sm:$0xff] }
 0x11a   : > { %1689 = vmatprep.mubr.f32.mxu0 %v4849_v41  ;;  %v873_v41 = vld [vmem:[#allocation2 + $0x39] sm:$0xff] }
 0x11c   : > { %1955 = vmatmul.mubr.f32.gmra.mrb[102].mxu1 %v4089_v63  ;;  %v4853_v63 = vld [vmem:[#allocation41_spill] sm:$0xff] }
 0x11d   : > { %1690 = vmatmul.mubr.f32.gmra.mrb[38].mxu0 %v4005_v7  ;;  %1959 = vmatprep.mubr.f32.mxu1 %v4271_v47 }
 0x11e   : > { %1694 = vmatprep.mubr.f32.mxu0 %v4850_v48 }
 0x120   : > { %1960 = vmatmul.mubr.f32.gmra.mrb[104].mxu1 %v4851_v57  ;;  %v841_v57 = vld [vmem:[#allocation2 + $0x38] sm:$0xff] }
 0x121   : > { %1695 = vmatmul.mubr.f32.gmra.mrb[40].mxu0 %v4016_v28  ;;  %1964 = vmatprep.mubr.f32.mxu1 %v4277_v53 }
 0x122   : > { %1699 = vmatprep.mubr.f32.mxu0 %v4852_v3 }
 0x123   : > { %v4283_v11 = vpop.f32.mrb[0].mxu1 }
 0x124   : > { %1965 = vmatmul.mubr.f32.gmra.mrb[106].mxu1 %v4853_v63  ;;  %v1148_v7 = vpop.f32.mrb[1].mxu1 }
 0x125   : > { %1700 = vmatmul.mubr.f32.gmra.mrb[42].mxu0 %v4027_v17  ;;  %1969 = vmatprep.mubr.f32.mxu1 %v902_v0  ;;  %v874_v0 = vld [vmem:[#allocation2 + $0x49] sm:$0xff] }
 0x126   : > { %1704 = vmatprep.mubr.f32.mxu0 %v4854_v23  ;;  %v842_v7 = vld [vmem:[#allocation2 + $0x48] sm:$0xff] }
 0x127   : > { %v4288_v52 = vpop.f32.mrb[2].mxu1 }
 0x128   : > { %1970 = vmatmul.mubr.f32.gmra.mrb[108].mxu1 %v870_v16  ;;  %v1153_v28 = vpop.f32.mrb[3].mxu1  ;;  %v875_v16 = vld [vmem:[#allocation2 + $0x51] sm:$0xff] }
 0x129   : > { %1705 = vmatmul.mubr.f32.gmra.mrb[44].mxu0 %v4825_v19  ;;  %1974 = vmatprep.mubr.f32.mxu1 %v903_v26 }
 0x12a   : > { %1709 = vmatprep.mubr.f32.mxu0 %v4855_v35 }
 0x12b   : > { %v4292_v21 = vpop.f32.mrb[4].mxu1 }
 0x12c   : > { %1975 = vmatmul.mubr.f32.gmra.mrb[110].mxu1 %v871_v14  ;;  %v1158_v17 = vpop.f32.mrb[5].mxu1  ;;  %v843_v14 = vld [vmem:[#allocation2 + $0x50] sm:$0xff] }
 0x12d   : > { %1710 = vmatmul.mubr.f32.gmra.mrb[46].mxu0 %v4829_v38  ;;  %2668 = vmatprep.mubr.f32.mxu1 %v904_v30  ;;  %v914_v38 = vld [vmem:[#allocation2 + $0xaa] sm:$0xff]  ;;  %v876_v30 = vld [vmem:[#allocation2 + $0x61] sm:$0xff] }
 0x12e   : > { %1714 = vmatprep.mubr.f32.mxu0 %v4856_v13 }
 0x12f   : > { %v4296_v40 = vpop.f32.mrb[6].mxu1 }
 0x130   : > { %2669 = vmatmul.mubr.f32.vlgmr.msra.gmra.mrb[112].mxu1 %v905_v46  ;;  %v1163_v50 = vpop.f32.mrb[7].mxu1  ;;  %v877_v46 = vld [vmem:[#allocation2 + $0x69] sm:$0xff] }
 0x131   : > { %1715 = vmatmul.mubr.f32.gmra.mrb[48].mxu0 %v4833_v54  ;;  %2671 = vmatprep.mubr.f32.mxu1 %v906_v31  ;;  %v4861_v54 = vld [vmem:[#allocation42_spill] sm:$0xff]  ;;  %v878_v50 = vld [vmem:[#allocation2 + $0x79] sm:$0xff] }
 0x132   : > { %1719 = vmatprep.mubr.f32.mxu0 %v4857_v6 }
 0x133   : > { %v4300_v37 = vpop.f32.mrb[8].mxu1 }
 0x134   : > { %2672 = vmatmul.mubr.f32.gmra.mrb[114].mxu1 %v907_v27  ;;  %v1168_v51 = vpop.f32.mrb[9].mxu1 }
 0x135   : > { %1720 = vmatmul.mubr.f32.gmra.mrb[50].mxu0 %v4837_v5  ;;  %2674 = vmatprep.mubr.f32.mxu1 %v908_v61  ;;  %v846_v61 = vld [vmem:[#allocation2 + $0x78] sm:$0xff] }
 0x136   : > { %1724 = vmatprep.mubr.f32.mxu0 %v4858_v45  ;;  %v934_v51 = vld [vmem:[#allocation2 + $0x19a] sm:$0xff] }
 0x137   : > { %v4304_v18 = vpop.f32.mrb[10].mxu1 }
 0x138   : > { %2675 = vmatmul.mubr.f32.gmra.mrb[116].mxu1 %v909_v8  ;;  %v1173_v56 = vpop.f32.mrb[11].mxu1  ;;  %v879_v8 = vld [vmem:[#allocation2 + $0x81] sm:$0xff] }
 0x139   : > { %1725 = vmatmul.mubr.f32.gmra.mrb[52].mxu0 %v4841_v24  ;;  %2677 = vmatprep.mubr.f32.mxu1 %v910_v62  ;;  %v935_v56 = vld [vmem:[#allocation2 + $0x1a2] sm:$0xff] }
 0x13a   : > { %1729 = vmatprep.mubr.f32.mxu0 %v4859_v9 }
 0x13b   : > { %v4308_v19 = vpop.f32.mrb[12].mxu1 }
 0x13c   : > { %2678 = vmatmul.mubr.f32.gmra.mrb[118].mxu1 %v911_v4  ;;  %v1178_v25 = vpop.f32.mrb[13].mxu1  ;;  %v847_v4 = vld [vmem:[#allocation2 + $0x80] sm:$0xff] }
 0x13d   : > { %1730 = vmatmul.mubr.f32.gmra.mrb[54].mxu0 %v4845_v59  ;;  %2680 = vmatprep.mubr.f32.mxu1 %v912_v15 }
 0x13e   : > { %1734 = vmatprep.mubr.f32.mxu0 %v4860_v32 }
 0x13f   : > { %v4312_v42 = vpop.f32.mrb[14].mxu1 }
 0x140   : > { %2681 = vmatmul.mubr.f32.gmra.mrb[120].mxu1 %v913_v29  ;;  %v1183_v43 = vpop.f32.mrb[15].mxu1 }
 0x141   : > { %1735 = vmatmul.mubr.f32.gmra.mrb[56].mxu0 %v4097_v12  ;;  %2683 = vmatprep.mubr.f32.mxu1 %v914_v38 }
 0x142   : > { %1739 = vmatprep.mubr.f32.mxu0 %v4861_v54 }
 0x143   : > { %v4318_v2 = vpop.f32.mrb[16].mxu1 }
 0x144   : > { %2684 = vmatmul.mubr.f32.gmra.mrb[122].mxu1 %v915_v49  ;;  %v1188_v5 = vpop.f32.mrb[17].mxu1 }
 0x145   : > { %1740 = vmatmul.mubr.f32.gmra.mrb[58].mxu0 %v4107_v33  ;;  %2686 = vmatprep.mubr.f32.mxu1 %v916_v55 }
 0x146   : > { %1744 = vmatprep.mubr.f32.mxu0 %v4316_v58 }
 0x147   : > { %v4324_v12 = vpop.f32.mrb[18].mxu1 }
 0x148   : > { %2687 = vmatmul.mubr.f32.gmra.mrb[124].mxu1 %v917_v10  ;;  %v1193_v24 = vpop.f32.mrb[19].mxu1 }
 0x149   : > { %1745 = vmatmul.mubr.f32.gmra.mrb[60].mxu0 %v4271_v47  ;;  %2689 = vmatprep.mubr.f32.mxu1 %v918_v20 }
 0x14a   : > { %1749 = vmatprep.mubr.f32.mxu0 %v4322_v22 }
 0x14b   : > { %v4328_v33 = vpop.f32.mrb[20].mxu1 }
 0x14c   : > { %2690 = vmatmul.mubr.f32.gmra.mrb[126].mxu1 %v919_v36  ;;  %v1198_v59 = vpop.f32.mrb[21].mxu1 }
 0x14d   : > { %1750 = vmatmul.mubr.f32.gmra.mrb[62].mxu0 %v4277_v53  ;;  %2692 = vmatprep.mubr.f32.mxu1 %v920_v39 }
 0x14e   : > { %1819 = vmatprep.mubr.f32.mxu0 %v872_v44 }
 0x14f   : > { %v4331_v48 = vpop.f32.mrb[22].mxu1 }
 0x150   : > { %2693 = vmatmul.mubr.f32.gmra.mrb[128].mxu1 %v921_v60  ;;  %v1203_v47 = vpop.f32.mrb[23].mxu1 }
 0x151   : > { %1820 = vmatmul.mubr.f32.vlgmr.msra.gmra.mrb[0].mxu0 %v840_v1  ;;  %2695 = vmatprep.mubr.f32.mxu1 %v922_v34 }
 0x152   : > { %1824 = vmatprep.mubr.f32.mxu0 %v873_v41 }
 0x153   : > { %v4333_v63 = vpop.f32.mrb[24].mxu1 }
 0x154   : > { %2696 = vmatmul.mubr.f32.gmra.mrb[130].mxu1 %v4852_v3  ;;  %v1208_v53 = vpop.f32.mrb[25].mxu1 }
 0x155   : > { %1825 = vmatmul.mubr.f32.gmra.mrb[2].mxu0 %v841_v57  ;;  %2698 = vmatprep.mubr.f32.mxu1 %v4854_v23  ;;  %v844_v23 = vld [vmem:[#allocation2 + $0x60] sm:$0xff] }
 0x156   : > { %1829 = vmatprep.mubr.f32.mxu0 %v874_v0 }
 0x157   : > { %v4337_v26 = vpop.f32.mrb[26].mxu1 }
 0x158   : > { %2699 = vmatmul.mubr.f32.gmra.mrb[132].mxu1 %v4855_v35  ;;  %v1213_v28 = vpop.f32.mrb[27].mxu1 }
 0x159   : > { %1830 = vmatmul.mubr.f32.gmra.mrb[4].mxu0 %v842_v7  ;;  %2701 = vmatprep.mubr.f32.mxu1 %v4856_v13  ;;  %v845_v13 = vld [vmem:[#allocation2 + $0x68] sm:$0xff] }
 0x15a   : > { %1834 = vmatprep.mubr.f32.mxu0 %v875_v16 }
 0x15b   : > { %v4341_v17 = vpop.f32.mrb[28].mxu1 }
 0x15c   : > { %2702 = vmatmul.mubr.f32.gmra.mrb[134].mxu1 %v4857_v6  ;;  %v1218_v3 = vpop.f32.mrb[29].mxu1 }
 0x15d   : > { %1835 = vmatmul.mubr.f32.gmra.mrb[6].mxu0 %v843_v14  ;;  %2704 = vmatprep.mubr.f32.mxu1 %v4858_v45 }
 0x15e   : > { %1839 = vmatprep.mubr.f32.mxu0 %v876_v30 }
 0x15f   : > { %v4345_v31 = vpop.f32.mrb[30].mxu1 }
 0x160   : > { %2705 = vmatmul.mubr.f32.gmra.mrb[136].mxu1 %v4859_v9  ;;  %v1223_v35 = vpop.f32.mrb[31].mxu1 }
 0x161   : > { %1840 = vmatmul.mubr.f32.gmra.mrb[8].mxu0 %v844_v23  ;;  %2707 = vmatprep.mubr.f32.mxu1 %v4860_v32 }
 0x162   : > { %1844 = vmatprep.mubr.f32.mxu0 %v877_v46 }
 0x163   : > { %v4349_v27 = vpop.f32.mrb[32].mxu1 }
 0x164   : > { %2708 = vmatmul.mubr.f32.gmra.mrb[138].mxu1 %v4861_v54  ;;  %v1228_v6 = vpop.f32.mrb[33].mxu1 }
 0x165   : > { %1845 = vmatmul.mubr.f32.gmra.mrb[10].mxu0 %v845_v13  ;;  %2710 = vmatprep.mubr.f32.mxu1 %v4316_v58 }
 0x166   : > { %1849 = vmatprep.mubr.f32.mxu0 %v878_v50 }
 0x167   : > { %v4353_v45 = vpop.f32.mrb[34].mxu1 }
 0x168   : > { %2711 = vmatmul.mubr.f32.gmra.mrb[140].mxu1 %v4322_v22  ;;  %v1233_v62 = vpop.f32.mrb[35].mxu1 }
 0x169   : > { %1850 = vmatmul.mubr.f32.gmra.mrb[12].mxu0 %v846_v61  ;;  %2713 = vmatprep.mubr.f32.mxu1 %v934_v51 }
 0x16a   : > { %1854 = vmatprep.mubr.f32.mxu0 %v879_v8 }
 0x16b   : > { %v4356_v9 = vpop.f32.mrb[36].mxu1 }
 0x16c   : > { %2714 = vmatmul.mubr.f32.gmra.mrb[142].mxu1 %v935_v56  ;;  %v1238_v15 = vpop.f32.mrb[37].mxu1 }
 0x16d   : > { %1855 = vmatmul.mubr.f32.gmra.mrb[14].mxu0 %v847_v4 }
 0x16f   : > { %v4358_v25 = vpop.f32.mrb[38].mxu1 }
 0x170   : > { %v1243_v29 = vpop.f32.mrb[39].mxu1 }
 0x173   : > { %v4360_v32 = vpop.f32.mrb[40].mxu1 }
 0x174   : > { %v1248_v38 = vpop.f32.mrb[41].mxu1 }
 0x177   : > { %v4362_v43 = vpop.f32.mrb[42].mxu1 }
 0x178   : > { %v1253_v49 = vpop.f32.mrb[43].mxu1 }
 0x17b   : > { %v4364_v54 = vpop.f32.mrb[44].mxu1 }
 0x17c   : > { %v1258_v55 = vpop.f32.mrb[45].mxu1 }
 0x17f   : > { %v4366_v58 = vpop.f32.mrb[46].mxu1 }
 0x180   : > { %v1263_v5 = vpop.f32.mrb[47].mxu1 }
 0x183   : > { %v4368_v10 = vpop.f32.mrb[48].mxu1 }
 0x184   : > { %v1268_v20 = vpop.f32.mrb[49].mxu1 }
 0x187   : > { %v4370_v22 = vpop.f32.mrb[50].mxu1 }
 0x188   : > { %v1273_v24 = vpop.f32.mrb[51].mxu1 }
 0x18b   : > { %v4372_v36 = vpop.f32.mrb[52].mxu1 }
 0x18c   : > { %v1278_v39 = vpop.f32.mrb[53].mxu1 }
 0x18f   : > { %v4374_v44 = vpop.f32.mrb[54].mxu1 }
 0x190   : > { %v1283_v59 = vpop.f32.mrb[55].mxu1 }
 0x193   : > { %v4376_v60 = vpop.f32.mrb[56].mxu1 }
 0x194   : > { %v1288_v1 = vpop.f32.mrb[57].mxu1 }
 0x197   : > { %v4378_v34 = vpop.f32.mrb[58].mxu1 }
 0x198   : > { %v1293_v41 = vpop.f32.mrb[59].mxu1 }
 0x19b   : > { %v4380_v47 = vpop.f32.mrb[60].mxu1 }
 0x19c   : > { %v1298_v57 = vpop.f32.mrb[61].mxu1 }
 0x19f   : > { %v4382_v0 = vpop.f32.mrb[62].mxu1 }
 0x1a0   : > { %v1303_v53 = vpop.f32.mrb[63].mxu1 }
 0x1a3   : > { %v1861_v7 = vpop.f32.mrb[64].mxu1 }
 0x1a4   : > { %v1863_v16 = vpop.f32.mrb[65].mxu1 }
 0x1a7   : > { %v1866_v28 = vpop.f32.mrb[66].mxu1 }
 0x1a8   : > { %v1868_v14 = vpop.f32.mrb[67].mxu1 }
 0x1ab   : > { %v1871_v30 = vpop.f32.mrb[68].mxu1 }
 0x1ac   : > { %v1873_v3 = vpop.f32.mrb[69].mxu1 }
 0x1af   : > { %v1876_v23 = vpop.f32.mrb[70].mxu1 }
 0x1b0   : > { %v1878_v46 = vpop.f32.mrb[71].mxu1 }
 0x1b3   : > { %v1881_v35 = vpop.f32.mrb[72].mxu1 }
 0x1b4   : > { %v1883_v13 = vpop.f32.mrb[73].mxu1 }
 0x1b7   : > { %v1886_v50 = vpop.f32.mrb[74].mxu1 }
 0x1b8   : > { %v1888_v6 = vpop.f32.mrb[75].mxu1 }
 0x1bb   : > { %v1891_v61 = vpop.f32.mrb[76].mxu1 }
 0x1bc   : > { %v1893_v51 = vpop.f32.mrb[77].mxu1 }
 0x1bf   : > { %v1896_v8 = vpop.f32.mrb[78].mxu1 }
 0x1c0   : > { %v1898_v62 = vpop.f32.mrb[79].mxu1 }
 0x1c3   : > { %v1901_v56 = vpop.f32.mrb[80].mxu1 }
 0x1c4   : > { %v1636_v4 = vpop.f32.mrb[16].mxu0  ;;  %v1903_v15 = vpop.f32.mrb[81].mxu1 }
 0x1c5   : > { %v2980_v29 = vadd.f32 %v1636_v4, %v4318_v2  ;;  %v1638_v38 = vpop.f32.mrb[17].mxu0 }
 0x1c7   : > { %v4385_v49 = vadd.f32 %v2980_v29, %v1861_v7  ;;  %v1906_v55 = vpop.f32.mrb[82].mxu1 }
 0x1c8   : > { %v1641_v5 = vpop.f32.mrb[18].mxu0  ;;  %v1908_v20 = vpop.f32.mrb[83].mxu1 }
 0x1c9   : > { %v2982_v24 = vadd.f32 %v1641_v5, %v4324_v12  ;;  %v1643_v39 = vpop.f32.mrb[19].mxu0 }
 0x1cb   : > { %v4388_v59 = vadd.f32 %v2982_v24, %v1866_v28  ;;  %v1911_v1 = vpop.f32.mrb[84].mxu1 }
 0x1cc   : > { %v1646_v41 = vpop.f32.mrb[20].mxu0  ;;  %v1913_v57 = vpop.f32.mrb[85].mxu1 }
 0x1cd   : > { %v2984_v53 = vadd.f32 %v1646_v41, %v4328_v33  ;;  %v1648_v16 = vpop.f32.mrb[21].mxu0 }
 0x1cf   : > { %v4391_v14 = vadd.f32 %v2984_v53, %v1871_v30  ;;  %v1916_v2 = vpop.f32.mrb[86].mxu1 }
 0x1d0   : > { %v1651_v3 = vpop.f32.mrb[22].mxu0  ;;  %v1918_v7 = vpop.f32.mrb[87].mxu1 }
 0x1d1   : > { %v2986_v46 = vadd.f32 %v1651_v3, %v4331_v48  ;;  %v1653_v13 = vpop.f32.mrb[23].mxu0 }
 0x1d3   : > { %v4394_v6 = vadd.f32 %v2986_v46, %v1876_v23  ;;  %v1921_v12 = vpop.f32.mrb[88].mxu1 }
 0x1d4   : > { %v1656_v51 = vpop.f32.mrb[24].mxu0  ;;  %v1923_v28 = vpop.f32.mrb[89].mxu1 }
 0x1d5   : > { %v2988_v62 = vadd.f32 %v1656_v51, %v4333_v63  ;;  %v1658_v4 = vpop.f32.mrb[25].mxu0 }
 0x1d7   : > { %v4397_v15 = vadd.f32 %v2988_v62, %v1881_v35  ;;  %v1926_v33 = vpop.f32.mrb[90].mxu1 }
 0x1d8   : > { %v1661_v29 = vpop.f32.mrb[26].mxu0  ;;  %v1928_v30 = vpop.f32.mrb[91].mxu1 }
 0x1d9   : > { %v2990_v38 = vadd.f32 %v1661_v29, %v4337_v26  ;;  %v1663_v5 = vpop.f32.mrb[27].mxu0 }
 0x1db   : > { %v4400_v20 = vadd.f32 %v2990_v38, %v1886_v50  ;;  %v1931_v48 = vpop.f32.mrb[92].mxu1 }
 0x1dc   : > { %v1666_v24 = vpop.f32.mrb[28].mxu0  ;;  %v1933_v23 = vpop.f32.mrb[93].mxu1 }
 0x1dd   : > { %v2992_v39 = vadd.f32 %v1666_v24, %v4341_v17  ;;  %v1668_v41 = vpop.f32.mrb[29].mxu0 }
 0x1df   : > { %v4403_v57 = vadd.f32 %v2992_v39, %v1891_v61  ;;  %v1936_v63 = vpop.f32.mrb[94].mxu1 }
 0x1e0   : > { %v1671_v53 = vpop.f32.mrb[30].mxu0  ;;  %v1938_v35 = vpop.f32.mrb[95].mxu1 }
 0x1e1   : > { %v2994_v16 = vadd.f32 %v1671_v53, %v4345_v31  ;;  %v1673_v3 = vpop.f32.mrb[31].mxu0 }
 0x1e3   : > { %v4406_v7 = vadd.f32 %v2994_v16, %v1896_v8  ;;  %v1941_v26 = vpop.f32.mrb[96].mxu1 }
 0x1e4   : > { %v1676_v46 = vpop.f32.mrb[32].mxu0  ;;  %v1943_v50 = vpop.f32.mrb[97].mxu1 }
 0x1e5   : > { %v2996_v13 = vadd.f32 %v1676_v46, %v4349_v27  ;;  %v1678_v51 = vpop.f32.mrb[33].mxu0 }
 0x1e7   : > { %v4409_v28 = vadd.f32 %v2996_v13, %v1901_v56  ;;  %v1946_v17 = vpop.f32.mrb[98].mxu1 }
 0x1e8   : > { %v1681_v62 = vpop.f32.mrb[34].mxu0  ;;  %v1948_v61 = vpop.f32.mrb[99].mxu1 }
 0x1e9   : > { %v2998_v4 = vadd.f32 %v1681_v62, %v4353_v45  ;;  %v1683_v29 = vpop.f32.mrb[35].mxu0 }
 0x1eb   : > { %v4412_v30 = vadd.f32 %v2998_v4, %v1906_v55  ;;  %v1951_v31 = vpop.f32.mrb[100].mxu1 }
 0x1ec   : > { %v1686_v38 = vpop.f32.mrb[36].mxu0  ;;  %v1953_v8 = vpop.f32.mrb[101].mxu1 }
 0x1ed   : > { %v3000_v5 = vadd.f32 %v1686_v38, %v4356_v9  ;;  %v1688_v24 = vpop.f32.mrb[37].mxu0 }
 0x1ef   : > { %v4415_v23 = vadd.f32 %v3000_v5, %v1911_v1  ;;  %v1956_v27 = vpop.f32.mrb[102].mxu1 }
 0x1f0   : > { %v1691_v39 = vpop.f32.mrb[38].mxu0  ;;  %v1958_v56 = vpop.f32.mrb[103].mxu1 }
 0x1f1   : > { %v3002_v41 = vadd.f32 %v1691_v39, %v4358_v25  ;;  %v1693_v53 = vpop.f32.mrb[39].mxu0 }
 0x1f3   : > { %v4418_v35 = vadd.f32 %v3002_v41, %v1916_v2  ;;  %v1961_v45 = vpop.f32.mrb[104].mxu1 }
 0x1f4   : > { %v1696_v16 = vpop.f32.mrb[40].mxu0  ;;  %v1963_v55 = vpop.f32.mrb[105].mxu1 }
 0x1f5   : > { %v3004_v3 = vadd.f32 %v1696_v16, %v4360_v32  ;;  %v1698_v46 = vpop.f32.mrb[41].mxu0 }
 0x1f7   : > { %v4421_v50 = vadd.f32 %v3004_v3, %v1921_v12  ;;  %v4423_v9 = vpop.f32.mrb[106].mxu1 }
 0x1f8   : > { %v1701_v1 = vpop.f32.mrb[42].mxu0  ;;  %v1968_v13 = vpop.f32.mrb[107].mxu1 }
 0x1f9   : > { %v3006_v51 = vadd.f32 %v1701_v1, %v4362_v43  ;;  %v1703_v62 = vpop.f32.mrb[43].mxu0 }
 0x1fb   : > { %v4426_v61 = vpop.f32.mrb[108].mxu1  ;;  %v4428_v25 = vadd.f32 %v3006_v51, %v1926_v33 }
 0x1fc   : > { %v1706_v2 = vpop.f32.mrb[44].mxu0  ;;  %v1973_v4 = vpop.f32.mrb[109].mxu1 }
 0x1fd   : > { %v3008_v29 = vadd.f32 %v1706_v2, %v4364_v54  ;;  %v1708_v38 = vpop.f32.mrb[45].mxu0 }
 0x1ff   : > { %v4431_v32 = vpop.f32.mrb[110].mxu1  ;;  %v4433_v12 = vadd.f32 %v3008_v29, %v1931_v48 }
 0x200   : > { %v1711_v8 = vpop.f32.mrb[46].mxu0  ;;  %v1978_v5 = vpop.f32.mrb[111].mxu1 }
 0x201   : > { %v3010_v24 = vadd.f32 %v1711_v8, %v4366_v58  ;;  %v1713_v39 = vpop.f32.mrb[47].mxu0 }
 0x203   : > { %v4436_v43 = vpop.f32.mrb[112].mxu1  ;;  %v4438_v56 = vadd.f32 %v3010_v24, %v1936_v63 }
 0x204   : > { %v1716_v33 = vpop.f32.mrb[48].mxu0  ;;  %v4440_v41 = vpop.f32.mrb[113].mxu1 }
 0x205   : > { %v3012_v53 = vadd.f32 %v1716_v33, %v4368_v10  ;;  %v1718_v54 = vpop.f32.mrb[49].mxu0 }
 0x207   : > { %v4443_v16 = vpop.f32.mrb[114].mxu1  ;;  %v4445_v55 = vadd.f32 %v3012_v53, %v1941_v26 }
 0x208   : > { %v1721_v48 = vpop.f32.mrb[50].mxu0  ;;  %v4447_v3 = vpop.f32.mrb[115].mxu1 }
 0x209   : > { %v3014_v58 = vadd.f32 %v1721_v48, %v4370_v22  ;;  %v1723_v46 = vpop.f32.mrb[51].mxu0 }
 0x20b   : > { %v4450_v1 = vpop.f32.mrb[116].mxu1  ;;  %v4452_v63 = vadd.f32 %v3014_v58, %v1946_v17 }
 0x20c   : > { %v1726_v13 = vpop.f32.mrb[52].mxu0  ;;  %v4454_v51 = vpop.f32.mrb[117].mxu1 }
 0x20d   : > { %v3016_v10 = vadd.f32 %v1726_v13, %v4372_v36  ;;  %v1728_v62 = vpop.f32.mrb[53].mxu0 }
 0x20f   : > { %v4457_v2 = vpop.f32.mrb[118].mxu1  ;;  %v4459_v26 = vadd.f32 %v3016_v10, %v1951_v31 }
 0x210   : > { %v1731_v4 = vpop.f32.mrb[54].mxu0  ;;  %v4461_v29 = vpop.f32.mrb[119].mxu1 }
 0x211   : > { %v3018_v22 = vadd.f32 %v1731_v4, %v4374_v44  ;;  %v1733_v38 = vpop.f32.mrb[55].mxu0 }
 0x213   : > { %v2682_v17 = vpop.f32.mrb[120].mxu1  ;;  %v4470_v36 = vadd.f32 %v3018_v22, %v1956_v27 }
 0x214   : > { %v1736_v8 = vpop.f32.mrb[56].mxu0  ;;  %v4473_v31 = vadd.f32 %v4388_v59, %v2682_v17  ;;  %v2086_v5 = vpop.f32.mrb[121].mxu1 }
 0x215   : > { %v3020_v44 = vadd.f32 %v1736_v8, %v4376_v60  ;;  %v1738_v24 = vpop.f32.mrb[57].mxu0  ;;  %v4477_v39 = vadd.f32 %v4385_v49, %v2086_v5 }
 0x216   : > { %2214 = vst [vmem:[%s4468_s8 + $0x48] sm:$0xff] %v4473_v31 }
 0x217   : > { %2213 = vst [vmem:[%s4468_s8 + $0x40] sm:$0xff] %v4477_v39  ;;  %v2685_v33 = vpop.f32.mrb[122].mxu1  ;;  %v4483_v27 = vadd.f32 %v3020_v44, %v1961_v45 }
 0x218   : > { %v1741_v53 = vpop.f32.mrb[58].mxu0  ;;  %v4486_v59 = vadd.f32 %v4394_v6, %v2685_v33  ;;  %v2096_v54 = vpop.f32.mrb[123].mxu1 }
 0x219   : > { %v3022_v60 = vadd.f32 %v1741_v53, %v4378_v34  ;;  %v1743_v48 = vpop.f32.mrb[59].mxu0  ;;  %v4490_v49 = vadd.f32 %v4391_v14, %v2096_v54 }
 0x21a   : > { %2216 = vst [vmem:[%s4468_s8 + $0x58] sm:$0xff] %v4486_v59 }
 0x21b   : > { %2215 = vst [vmem:[%s4468_s8 + $0x50] sm:$0xff] %v4490_v49  ;;  %v2688_v58 = vpop.f32.mrb[124].mxu1  ;;  %v4497_v45 = vadd.f32 %v3022_v60, %v4423_v9 }
 0x21c   : > { %v1746_v46 = vpop.f32.mrb[60].mxu0  ;;  %v4500_v6 = vadd.f32 %v4400_v20, %v2688_v58  ;;  %v2106_v13 = vpop.f32.mrb[125].mxu1 }
 0x21d   : > { %v3024_v34 = vadd.f32 %v1746_v46, %v4380_v47  ;;  %v1748_v10 = vpop.f32.mrb[61].mxu0  ;;  %v4504_v14 = vadd.f32 %v4397_v15, %v2106_v13 }
 0x21e   : > { %2218 = vst [vmem:[%s4468_s8 + $0x68] sm:$0xff] %v4500_v6 }
 0x21f   : > { %2217 = vst [vmem:[%s4468_s8 + $0x60] sm:$0xff] %v4504_v14  ;;  %v2691_v62 = vpop.f32.mrb[126].mxu1  ;;  %v4511_v9 = vadd.f32 %v3024_v34, %v4426_v61 }
 0x220   : > { %v1751_v4 = vpop.f32.mrb[62].mxu0  ;;  %v4514_v20 = vadd.f32 %v4406_v7, %v2691_v62  ;;  %v2116_v22 = vpop.f32.mrb[127].mxu1 }
 0x221   : > { %v3026_v47 = vadd.f32 %v1751_v4, %v4382_v0  ;;  %v1753_v38 = vpop.f32.mrb[63].mxu0  ;;  %v4518_v15 = vadd.f32 %v4403_v57, %v2116_v22 }
 0x222   : > { %2220 = vst [vmem:[%s4468_s8 + $0x78] sm:$0xff] %v4514_v20 }
 0x223   : > { %2219 = vst [vmem:[%s4468_s8 + $0x70] sm:$0xff] %v4518_v15  ;;  %v2694_v61 = vpop.f32.mrb[128].mxu1  ;;  %v4525_v17 = vadd.f32 %v3026_v47, %v4431_v32 }
 0x224   : > { %v1821_v8 = vpop.f32.mrb[0].mxu0  ;;  %v4528_v7 = vadd.f32 %v4412_v30, %v2694_v61  ;;  %v2126_v5 = vpop.f32.mrb[129].mxu1 }
 0x225   : > { %v2972_v0 = vadd.f32 %v1821_v8, %v4283_v11  ;;  %v1823_v57 = vpop.f32.mrb[1].mxu0  ;;  %v4532_v44 = vadd.f32 %v4409_v28, %v2126_v5 }
 0x226   : > { %2222 = vst [vmem:[%s4468_s8 + $0x88] sm:$0xff] %v4528_v7 }
 0x227   : > { %v2047_v24 = vadd.f32 %v2972_v0, %v4440_v41  ;;  %2221 = vst [vmem:[%s4468_s8 + $0x80] sm:$0xff] %v4532_v44  ;;  %v2697_v32 = vpop.f32.mrb[130].mxu1 }
 0x228   : > { %v1826_v33 = vpop.f32.mrb[2].mxu0  ;;  %v4540_v30 = vadd.f32 %v4418_v35, %v2697_v32  ;;  %v2136_v53 = vpop.f32.mrb[131].mxu1 }
 0x229   : > { %2205 = vst [vmem:[%s4468_s8] sm:$0xff] %v2047_v24  ;;  %v2973_v11 = vadd.f32 %v1826_v33, %v4288_v52  ;;  %v1828_v54 = vpop.f32.mrb[3].mxu0  ;;  %v4545_v28 = vadd.f32 %v4415_v23, %v2136_v53  ;;  %v2274_v48 = vmul.f32 %v2047_v24, %v2047_v24 }
 0x22a   : > { %2224 = vst [vmem:[%s4468_s8 + $0x98] sm:$0xff] %v4540_v30 }
 0x22b   : > { %v2052_v41 = vadd.f32 %v2973_v11, %v4436_v43  ;;  %2223 = vst [vmem:[%s4468_s8 + $0x90] sm:$0xff] %v4545_v28  ;;  %v2700_v60 = vpop.f32.mrb[132].mxu1 }
 0x22c   : > { %v1831_v35 = vpop.f32.mrb[4].mxu0  ;;  %v4553_v58 = vadd.f32 %v4428_v25, %v2700_v60  ;;  %v2146_v52 = vpop.f32.mrb[133].mxu1 }
 0x22d   : > { %2206 = vst [vmem:[%s4468_s8 + $0x8] sm:$0xff] %v2052_v41  ;;  %v2237_v46 = vadd.f32 %v2052_v41, %v2047_v24  ;;  %v2275_v13 = vmul.f32 %v2052_v41, %v2052_v41  ;;  %v2974_v23 = vadd.f32 %v1831_v35, %v4292_v21  ;;  %v1833_v34 = vpop.f32.mrb[5].mxu0  ;;  %v4558_v43 = vadd.f32 %v4421_v50, %v2146_v52 }
 0x22e   : > { %2226 = vst [vmem:[%s4468_s8 + $0xa8] sm:$0xff] %v4553_v58 }
 0x22f   : > { %v2306_v10 = vadd.f32 %v2275_v13, %v2274_v48  ;;  %v2057_v62 = vadd.f32 %v2974_v23, %v4447_v3  ;;  %2225 = vst [vmem:[%s4468_s8 + $0xa0] sm:$0xff] %v4558_v43  ;;  %v2703_v25 = vpop.f32.mrb[134].mxu1 }
 0x230   : > { %v1836_v4 = vpop.f32.mrb[6].mxu0  ;;  %v4566_v22 = vadd.f32 %v4438_v56, %v2703_v25  ;;  %v2156_v21 = vpop.f32.mrb[135].mxu1 }
 0x231   : > { %2207 = vst [vmem:[%s4468_s8 + $0x10] sm:$0xff] %v2057_v62  ;;  %v2238_v47 = vadd.f32 %v2237_v46, %v2057_v62  ;;  %v2276_v38 = vmul.f32 %v2057_v62, %v2057_v62  ;;  %v2975_v50 = vadd.f32 %v1836_v4, %v4296_v40  ;;  %v1838_v61 = vpop.f32.mrb[7].mxu0  ;;  %v4571_v8 = vadd.f32 %v4433_v12, %v2156_v21 }
 0x232   : > { %2228 = vst [vmem:[%s4468_s8 + $0xb8] sm:$0xff] %v4566_v22 }
 0x233   : > { %v2307_v3 = vadd.f32 %v2306_v10, %v2276_v38  ;;  %v2062_v5 = vadd.f32 %v2975_v50, %v4443_v16  ;;  %2227 = vst [vmem:[%s4468_s8 + $0xb0] sm:$0xff] %v4571_v8  ;;  %v2706_v56 = vpop.f32.mrb[136].mxu1 }
 0x234   : > { %v1841_v0 = vpop.f32.mrb[8].mxu0  ;;  %v4579_v57 = vadd.f32 %v4452_v63, %v2706_v56  ;;  %v2166_v40 = vpop.f32.mrb[137].mxu1 }
 0x235   : > { %2208 = vst [vmem:[%s4468_s8 + $0x18] sm:$0xff] %v2062_v5  ;;  %v2239_v24 = vadd.f32 %v2238_v47, %v2062_v5  ;;  %v2277_v32 = vmul.f32 %v2062_v5, %v2062_v5  ;;  %v2976_v12 = vadd.f32 %v1841_v0, %v4300_v37  ;;  %v1843_v33 = vpop.f32.mrb[9].mxu0  ;;  %v4584_v53 = vadd.f32 %v4445_v55, %v2166_v40 }
 0x236   : > { %2230 = vst [vmem:[%s4468_s8 + $0xc8] sm:$0xff] %v4579_v57  ;;  %v2282_v0 = vmul.f32 %v4477_v39, %v4477_v39 }
 0x237   : > { %v2308_v16 = vadd.f32 %v2307_v3, %v2277_v32  ;;  %v2067_v11 = vadd.f32 %v2976_v12, %v4454_v51  ;;  %2229 = vst [vmem:[%s4468_s8 + $0xc0] sm:$0xff] %v4584_v53  ;;  %v2709_v63 = vpop.f32.mrb[138].mxu1 }
 0x238   : > { %v1846_v54 = vpop.f32.mrb[10].mxu0  ;;  %v4592_v41 = vadd.f32 %v4470_v36, %v2709_v63  ;;  %v2176_v37 = vpop.f32.mrb[139].mxu1 }
 0x239   : > { %2209 = vst [vmem:[%s4468_s8 + $0x20] sm:$0xff] %v2067_v11  ;;  %v2240_v60 = vadd.f32 %v2239_v24, %v2067_v11  ;;  %v2278_v48 = vmul.f32 %v2067_v11, %v2067_v11  ;;  %v2977_v55 = vadd.f32 %v1846_v54, %v4304_v18  ;;  %v1848_v35 = vpop.f32.mrb[11].mxu0  ;;  %v4597_v52 = vadd.f32 %v4459_v26, %v2176_v37 }
 0x23a   : > { %2232 = vst [vmem:[%s4468_s8 + $0xd8] sm:$0xff] %v4592_v41 }
 0x23b   : > { %v2309_v51 = vadd.f32 %v2308_v16, %v2278_v48  ;;  %v2072_v46 = vadd.f32 %v2977_v55, %v4450_v1  ;;  %2231 = vst [vmem:[%s4468_s8 + $0xd0] sm:$0xff] %v4597_v52  ;;  %v2712_v36 = vpop.f32.mrb[140].mxu1  ;;  %v2285_v16 = vmul.f32 %v4486_v59, %v4486_v59 }
 0x23c   : > { %v1851_v13 = vpop.f32.mrb[12].mxu0  ;;  %v4605_v23 = vadd.f32 %v4497_v45, %v2712_v36  ;;  %v2186_v18 = vpop.f32.mrb[141].mxu1 }
 0x23d   : > { %2210 = vst [vmem:[%s4468_s8 + $0x28] sm:$0xff] %v2072_v46  ;;  %v2241_v34 = vadd.f32 %v2240_v60, %v2072_v46  ;;  %v2279_v10 = vmul.f32 %v2072_v46, %v2072_v46  ;;  %v2978_v26 = vadd.f32 %v1851_v13, %v4308_v19  ;;  %v1853_v62 = vpop.f32.mrb[13].mxu0  ;;  %v4610_v25 = vadd.f32 %v4483_v27, %v2186_v18 }
 0x23e   : > { %2234 = vst [vmem:[%s4468_s8 + $0xe8] sm:$0xff] %v4605_v23 }
 0x23f   : > { %v2310_v1 = vadd.f32 %v2309_v51, %v2279_v10  ;;  %v2077_v4 = vadd.f32 %v2978_v26, %v4461_v29  ;;  %2233 = vst [vmem:[%s4468_s8 + $0xe0] sm:$0xff] %v4610_v25  ;;  %v2715_v45 = vpop.f32.mrb[142].mxu1 }
 0x240   : > { %v1856_v21 = vpop.f32.mrb[14].mxu0  ;;  %v4618_v47 = vadd.f32 %v4525_v17, %v2715_v45  ;;  %v2196_v19 = vpop.f32.mrb[143].mxu1 }
 0x241   : > { %2211 = vst [vmem:[%s4468_s8 + $0x30] sm:$0xff] %v2077_v4  ;;  %v2242_v38 = vadd.f32 %v2241_v34, %v2077_v4  ;;  %v2280_v50 = vmul.f32 %v2077_v4, %v2077_v4  ;;  %v2979_v27 = vadd.f32 %v1856_v21, %v4312_v42  ;;  %v1858_v61 = vpop.f32.mrb[15].mxu0  ;;  %v4623_v3 = vadd.f32 %v4511_v9, %v2196_v19 }
 0x242   : > { %2236 = vst [vmem:[%s4468_s8 + $0xf8] sm:$0xff] %v4618_v47  ;;  %v2283_v9 = vmul.f32 %v4473_v31, %v4473_v31 }
 0x243   : > { %v2311_v29 = vadd.f32 %v2310_v1, %v2280_v50  ;;  %v2082_v5 = vadd.f32 %v2979_v27, %v4457_v2  ;;  %2235 = vst [vmem:[%s4468_s8 + $0xf0] sm:$0xff] %v4623_v3  ;;  %v2284_v2 = vmul.f32 %v4490_v49, %v4490_v49 }
 0x245   : > { %2212 = vst [vmem:[%s4468_s8 + $0x38] sm:$0xff] %v2082_v5  ;;  %v2243_v17 = vadd.f32 %v2242_v38, %v2082_v5  ;;  %v2281_v56 = vmul.f32 %v2082_v5, %v2082_v5 }
 0x247   : > { %v2244_v40 = vadd.f32 %v2243_v17, %v4477_v39  ;;  %v2312_v42 = vadd.f32 %v2311_v29, %v2281_v56  ;;  %v2286_v39 = vmul.f32 %v4504_v14, %v4504_v14 }
 0x249   : > { %v2245_v24 = vadd.f32 %v2244_v40, %v4473_v31  ;;  %v2313_v32 = vadd.f32 %v2312_v42, %v2282_v0  ;;  %v2287_v31 = vmul.f32 %v4500_v6, %v4500_v6 }
 0x24b   : > { %v2246_v12 = vadd.f32 %v2245_v24, %v4490_v49  ;;  %v2314_v33 = vadd.f32 %v2313_v32, %v2283_v9  ;;  %v2288_v49 = vmul.f32 %v4518_v15, %v4518_v15 }
 0x24d   : > { %v2247_v11 = vadd.f32 %v2246_v12, %v4486_v59  ;;  %v2315_v63 = vadd.f32 %v2314_v33, %v2284_v2  ;;  %v2289_v59 = vmul.f32 %v4514_v20, %v4514_v20  ;;  %v2304_v33 = vmul.f32 %v4623_v3, %v4623_v3 }
 0x24f   : > { %v2248_v54 = vadd.f32 %v2247_v11, %v4504_v14  ;;  %v2316_v37 = vadd.f32 %v2315_v63, %v2285_v16  ;;  %v2290_v14 = vmul.f32 %v4532_v44, %v4532_v44  ;;  %v2305_v16 = vmul.f32 %v4618_v47, %v4618_v47 }
 0x251   : > { %v2249_v60 = vadd.f32 %v2248_v54, %v4500_v6  ;;  %v2317_v48 = vadd.f32 %v2316_v37, %v2286_v39  ;;  %v2291_v6 = vmul.f32 %v4528_v7, %v4528_v7 }
 0x253   : > { %v2250_v55 = vadd.f32 %v2249_v60, %v4518_v15  ;;  %v2318_v35 = vadd.f32 %v2317_v48, %v2287_v31  ;;  %v2292_v15 = vmul.f32 %v4545_v28, %v4545_v28 }
 0x255   : > { %v2251_v51 = vadd.f32 %v2250_v55, %v4514_v20  ;;  %v2319_v46 = vadd.f32 %v2318_v35, %v2288_v49  ;;  %v2293_v20 = vmul.f32 %v4540_v30, %v4540_v30 }
 0x257   : > { %v2252_v36 = vadd.f32 %v2251_v51, %v4532_v44  ;;  %v2320_v13 = vadd.f32 %v2319_v46, %v2289_v59  ;;  %v2294_v44 = vmul.f32 %v4558_v43, %v4558_v43 }
 0x259   : > { %v2253_v18 = vadd.f32 %v2252_v36, %v4528_v7  ;;  %v2321_v34 = vadd.f32 %v2320_v13, %v2290_v14  ;;  %v2295_v7 = vmul.f32 %v4553_v58, %v4553_v58 }
 0x25b   : > { %v2322_v10 = vadd.f32 %v2321_v34, %v2291_v6  ;;  %v2254_v26 = vadd.f32 %v2253_v18, %v4545_v28  ;;  %v2296_v28 = vmul.f32 %v4571_v8, %v4571_v8 }
 0x25d   : > { %v2255_v62 = vadd.f32 %v2254_v26, %v4540_v30  ;;  %v2323_v1 = vadd.f32 %v2322_v10, %v2292_v15  ;;  %v2297_v30 = vmul.f32 %v4566_v22, %v4566_v22 }
 0x25f   : > { %v2256_v4 = vadd.f32 %v2255_v62, %v4558_v43  ;;  %v2324_v45 = vadd.f32 %v2323_v1, %v2293_v20  ;;  %v2298_v43 = vmul.f32 %v4584_v53, %v4584_v53 }
 0x261   : > { %v2257_v21 = vadd.f32 %v2256_v4, %v4553_v58  ;;  %v2325_v19 = vadd.f32 %v2324_v45, %v2294_v44  ;;  %v2299_v58 = vmul.f32 %v4579_v57, %v4579_v57 }
 0x263   : > { %v2258_v38 = vadd.f32 %v2257_v21, %v4571_v8  ;;  %v2326_v50 = vadd.f32 %v2325_v19, %v2295_v7  ;;  %v2300_v8 = vmul.f32 %v4597_v52, %v4597_v52 }
 0x265   : > { %v2259_v27 = vadd.f32 %v2258_v38, %v4566_v22  ;;  %v2327_v61 = vadd.f32 %v2326_v50, %v2296_v28  ;;  %v2301_v22 = vmul.f32 %v4592_v41, %v4592_v41 }
 0x267   : > { %v2260_v29 = vadd.f32 %v2259_v27, %v4584_v53  ;;  %v2328_v5 = vadd.f32 %v2327_v61, %v2297_v30  ;;  %v2302_v53 = vmul.f32 %v4610_v25, %v4610_v25 }
 0x269   : > { %v2261_v17 = vadd.f32 %v2260_v29, %v4579_v57  ;;  %v2329_v56 = vadd.f32 %v2328_v5, %v2298_v43  ;;  %v2303_v57 = vmul.f32 %v4605_v23, %v4605_v23 }
 0x26b   : > { %v2262_v0 = vadd.f32 %v2261_v17, %v4597_v52  ;;  %v2330_v40 = vadd.f32 %v2329_v56, %v2299_v58 }
 0x26d   : > { %v2263_v42 = vadd.f32 %v2262_v0, %v4592_v41  ;;  %v2331_v9 = vadd.f32 %v2330_v40, %v2300_v8 }
 0x26f   : > { %v2264_v24 = vadd.f32 %v2263_v42, %v4610_v25  ;;  %v2332_v32 = vadd.f32 %v2331_v9, %v2301_v22 }
 0x271   : > { %v2265_v2 = vadd.f32 %v2264_v24, %v4605_v23  ;;  %v2333_v12 = vadd.f32 %v2332_v32, %v2302_v53 }
 0x273   : > { %v2266_v52 = vadd.f32 %v2265_v2, %v4623_v3  ;;  %v2334_v41 = vadd.f32 %v2333_v12, %v2303_v57 }
 0x275   : > { %v2267_v11 = vadd.f32 %v2266_v52, %v4618_v47  ;;  %v2335_v25 = vadd.f32 %v2334_v41, %v2304_v33 }
 0x277   : > { %v2268_v63 = vrot.slane %v2267_v11, 4  ;;  %v2336_v39 = vadd.f32 %v2335_v25, %v2305_v16 }
 0x279   : > { %v2269_v54 = vadd.f32 %v2268_v63, %v2267_v11  ;;  %v2337_v37 = vrot.slane %v2336_v39, 4 }
 0x27b   : > { %v2270_v31 = vrot.slane %v2269_v54, 2  ;;  %v2338_v23 = vadd.f32 %v2337_v37, %v2336_v39 }
 0x27d   : > { %v2271_v60 = vadd.f32 %v2270_v31, %v2269_v54  ;;  %v2339_v48 = vrot.slane %v2338_v23, 2 }
 0x27f   : > { %v2272_v49 = vrot.slane %v2271_v60, 1  ;;  %v2340_v55 = vadd.f32 %v2339_v48, %v2338_v23 }
 0x281   : > { %v2341_v35 = vrot.slane %v2340_v55, 1  ;;  %v2273_v3 = vadd.f32 %v2272_v49, %v2271_v60 }
 0x283   : > { %v2342_v59 = vadd.f32 %v2341_v35, %v2340_v55 }
 0x285   : > { %v2344_v47 = vsel %vm2343_vm1, %v2273_v3, %v2342_v59 }
 0x286   : > { %v2346_v51 = vsel %vm2345_vm2, %v2344_v47, 0.0 }
 0x287   : > { %2347 = vst [vmem:[%s505_s11] sm:$0xff] %v2346_v51 }
 0x288 PF: > { %s18_s26 = sadd.s32 1, %s3156_s26   ;;  %s4862_s24 = smov %s3152_s25 }
 0x289   : > { %p15_p5 = scmp.ge.s32.totalorder %s18_s26, 4   ;;  %s4863_s25 = smov %s4865_s4 }
 0x28b   :  { %17 = sbr.rel (!%p15_p5) target bundleno = 2 (0x2), region = 98 }

// kernel: double_conv_forward.3
= control target key start
LH: loop header
LB: loop body
LE: loop exit
PB: predicated region body
PF: predicated region fallthrough
CT: control target
= control target key end

     0   :  { %s3377_s24 = smov 0   ;;  %s3379_s25 = smov 0   ;;  %s5087_s0 = inlined_call_operand.vmem [shape: f32[2,16,16,128], index: 0, kind: input, shape index: {}, may-alias: {0,1,2}]   ;;  %s5088_s1 = inlined_call_operand.vmem [shape: f32[2,16,16,128], index: 1, kind: input, shape index: {}, may-alias: {0,1,2}]   ;;  %s5089_s2 = inlined_call_operand.vmem [shape: f32[2,16,16,128], index: 2, kind: input, shape index: {}, may-alias: {0,1,2}]   ;;  %s5090_s3 = inlined_call_operand.vmem [shape: f32[1152,128], index: 3, kind: input, shape index: {}]   ;;  %s5091_s4 = inlined_call_operand.vmem [shape: f32[1,128], index: 4, kind: input, shape index: {}]   ;;  %s5092_s5 = inlined_call_operand.vmem [shape: f32[1,128], index: 5, kind: input, shape index: {}]   ;;  %s5093_s6 = inlined_call_operand.vmem [shape: f32[2,16,16,128], index: 6, kind: output, shape index: {0}]   ;;  %s5094_s7 = inlined_call_operand.vmem [shape: f32[2,1,8,128], index: 7, kind: output, shape index: {1}]  }
   0x1   :  { %s3381_s26 = smov 0  }
   0x2 LB: > { %s37_s27 = sadd.s32 1, %s3329_s25  ;;  %p2719_p0 = scmp.ge.s32.totalorder %s3333_s26, 1  ;;  %s3333_s26 = sphi %s3381_s26, %s18_s26   ;;  %s3329_s25 = sphi %s3379_s25, %s5197_s25   ;;  %s3325_s24 = sphi %s3377_s24, %s5196_s24  }
   0x3   : > { %p39_p1 = scmp.ge.s32.totalorder %s37_s27, 2  ;;  %p348_p2 = scmp.lt.s32.totalorder %s3333_s26, 3 }
   0x5   : > { %s5199_s27 = smov (%p39_p1, %s37_s27), 0  ;;  %p349_p3 = pnand %p2719_p0, %p348_p2 }
   0x7   : > { %352 = sbr.rel (%p349_p3) target bundleno = 648 (0x288), region = 44 }
   0xe   : > { %v3400_v0 = vld [vmem:[%s5090_s3] sm:$0xff]  ;;  %v3405_v1 = vld [vmem:[%s5090_s3 + $0x8] sm:$0xff]  ;;  %v5112_v3 = vmov 0.0|0.0   ;;  %v3424_v6 = vld [vmem:[%s5090_s3 + $0x10] sm:$0xff]  ;;  %v3336_v8 = vmov 0.0   ;;  %p434_p4 = scmp.lt.s32.totalorder %s3325_s24, 1 }
   0xf   : > { %v3410_v2 = vld [vmem:[%s5090_s3 + $0x100] sm:$0xff]  ;;  %2871 = vmatprep.subr.bf16.mxu1 %v5112_v3  ;;  %2919 = vmatprep.subr.bf16.mxu0 %v5112_v3  ;;  %v2872_v4 = vpack.c.bf16 %v3405_v1, %v3400_v0  ;;  %v3419_v5 = vld [vmem:[%s5090_s3 + $0x108] sm:$0xff]  ;;  %v3429_v7 = vld [vmem:[%s5090_s3 + $0x18] sm:$0xff]  ;;  %506 = vst [vmem:[#allocation2] sm:$0xff] %v3336_v8  ;;  %vm2492_vm0 = vcmask 1040384   ;;  %vm2494_vm1 = vcmask 1041408  }
  0x10   : > { %507 = vst [vmem:[#allocation2 + $0x8] sm:$0xff] %v3336_v8  ;;  %508 = vst [vmem:[#allocation2 + $0x10] sm:$0x3] %v3336_v8  ;;  %v2920_v9 = vpack.c.bf16 %v3419_v5, %v3410_v2  ;;  %v1119_v10 = vld [vmem:[%s5090_s3 + $0x110] sm:$0xff]  ;;  %v1120_v11 = vld [vmem:[%s5090_s3 + $0x118] sm:$0xff]  ;;  %v2875_v12 = vpack.c.bf16 %v3429_v7, %v3424_v6  ;;  %s5201_s24 = smov (!%p434_p4, %s3325_s24), 1 }
  0x11   : > { %509 = vst [vmem:[#allocation2 + $0x18] sm:$0xff] %v3336_v8  ;;  %510 = vst [vmem:[#allocation2 + $0x20] sm:$0xff] %v3336_v8  ;;  %2873 = vmatpush1.bf16.msra.mxu1 %v2872_v4  ;;  %v2923_v13 = vpack.c.bf16 %v1120_v11, %v1119_v10  ;;  %v1089_v14 = vld [vmem:[%s5090_s3 + $0x20] sm:$0xff]  ;;  %v1090_v15 = vld [vmem:[%s5090_s3 + $0x28] sm:$0xff]  ;;  %s3488_s30 = sshll.u32 %s5201_s24, 8 }
  0x12   : > { %511 = vst [vmem:[#allocation2 + $0x28] sm:$0x3] %v3336_v8  ;;  %512 = vst [vmem:[#allocation2 + $0x30] sm:$0xff] %v3336_v8  ;;  %2921 = vmatpush1.bf16.msra.mxu0 %v2920_v9  ;;  %2874 = vmatprep.subr.bf16.mxu1 %v5112_v3  ;;  %v1121_v16 = vld [vmem:[%s5090_s3 + $0x120] sm:$0xff]  ;;  %v1122_v17 = vld [vmem:[%s5090_s3 + $0x128] sm:$0xff]  ;;  %v2878_v18 = vpack.c.bf16 %v1090_v15, %v1089_v14  ;;  %s456_s18 = scalar_lea.vmem %s5088_s1, %s3488_s30  ;;  %s3518_s29 = scalar_lea.vmem %s5087_s0, %s3488_s30 }
  0x13   : > { %513 = vst [vmem:[#allocation2 + $0x38] sm:$0xff] %v3336_v8  ;;  %514 = vst [vmem:[#allocation2 + $0x40] sm:$0x3] %v3336_v8  ;;  %2922 = vmatprep.subr.bf16.mxu0 %v5112_v3  ;;  %v2926_v19 = vpack.c.bf16 %v1122_v17, %v1121_v16  ;;  %v1091_v20 = vld [vmem:[%s5090_s3 + $0x30] sm:$0xff]  ;;  %v1092_v21 = vld [vmem:[%s5090_s3 + $0x38] sm:$0xff]  ;;  %s2740_s10 = sadd.s32 240, %s3488_s30  ;;  %s4839_s12 = scalar_lea.vmem %s5093_s6, %s3488_s30 }
  0x14   : > { %515 = vst [vmem:[#allocation2 + $0x48] sm:$0xff] %v3336_v8  ;;  %516 = vst [vmem:[#allocation2 + $0x50] sm:$0xff] %v3336_v8  ;;  %v1123_v22 = vld [vmem:[%s5090_s3 + $0x130] sm:$0xff]  ;;  %v1124_v23 = vld [vmem:[%s5090_s3 + $0x138] sm:$0xff]  ;;  %v2881_v24 = vpack.c.bf16 %v1092_v21, %v1091_v20  ;;  %s473_s13 = scalar_lea.vmem %s5089_s2, %s2740_s10  ;;  %s2728_s30 = sshll.u32 %s5201_s24, 3 }
  0x15   : > { %517 = vst [vmem:[#allocation2 + $0x58] sm:$0x3] %v3336_v8  ;;  %518 = vst [vmem:[#allocation2 + $0x60] sm:$0xff] %v3336_v8  ;;  %2876 = vmatpush1.bf16.msra.mxu1 %v2875_v12  ;;  %v2929_v25 = vpack.c.bf16 %v1124_v23, %v1123_v22  ;;  %v1093_v26 = vld [vmem:[%s5090_s3 + $0x40] sm:$0xff]  ;;  %v1094_v27 = vld [vmem:[%s5090_s3 + $0x48] sm:$0xff]  ;;  %s505_s14 = scalar_lea.vmem %s5094_s7, %s2728_s30 }
  0x16   : > { %519 = vst [vmem:[#allocation2 + $0x68] sm:$0xff] %v3336_v8  ;;  %520 = vst [vmem:[#allocation2 + $0x70] sm:$0x3] %v3336_v8  ;;  %2924 = vmatpush1.bf16.msra.mxu0 %v2923_v13  ;;  %2877 = vmatprep.subr.bf16.mxu1 %v5112_v3  ;;  %v1125_v28 = vld [vmem:[%s5090_s3 + $0x140] sm:$0xff]  ;;  %v1126_v29 = vld [vmem:[%s5090_s3 + $0x148] sm:$0xff]  ;;  %v2884_v30 = vpack.c.bf16 %v1094_v27, %v1093_v26 }
  0x17   : > { %521 = vst [vmem:[#allocation2 + $0x78] sm:$0xff] %v3336_v8  ;;  %522 = vst [vmem:[#allocation2 + $0x80] sm:$0xff] %v3336_v8  ;;  %2925 = vmatprep.subr.bf16.mxu0 %v5112_v3  ;;  %v2932_v31 = vpack.c.bf16 %v1126_v29, %v1125_v28  ;;  %v1095_v32 = vld [vmem:[%s5090_s3 + $0x50] sm:$0xff]  ;;  %v1096_v33 = vld [vmem:[%s5090_s3 + $0x58] sm:$0xff] }
  0x18   : > { %523 = vst [vmem:[#allocation2 + $0x88] sm:$0x3] %v3336_v8  ;;  %524 = vst [vmem:[#allocation2 + $0x90] sm:$0xff] %v3336_v8  ;;  %v1127_v34 = vld [vmem:[%s5090_s3 + $0x150] sm:$0xff]  ;;  %v1128_v35 = vld [vmem:[%s5090_s3 + $0x158] sm:$0xff]  ;;  %v2887_v36 = vpack.c.bf16 %v1096_v33, %v1095_v32 }
  0x19   : > { %525 = vst [vmem:[#allocation2 + $0x98] sm:$0xff] %v3336_v8  ;;  %526 = vst [vmem:[#allocation2 + $0xa0] sm:$0x3] %v3336_v8  ;;  %2879 = vmatpush1.bf16.msra.mxu1 %v2878_v18  ;;  %v1097_v37 = vld [vmem:[%s5090_s3 + $0x60] sm:$0xff]  ;;  %v1098_v38 = vld [vmem:[%s5090_s3 + $0x68] sm:$0xff]  ;;  %v2935_v39 = vpack.c.bf16 %v1128_v35, %v1127_v34 }
  0x1a   : > { %527 = vst [vmem:[#allocation2 + $0xa8] sm:$0xff] %v3336_v8  ;;  %528 = vst [vmem:[#allocation2 + $0xb0] sm:$0xff] %v3336_v8  ;;  %2927 = vmatpush1.bf16.msra.mxu0 %v2926_v19  ;;  %2880 = vmatprep.subr.bf16.mxu1 %v5112_v3  ;;  %v1129_v40 = vld [vmem:[%s5090_s3 + $0x160] sm:$0xff]  ;;  %v1130_v41 = vld [vmem:[%s5090_s3 + $0x168] sm:$0xff]  ;;  %v2890_v50 = vpack.c.bf16 %v1098_v38, %v1097_v37 }
  0x1b   : > { %529 = vst [vmem:[#allocation2 + $0xb8] sm:$0x3] %v3336_v8  ;;  %530 = vst [vmem:[#allocation2 + $0xc0] sm:$0xff] %v3336_v8  ;;  %2928 = vmatprep.subr.bf16.mxu0 %v5112_v3  ;;  %v3530_v42 = vld [vmem:[%s5090_s3 + $0x70] sm:$0xff]  ;;  %v3536_v43 = vld [vmem:[%s5090_s3 + $0x78] sm:$0xff]  ;;  %v2938_v54 = vpack.c.bf16 %v1130_v41, %v1129_v40 }
  0x1c   : > { %531 = vst [vmem:[#allocation2 + $0xc8] sm:$0xff] %v3336_v8  ;;  %532 = vst [vmem:[#allocation2 + $0xd0] sm:$0x3] %v3336_v8  ;;  %v741_v44 = vld [vmem:[%s456_s18] sm:$0xff]  ;;  %v742_v49 = vld [vmem:[%s456_s18 + $0x8] sm:$0xff]  ;;  %v2893_v60 = vpack.c.bf16 %v3536_v43, %v3530_v42 }
  0x1d   : > { %533 = vst [vmem:[#allocation2 + $0xd8] sm:$0xff] %v3336_v8  ;;  %534 = vst [vmem:[#allocation2 + $0xe0] sm:$0xff] %v3336_v8  ;;  %2882 = vmatpush1.bf16.msra.mxu1 %v2881_v24  ;;  %v3541_v45 = vld [vmem:[%s5091_s4] ss:$0 sm:$0xff]  ;;  %v561_v53 = vld [vmem:[%s3518_s29 + $0x8] sm:$0xff] }
  0x1e   : > { %535 = vst [vmem:[#allocation2 + $0xe8] sm:$0x3] %v3336_v8  ;;  %536 = vst [vmem:[#allocation2 + $0xf0] sm:$0xff] %v3336_v8  ;;  %2930 = vmatpush1.bf16.msra.mxu0 %v2929_v25  ;;  %2883 = vmatprep.subr.bf16.mxu1 %v5112_v3  ;;  %v3546_v46 = vld [vmem:[%s5092_s5] ss:$0 sm:$0xff]  ;;  %v751_v47 = vmul.f32 %v3541_v45, %v741_v44  ;;  %v752_v52 = vmul.f32 %v3541_v45, %v742_v49  ;;  %v1131_v55 = vld [vmem:[%s5090_s3 + $0x170] sm:$0xff] }
  0x1f   : > { %537 = vst [vmem:[#allocation2 + $0xf8] sm:$0xff] %v3336_v8  ;;  %538 = vst [vmem:[#allocation2 + $0x100] sm:$0x3] %v3336_v8  ;;  %2931 = vmatprep.subr.bf16.mxu0 %v5112_v3  ;;  %v560_v48 = vld [vmem:[%s3518_s29] sm:$0xff]  ;;  %v1132_v56 = vld [vmem:[%s5090_s3 + $0x178] sm:$0xff]  ;;  %v601_v58 = vmul.f32 %v3541_v45, %v561_v53 }
  0x20   : > { %539 = vst [vmem:[#allocation2 + $0x108] sm:$0xff] %v3336_v8  ;;  %540 = vst [vmem:[#allocation2 + $0x110] sm:$0xff] %v3336_v8  ;;  %v600_v51 = vmul.f32 %v3541_v45, %v560_v48  ;;  %v759_v57 = vadd.f32 %v3546_v46, %v751_v47  ;;  %v562_v59 = vld [vmem:[%s3518_s29 + $0x10] sm:$0xff]  ;;  %v760_v62 = vadd.f32 %v3546_v46, %v752_v52  ;;  %v563_v0 = vld [vmem:[%s3518_s29 + $0x18] sm:$0xff] }
  0x21   : > { %541 = vst [vmem:[#allocation2 + $0x118] sm:$0x3] %v3336_v8  ;;  %542 = vst [vmem:[#allocation2 + $0x120] sm:$0xff] %v3336_v8  ;;  %2885 = vmatpush1.bf16.msra.mxu1 %v2884_v30  ;;  %v602_v63 = vmul.f32 %v3541_v45, %v562_v59  ;;  %v564_v1 = vld [vmem:[%s3518_s29 + $0x20] sm:$0xff]  ;;  %v3574_v4 = vadd.f32 %v3546_v46, %v601_v58  ;;  %v603_v5 = vmul.f32 %v3541_v45, %v563_v0  ;;  %v565_v7 = vld [vmem:[%s3518_s29 + $0x28] sm:$0xff] }
  0x22   : > { %543 = vst [vmem:[#allocation2 + $0x128] sm:$0xff] %v3336_v8  ;;  %544 = vst [vmem:[#allocation2 + $0x130] sm:$0x3] %v3336_v8  ;;  %2933 = vmatpush1.bf16.msra.mxu0 %v2932_v31  ;;  %2886 = vmatprep.subr.bf16.mxu1 %v5112_v3  ;;  %v3567_v61 = vadd.f32 %v3546_v46, %v600_v51  ;;  %v761_v2 = vmax.f32 %v759_v57, 0.0  ;;  %v604_v6 = vmul.f32 %v3541_v45, %v564_v1  ;;  %v1101_v10 = vld [vmem:[%s5090_s3 + $0x80] sm:$0xff]  ;;  %v1102_v11 = vld [vmem:[%s5090_s3 + $0x88] sm:$0xff] }
  0x23   : > { %545 = vst [vmem:[#allocation2 + $0x138] sm:$0xff] %v3336_v8  ;;  %546 = vst [vmem:[#allocation2 + $0x140] sm:$0xff] %v3336_v8  ;;  %2934 = vmatprep.subr.bf16.mxu0 %v5112_v3  ;;  %v2941_v9 = vpack.c.bf16 %v1132_v56, %v1131_v55  ;;  %v762_v13 = vmax.f32 %v760_v62, 0.0  ;;  %v3588_v14 = vadd.f32 %v3546_v46, %v602_v63  ;;  %v567_v15 = vld [vmem:[%s3518_s29 + $0x38] sm:$0xff]  ;;  %v1133_v16 = vld [vmem:[%s5090_s3 + $0x180] sm:$0xff]  ;;  %v671_v19 = vmax.f32 %v3574_v4, 0.0 }
  0x24   : > { %547 = vst [vmem:[#allocation2 + $0x148] sm:$0x3] %v3336_v8  ;;  %548 = vst [vmem:[#allocation2 + $0x150] sm:$0xff] %v3336_v8  ;;  %v670_v12 = vmax.f32 %v3567_v61, 0.0  ;;  %v1134_v17 = vld [vmem:[%s5090_s3 + $0x188] sm:$0xff]  ;;  %v764_v18 = vmul.f32 0.0, %v761_v2  ;;  %v3600_v20 = vadd.f32 %v3546_v46, %v603_v5  ;;  %v3603_v21 = vadd.f32 %v3546_v46, %v604_v6 }
  0x25   : > { %549 = vst [vmem:[#allocation2 + $0x158] sm:$0xff] %v3336_v8  ;;  %550 = vst [vmem:[#allocation2 + $0x160] sm:$0x3] %v3336_v8  ;;  %2888 = vmatpush1.bf16.msra.mxu1 %v2887_v36  ;;  %v568_v22 = vld [vmem:[%s3518_s29 + $0x40] sm:$0xff]  ;;  %v3609_v23 = vmul.f32 0.0, %v762_v13  ;;  %v672_v24 = vmax.f32 %v3588_v14, 0.0  ;;  %v605_v25 = vmul.f32 %v3541_v45, %v565_v7  ;;  %v2896_v29 = vpack.c.bf16 %v1102_v11, %v1101_v10 }
  0x26   : > { %551 = vst [vmem:[#allocation2 + $0x168] sm:$0xff] %v3336_v8  ;;  %552 = vst [vmem:[#allocation2 + $0x170] sm:$0xff] %v3336_v8  ;;  %2936 = vmatpush1.bf16.msra.mxu0 %v2935_v39  ;;  %2889 = vmatprep.subr.bf16.mxu1 %v5112_v3  ;;  %v569_v27 = vld [vmem:[%s3518_s29 + $0x48] sm:$0xff]  ;;  %v570_v28 = vld [vmem:[%s3518_s29 + $0x50] sm:$0xff]  ;;  %v673_v30 = vmax.f32 %v3600_v20, 0.0  ;;  %v674_v31 = vmax.f32 %v3603_v21, 0.0  ;;  %v607_v32 = vmul.f32 %v3541_v45, %v567_v15 }
  0x27   : > { %553 = vst [vmem:[#allocation2 + $0x178] sm:$0x3] %v3336_v8  ;;  %554 = vst [vmem:[#allocation2 + $0x180] sm:$0xff] %v3336_v8  ;;  %2937 = vmatprep.subr.bf16.mxu0 %v5112_v3  ;;  %1293 = vmatprep.mubr.f32.mxu1 %v764_v18  ;;  %v2944_v33 = vpack.c.bf16 %v1134_v17, %v1133_v16  ;;  %v1103_v34 = vld [vmem:[%s5090_s3 + $0x90] sm:$0xff]  ;;  %v1104_v35 = vld [vmem:[%s5090_s3 + $0x98] sm:$0xff]  ;;  %v3631_v36 = vadd.f32 %v3546_v46, %v605_v25 }
  0x28   : > { %555 = vst [vmem:[#allocation2 + $0x188] sm:$0xff] %v3336_v8  ;;  %556 = vst [vmem:[#allocation2 + $0x190] sm:$0x3] %v3336_v8  ;;  %v608_v38 = vmul.f32 %v3541_v45, %v568_v22  ;;  %v571_v39 = vld [vmem:[%s3518_s29 + $0x58] sm:$0xff]  ;;  %v1135_v40 = vld [vmem:[%s5090_s3 + $0x190] sm:$0xff]  ;;  %v3650_v42 = vadd.f32 %v3546_v46, %v607_v32  ;;  %v609_v43 = vmul.f32 %v3541_v45, %v569_v27 }
  0x29   : > { %557 = vst [vmem:[#allocation2 + $0x198] sm:$0xff] %v3336_v8  ;;  %558 = vst [vmem:[#allocation2 + $0x1a0] sm:$0xff] %v3336_v8  ;;  %2891 = vmatpush1.bf16.msra.mxu1 %v2890_v50  ;;  %v1136_v41 = vld [vmem:[%s5090_s3 + $0x198] sm:$0xff]  ;;  %v610_v44 = vmul.f32 %v3541_v45, %v570_v28  ;;  %v572_v47 = vld [vmem:[%s3518_s29 + $0x60] sm:$0xff]  ;;  %v675_v48 = vmax.f32 %v3631_v36, 0.0  ;;  %v611_v55 = vmul.f32 %v3541_v45, %v571_v39 }
  0x2a   : > { %559 = vst [vmem:[#allocation2 + $0x1a8] sm:$0x3] %v3336_v8  ;;  %v566_v8 = vld [vmem:[%s3518_s29 + $0x30] sm:$0xff]  ;;  %2939 = vmatpush1.bf16.msra.mxu0 %v2938_v54  ;;  %2892 = vmatprep.subr.bf16.mxu1 %v5112_v3  ;;  %703 = vst [vmem:[#allocation2 + $0x19] sm:$0xff] %v670_v12  ;;  %v3659_v50 = vadd.f32 %v3546_v46, %v608_v38  ;;  %v573_v51 = vld [vmem:[%s3518_s29 + $0x68] sm:$0xff]  ;;  %v677_v52 = vmax.f32 %v3650_v42, 0.0  ;;  %v3664_v53 = vadd.f32 %v3546_v46, %v609_v43 }
  0x2b   : > { %2940 = vmatprep.subr.bf16.mxu0 %v5112_v3  ;;  %v606_v26 = vmul.f32 %v3541_v45, %v566_v8  ;;  %766 = vst [vmem:[#allocation2 + $0x1] sm:$0xff] %v764_v18  ;;  %704 = vst [vmem:[#allocation2 + $0x21] sm:$0xff] %v671_v19  ;;  %v3667_v54 = vadd.f32 %v3546_v46, %v610_v44  ;;  %v574_v56 = vld [vmem:[%s3518_s29 + $0x70] sm:$0xff]  ;;  %v2899_v57 = vpack.c.bf16 %v1104_v35, %v1103_v34  ;;  %v1105_v59 = vld [vmem:[%s5090_s3 + $0xa0] sm:$0xff] }
  0x2c   : > { %767 = vst [vmem:[#allocation2 + $0x9] sm:$0xff] %v3609_v23  ;;  %705 = vst [vmem:[#allocation2 + $0x31] sm:$0xff] %v672_v24  ;;  %v2947_v58 = vpack.c.bf16 %v1136_v41, %v1135_v40  ;;  %v612_v62 = vmul.f32 %v3541_v45, %v572_v47  ;;  %v575_v63 = vld [vmem:[%s3518_s29 + $0x78] sm:$0xff]  ;;  %v1106_v0 = vld [vmem:[%s5090_s3 + $0xa8] sm:$0xff]  ;;  %v679_v2 = vmax.f32 %v3664_v53, 0.0  ;;  %v3692_v6 = vadd.f32 %v3546_v46, %v611_v55 }
  0x2d   : > { %2894 = vmatpush1.bf16.msra.mxu1 %v2893_v60  ;;  %v3634_v37 = vadd.f32 %v3546_v46, %v606_v26  ;;  %706 = vst [vmem:[#allocation2 + $0x39] sm:$0xff] %v673_v30  ;;  %707 = vst [vmem:[#allocation2 + $0x49] sm:$0xff] %v674_v31  ;;  %v678_v60 = vmax.f32 %v3659_v50, 0.0  ;;  %v680_v5 = vmax.f32 %v3667_v54, 0.0  ;;  %v613_v7 = vmul.f32 %v3541_v45, %v573_v51  ;;  %v576_v8 = vld [vmem:[%s3518_s29 + $0x80] sm:$0xff]  ;;  %v1138_v10 = vld [vmem:[%s5090_s3 + $0x1a8] sm:$0xff] }
  0x2e   : > { %2942 = vmatpush1.bf16.msra.mxu0 %v2941_v9  ;;  %2895 = vmatprep.subr.bf16.mxu1 %v5112_v3  ;;  %708 = vst [vmem:[#allocation2 + $0x51] sm:$0xff] %v675_v48  ;;  %710 = vst [vmem:[#allocation2 + $0x69] sm:$0xff] %v677_v52  ;;  %v1137_v9 = vld [vmem:[%s5090_s3 + $0x1a0] sm:$0xff]  ;;  %v3707_v11 = vadd.f32 %v3546_v46, %v612_v62  ;;  %v614_v13 = vmul.f32 %v3541_v45, %v574_v56  ;;  %v577_v15 = vld [vmem:[%s3518_s29 + $0x88] sm:$0xff]  ;;  %v681_v16 = vmax.f32 %v3692_v6, 0.0 }
  0x2f   : > { %2943 = vmatprep.subr.bf16.mxu0 %v5112_v3  ;;  %v676_v49 = vmax.f32 %v3634_v37, 0.0  ;;  %711 = vst [vmem:[#allocation2 + $0x79] sm:$0xff] %v678_v60  ;;  %712 = vst [vmem:[#allocation2 + $0x81] sm:$0xff] %v679_v2  ;;  %v3717_v17 = vadd.f32 %v3546_v46, %v613_v7  ;;  %v615_v18 = vmul.f32 %v3541_v45, %v575_v63  ;;  %v1108_v32 = vld [vmem:[%s5090_s3 + $0xb8] sm:$0xff]  ;;  %v1139_v38 = vld [vmem:[%s5090_s3 + $0x1b0] sm:$0xff] }
  0x30   : > { %713 = vst [vmem:[#allocation2 + $0x91] sm:$0xff] %v680_v5  ;;  %v2902_v22 = vpack.c.bf16 %v1106_v0, %v1105_v59  ;;  %v5109_v25 = vmax.f32 %v3707_v11, 0.0  ;;  %v3722_v26 = vadd.f32 %v3546_v46, %v614_v13  ;;  %v616_v27 = vmul.f32 %v3541_v45, %v576_v8  ;;  %714 = vst [vmem:[#allocation2 + $0x99] sm:$0xff] %v681_v16  ;;  %v1140_v39 = vld [vmem:[%s5090_s3 + $0x1b8] sm:$0xff]  ;;  %v578_v43 = vld [vmem:[%s3518_s29 + $0x90] sm:$0xff] }
  0x31   : > { %2897 = vmatpush1.bf16.msra.mxu1 %v2896_v29  ;;  %709 = vst [vmem:[#allocation2 + $0x61] sm:$0xff] %v676_v49  ;;  %v3685_v1 = vld [vmem:[#allocation2 + $0x18] sm:$0xff]  ;;  %v2950_v28 = vpack.c.bf16 %v1138_v10, %v1137_v9  ;;  %v1107_v29 = vld [vmem:[%s5090_s3 + $0xb0] sm:$0xff]  ;;  %v3736_v34 = vadd.f32 %v3546_v46, %v615_v18  ;;  %v617_v35 = vmul.f32 %v3541_v45, %v577_v15  ;;  %v1110_v59 = vld [vmem:[%s5090_s3 + $0xc8] sm:$0xff] }
  0x32   : > { %2945 = vmatpush1.bf16.msra.mxu0 %v2944_v33  ;;  %2898 = vmatprep.subr.bf16.mxu1 %v5112_v3  ;;  %v5107_v33 = vmax.f32 %v3717_v17, 0.0  ;;  %715 = vst [vmem:[#allocation2 + $0xa9] sm:$0xff] %v5109_v25  ;;  %v5105_v40 = vmax.f32 %v3722_v26, 0.0  ;;  %v3750_v41 = vadd.f32 %v3546_v46, %v616_v27  ;;  %v618_v51 = vmul.f32 %v3541_v45, %v578_v43  ;;  %v1141_v0 = vld [vmem:[%s5090_s3 + $0x1c0] sm:$0xff]  ;;  %v1142_v7 = vld [vmem:[%s5090_s3 + $0x1c8] sm:$0xff]  ;;  %v579_v9 = vld [vmem:[%s3518_s29 + $0x98] sm:$0xff] }
  0x33   : > { %2946 = vmatprep.subr.bf16.mxu0 %v5112_v3  ;;  %1518 = vmatprep.mubr.f32.mxu0 %v3685_v1  ;;  %v5104_v44 = vmax.f32 %v3736_v34, 0.0  ;;  %v3757_v47 = vadd.f32 %v3546_v46, %v617_v35  ;;  %v2905_v55 = vpack.c.bf16 %v1108_v32, %v1107_v29  ;;  %v619_v13 = vmul.f32 %v3541_v45, %v579_v9  ;;  %v1111_v18 = vld [vmem:[%s5090_s3 + $0xd0] sm:$0xff]  ;;  %v580_v27 = vld [vmem:[%s3518_s29 + $0xa0] sm:$0xff]  ;;  %v1144_v29 = vld [vmem:[%s5090_s3 + $0x1d8] sm:$0xff] }
  0x34   : > { %716 = vst [vmem:[#allocation2 + $0xb1] sm:$0xff] %v5107_v33  ;;  %717 = vst [vmem:[#allocation2 + $0xc1] sm:$0xff] %v5105_v40  ;;  %v5103_v56 = vmax.f32 %v3750_v41, 0.0  ;;  %v3774_v63 = vadd.f32 %v3546_v46, %v618_v51  ;;  %v2956_v15 = vpack.c.bf16 %v1142_v7, %v1141_v0  ;;  %v620_v35 = vmul.f32 %v3541_v45, %v580_v27  ;;  %v1146_v0 = vld [vmem:[%s5090_s3 + $0x1e8] sm:$0xff]  ;;  %v1115_v27 = vld [vmem:[%s5090_s3 + $0xf0] sm:$0xff] }
  0x35   : > { %2900 = vmatpush1.bf16.msra.mxu1 %v2899_v57  ;;  %v2953_v57 = vpack.c.bf16 %v1140_v39, %v1139_v38  ;;  %718 = vst [vmem:[#allocation2 + $0xc9] sm:$0xff] %v5104_v44  ;;  %v5100_v62 = vmax.f32 %v3757_v47, 0.0  ;;  %v3808_v32 = vadd.f32 %v3546_v46, %v619_v13  ;;  %v861_v44 = vld [vmem:[#allocation2 + $0xa] sm:$0xff]  ;;  %v1193_v20 = vld [vmem:[%s5090_s3 + $0x360] sm:$0xff] }
  0x36   : > { %2948 = vmatpush1.bf16.msra.mxu0 %v2947_v58  ;;  %2901 = vmatprep.subr.bf16.mxu1 %v5112_v3  ;;  %v1109_v58 = vld [vmem:[%s5090_s3 + $0xc0] sm:$0xff]  ;;  %719 = vst [vmem:[#allocation2 + $0xd9] sm:$0xff] %v5103_v56  ;;  %v5099_v8 = vmax.f32 %v3774_v63, 0.0  ;;  %v3813_v43 = vadd.f32 %v3546_v46, %v620_v35  ;;  %v1147_v35 = vld [vmem:[%s5090_s3 + $0x1f0] sm:$0xff]  ;;  %v1158_v4 = vld [vmem:[%s5090_s3 + $0x248] sm:$0xff] }
  0x37   : > { %2949 = vmatprep.subr.bf16.mxu0 %v5112_v3  ;;  %720 = vst [vmem:[#allocation2 + $0xe1] sm:$0xff] %v5100_v62  ;;  %v2908_v10 = vpack.c.bf16 %v1110_v59, %v1109_v58  ;;  %v5098_v39 = vmax.f32 %v3808_v32, 0.0  ;;  %v581_v58 = vld [vmem:[%s3518_s29 + $0xa8] sm:$0xff]  ;;  %v1145_v59 = vld [vmem:[%s5090_s3 + $0x1e0] sm:$0xff]  ;;  %v1155_v61 = vld [vmem:[%s5090_s3 + $0x230] sm:$0xff] }
  0x38   : > { %721 = vst [vmem:[#allocation2 + $0xf1] sm:$0xff] %v5099_v8  ;;  %v5095_v7 = vmax.f32 %v3813_v43, 0.0  ;;  %v621_v9 = vmul.f32 %v3541_v45, %v581_v58  ;;  %v584_v58 = vld [vmem:[%s3518_s29 + $0xc0] sm:$0xff]  ;;  %v1191_v14 = vld [vmem:[%s5090_s3 + $0x350] sm:$0xff] }
  0x39   : > { %2903 = vmatpush1.bf16.msra.mxu1 %v2902_v22  ;;  %v1112_v22 = vld [vmem:[%s5090_s3 + $0xd8] sm:$0xff]  ;;  %722 = vst [vmem:[#allocation2 + $0xf9] sm:$0xff] %v5098_v39  ;;  %v860_v39 = vld [vmem:[#allocation2 + $0x2] sm:$0xff] }
  0x3a   : > { %2951 = vmatpush1.bf16.msra.mxu0 %v2950_v28  ;;  %2904 = vmatprep.subr.bf16.mxu1 %v5112_v3  ;;  %v1143_v28 = vld [vmem:[%s5090_s3 + $0x1d0] sm:$0xff]  ;;  %v2911_v38 = vpack.c.bf16 %v1112_v22, %v1111_v18  ;;  %723 = vst [vmem:[#allocation2 + $0x109] sm:$0xff] %v5095_v7  ;;  %v2962_v22 = vpack.c.bf16 %v1146_v0, %v1145_v59  ;;  %v585_v7 = vld [vmem:[%s3518_s29 + $0xc8] sm:$0xff] }
  0x3b   : > { %2952 = vmatprep.subr.bf16.mxu0 %v5112_v3  ;;  %v2959_v51 = vpack.c.bf16 %v1144_v29, %v1143_v28  ;;  %v1116_v28 = vld [vmem:[%s5090_s3 + $0xf8] sm:$0xff]  ;;  %v624_v59 = vmul.f32 %v3541_v45, %v584_v58 }
  0x3c   : > { %v583_v29 = vld [vmem:[%s3518_s29 + $0xb8] sm:$0xff]  ;;  %v2917_v0 = vpack.c.bf16 %v1116_v28, %v1115_v27  ;;  %v1149_v27 = vld [vmem:[%s5090_s3 + $0x200] sm:$0xff]  ;;  %v1150_v28 = vld [vmem:[%s5090_s3 + $0x208] sm:$0xff] }
  0x3d   : > { %2906 = vmatpush1.bf16.msra.mxu1 %v2905_v55  ;;  %v1113_v55 = vld [vmem:[%s5090_s3 + $0xe0] sm:$0xff]  ;;  %v2968_v8 = vpack.c.bf16 %v1150_v28, %v1149_v27  ;;  %v1152_v27 = vld [vmem:[%s5090_s3 + $0x218] sm:$0xff] }
  0x3e   : > { %2954 = vmatpush1.bf16.msra.mxu0 %v2953_v57  ;;  %2907 = vmatprep.subr.bf16.mxu1 %v5112_v3  ;;  %v1114_v57 = vld [vmem:[%s5090_s3 + $0xe8] sm:$0xff] }
  0x3f   : > { %2955 = vmatprep.subr.bf16.mxu0 %v5112_v3  ;;  %v2914_v13 = vpack.c.bf16 %v1114_v57, %v1113_v55  ;;  %v623_v57 = vmul.f32 %v3541_v45, %v583_v29  ;;  %v3872_v29 = vadd.f32 %v3546_v46, %v624_v59 }
  0x41   : > { %2909 = vmatpush1.bf16.msra.mxu1 %v2908_v10  ;;  %v582_v10 = vld [vmem:[%s3518_s29 + $0xb0] sm:$0xff] }
  0x42   : > { %2957 = vmatpush1.bf16.msra.mxu0 %v2956_v15  ;;  %2910 = vmatprep.subr.bf16.mxu1 %v5112_v3  ;;  %v3838_v15 = vadd.f32 %v3546_v46, %v621_v9  ;;  %v622_v18 = vmul.f32 %v3541_v45, %v582_v10  ;;  %v3867_v10 = vadd.f32 %v3546_v46, %v623_v57  ;;  %v5102_v57 = vmax.f32 %v3872_v29, 0.0 }
  0x43   : > { %2958 = vmatprep.subr.bf16.mxu0 %v5112_v3 }
  0x44   : > { %v3858_v55 = vadd.f32 %v3546_v46, %v622_v18  ;;  %727 = vst [vmem:[#allocation2 + $0x139] sm:$0xff] %v5102_v57  ;;  %v1184_v57 = vld [vmem:[%s5090_s3 + $0x318] sm:$0xff] }
  0x45   : > { %2912 = vmatpush1.bf16.msra.mxu1 %v2911_v38  ;;  %v1148_v38 = vld [vmem:[%s5090_s3 + $0x1f8] sm:$0xff] }
  0x46   : > { %2960 = vmatpush1.bf16.msra.mxu0 %v2959_v51  ;;  %2913 = vmatprep.subr.bf16.mxu1 %v5112_v3  ;;  %v5097_v51 = vmax.f32 %v3838_v15, 0.0  ;;  %v5096_v9 = vmax.f32 %v3858_v55, 0.0  ;;  %v2965_v18 = vpack.c.bf16 %v1148_v38, %v1147_v35  ;;  %v586_v35 = vld [vmem:[%s3518_s29 + $0xd0] sm:$0xff]  ;;  %v1182_v38 = vld [vmem:[%s5090_s3 + $0x308] sm:$0xff] }
  0x47   : > { %2961 = vmatprep.subr.bf16.mxu0 %v5112_v3  ;;  %v626_v59 = vmul.f32 %v3541_v45, %v586_v35  ;;  %v588_v35 = vld [vmem:[%s3518_s29 + $0xe0] sm:$0xff] }
  0x48   : > { %724 = vst [vmem:[#allocation2 + $0x111] sm:$0xff] %v5097_v51  ;;  %725 = vst [vmem:[#allocation2 + $0x121] sm:$0xff] %v5096_v9  ;;  %v796_v9 = vld [vmem:[#allocation2] sm:$0xff]  ;;  %v587_v51 = vld [vmem:[%s3518_s29 + $0xd8] sm:$0xff] }
  0x49   : > { %2915 = vmatpush1.bf16.msra.mxu1 %v2914_v13  ;;  %v625_v13 = vmul.f32 %v3541_v45, %v585_v7  ;;  %v1181_v7 = vld [vmem:[%s5090_s3 + $0x300] sm:$0xff] }
  0x4a   : > { %2963 = vmatpush1.bf16.msra.mxu0 %v2962_v22  ;;  %2916 = vmatprep.subr.bf16.mxu1 %v5112_v3  ;;  %v5101_v22 = vmax.f32 %v3867_v10, 0.0  ;;  %v3918_v28 = vpack.c.bf16 %v1182_v38, %v1181_v7 }
  0x4b   : > { %2964 = vmatprep.subr.bf16.mxu0 %v5112_v3  ;;  %v3894_v58 = vadd.f32 %v3546_v46, %v625_v13  ;;  %v3905_v13 = vadd.f32 %v3546_v46, %v626_v59  ;;  %v628_v59 = vmul.f32 %v3541_v45, %v588_v35  ;;  %v589_v35 = vld [vmem:[%s3518_s29 + $0xe8] sm:$0xff] }
  0x4c   : > { %726 = vst [vmem:[#allocation2 + $0x129] sm:$0xff] %v5101_v22  ;;  %v3910_v22 = vld [vmem:[#allocation2 + $0x20] sm:$0xff]  ;;  %v629_v33 = vmul.f32 %v3541_v45, %v589_v35  ;;  %v1186_v35 = vld [vmem:[%s5090_s3 + $0x328] sm:$0xff] }
  0x4d   : > { %2918 = vmatpush1.bf16.msra.mxu1 %v2917_v0  ;;  %v5106_v62 = vmax.f32 %v3894_v58, 0.0  ;;  %v627_v0 = vmul.f32 %v3541_v45, %v587_v51  ;;  %v1183_v51 = vld [vmem:[%s5090_s3 + $0x310] sm:$0xff]  ;;  %v5108_v56 = vmax.f32 %v3905_v13, 0.0  ;;  %v666_v38 = vadd.f32 %v3546_v46, %v628_v59 }
  0x4e   : > { %2966 = vmatpush1.bf16.msra.mxu0 %v2965_v18  ;;  %3095 = vmatprep.subr.bf16.mxu1 %v5112_v3  ;;  %v1151_v18 = vld [vmem:[%s5090_s3 + $0x210] sm:$0xff] }
  0x4f   : > { %2967 = vmatprep.subr.bf16.mxu0 %v5112_v3  ;;  %728 = vst [vmem:[#allocation2 + $0x141] sm:$0xff] %v5106_v62  ;;  %v665_v7 = vadd.f32 %v3546_v46, %v627_v0  ;;  %v2971_v40 = vpack.c.bf16 %v1152_v27, %v1151_v18  ;;  %729 = vst [vmem:[#allocation2 + $0x151] sm:$0xff] %v5108_v56  ;;  %v590_v0 = vld [vmem:[%s3518_s29 + $0xf0] sm:$0xff]  ;;  %v3951_v18 = vpack.c.bf16 %v1184_v57, %v1183_v51 }
  0x50   : > { %1294 = vmatmul.mubr.f32.vlgmr.msra.gmra.mrb[0].mxu1 %v796_v9  ;;  %v797_v9 = vld [vmem:[#allocation2 + $0x8] sm:$0xff]  ;;  %v3953_v27 = vmax.f32 %v666_v38, 0.0  ;;  %v630_v59 = vmul.f32 %v3541_v45, %v590_v0  ;;  %v667_v57 = vadd.f32 %v3546_v46, %v629_v33  ;;  %v862_v38 = vld [vmem:[#allocation2 + $0x1a] sm:$0xff] }
  0x51   : > { %1519 = vmatmul.mubr.f32.vlgmr.msra.gmra.mrb[0].mxu0 %v860_v39  ;;  %1298 = vmatprep.mubr.f32.mxu1 %v3609_v23  ;;  %v3937_v62 = vmax.f32 %v665_v7, 0.0  ;;  %v3941_v39 = vld [vmem:[#allocation2 + $0x30] sm:$0xff]  ;;  %v1153_v23 = vld [vmem:[%s5090_s3 + $0x220] sm:$0xff]  ;;  %v895_v33 = vld [vmem:[#allocation2 + $0x38] sm:$0xff] }
  0x52   : > { %2969 = vmatpush1.bf16.msra.mxu0 %v2968_v8  ;;  %1523 = vmatprep.mubr.f32.mxu0 %v3910_v22  ;;  %v1154_v8 = vld [vmem:[%s5090_s3 + $0x228] sm:$0xff]  ;;  %v1185_v7 = vld [vmem:[%s5090_s3 + $0x320] sm:$0xff]  ;;  %731 = vst [vmem:[#allocation2 + $0x169] sm:$0xff] %v3953_v27  ;;  %v3969_v51 = vadd.f32 %v3546_v46, %v630_v59  ;;  %v3973_v56 = vmax.f32 %v667_v57, 0.0 }
  0x53   : > { %2970 = vmatprep.subr.bf16.mxu0 %v5112_v3  ;;  %3111 = vmatpush1.bf16.msra.mxu1 %v3918_v28  ;;  %730 = vst [vmem:[#allocation2 + $0x159] sm:$0xff] %v3937_v62  ;;  %v2974_v0 = vpack.c.bf16 %v1154_v8, %v1153_v23  ;;  %v1188_v23 = vld [vmem:[%s5090_s3 + $0x338] sm:$0xff]  ;;  %v1190_v57 = vld [vmem:[%s5090_s3 + $0x348] sm:$0xff] }
  0x54   : > { %1299 = vmatmul.mubr.f32.gmra.mrb[2].mxu1 %v797_v9  ;;  %3096 = vmatprep.subr.bf16.mxu1 %v5112_v3  ;;  %5140 = vst [vmem:[#allocation3_spill] sm:$0xff] %v3969_v51  ;;  %v591_v9 = vld [vmem:[%s3518_s29 + $0xf8] sm:$0xff]  ;;  %732 = vst [vmem:[#allocation2 + $0x171] sm:$0xff] %v3973_v56 }
  0x55   : > { %1524 = vmatmul.mubr.f32.gmra.mrb[2].mxu0 %v861_v44  ;;  %1303 = vmatprep.mubr.f32.mxu1 %v670_v12  ;;  %v631_v25 = vmul.f32 %v3541_v45, %v591_v9  ;;  %v1156_v12 = vld [vmem:[%s5090_s3 + $0x238] sm:$0xff]  ;;  %v3984_v44 = vpack.c.bf16 %v1186_v35, %v1185_v7  ;;  %v1187_v45 = vld [vmem:[%s5090_s3 + $0x330] sm:$0xff]  ;;  %v896_v35 = vld [vmem:[#allocation2 + $0x48] sm:$0xff] }
  0x56   : > { %1528 = vmatprep.mubr.f32.mxu0 %v3941_v39  ;;  %2972 = vmatpush1.bf16.msra.mxu0 %v2971_v40  ;;  %v5111_v40 = vmax.f32 %v3969_v51, 0.0  ;;  %v2977_v59 = vpack.c.bf16 %v1156_v12, %v1155_v61  ;;  %v864_v9 = vld [vmem:[#allocation2 + $0x32] sm:$0xff] }
  0x57   : > { %2973 = vmatprep.subr.bf16.mxu0 %v5112_v3  ;;  %3112 = vmatpush1.bf16.msra.mxu1 %v3951_v18  ;;  %v3997_v8 = vadd.f32 %v3546_v46, %v631_v25  ;;  %v1157_v46 = vld [vmem:[%s5090_s3 + $0x240] sm:$0xff]  ;;  %v1160_v61 = vld [vmem:[%s5090_s3 + $0x258] sm:$0xff]  ;;  %v4357_v51 = vld [vmem:[#allocation2 + $0x110] sm:$0xff] }
  0x58   : > { %1304 = vmatmul.mubr.f32.gmra.mrb[4].mxu1 %v3685_v1  ;;  %3097 = vmatprep.subr.bf16.mxu1 %v5112_v3  ;;  %733 = vst [vmem:[#allocation2 + $0x181] sm:$0xff] %v5111_v40  ;;  %v863_v1 = vld [vmem:[#allocation2 + $0x22] sm:$0xff] }
  0x59   : > { %5141 = vst [vmem:[#allocation4_spill] sm:$0xff] %v3997_v8  ;;  %1529 = vmatmul.mubr.f32.gmra.mrb[4].mxu0 %v862_v38  ;;  %1308 = vmatprep.mubr.f32.mxu1 %v671_v19  ;;  %v5110_v7 = vmax.f32 %v3997_v8, 0.0  ;;  %v4012_v19 = vpack.c.bf16 %v1188_v23, %v1187_v45  ;;  %v1189_v25 = vld [vmem:[%s5090_s3 + $0x340] sm:$0xff]  ;;  %v897_v38 = vld [vmem:[#allocation2 + $0x50] sm:$0xff] }
  0x5a   : > { %1533 = vmatprep.mubr.f32.mxu0 %v895_v33  ;;  %2975 = vmatpush1.bf16.msra.mxu0 %v2974_v0  ;;  %v1159_v0 = vld [vmem:[%s5090_s3 + $0x250] sm:$0xff]  ;;  %v4034_v12 = vpack.c.bf16 %v1190_v57, %v1189_v25  ;;  %v865_v45 = vld [vmem:[#allocation2 + $0x3a] sm:$0xff] }
  0x5b   : > { %2976 = vmatprep.subr.bf16.mxu0 %v5112_v3  ;;  %3113 = vmatpush1.bf16.msra.mxu1 %v3984_v44  ;;  %734 = vst [vmem:[#allocation2 + $0x189] sm:$0xff] %v5110_v7  ;;  %v2983_v23 = vpack.c.bf16 %v1160_v61, %v1159_v0  ;;  %v1163_v57 = vld [vmem:[%s5090_s3 + $0x270] sm:$0xff]  ;;  %v900_v61 = vld [vmem:[#allocation2 + $0x78] sm:$0xff]  ;;  %v4348_v7 = vld [vmem:[#allocation2 + $0x108] sm:$0xff] }
  0x5c   : > { %1309 = vmatmul.mubr.f32.gmra.mrb[6].mxu1 %v3910_v22  ;;  %3098 = vmatprep.subr.bf16.mxu1 %v5112_v3  ;;  %v2980_v22 = vpack.c.bf16 %v1158_v4, %v1157_v46  ;;  %v4065_v4 = vld [vmem:[#allocation2 + $0x4a] sm:$0xff]  ;;  %v4087_v0 = vld [vmem:[#allocation2 + $0x52] sm:$0xff] }
  0x5d   : > { %1534 = vmatmul.mubr.f32.gmra.mrb[6].mxu0 %v863_v1  ;;  %1313 = vmatprep.mubr.f32.mxu1 %v672_v24  ;;  %v1192_v24 = vld [vmem:[%s5090_s3 + $0x358] sm:$0xff]  ;;  %v898_v1 = vld [vmem:[#allocation2 + $0x60] sm:$0xff] }
  0x5e   : > { %1538 = vmatprep.mubr.f32.mxu0 %v896_v35  ;;  %2978 = vmatpush1.bf16.msra.mxu0 %v2977_v59  ;;  %v1162_v59 = vld [vmem:[%s5090_s3 + $0x268] sm:$0xff]  ;;  %v4054_v46 = vpack.c.bf16 %v1192_v24, %v1191_v14  ;;  %v1165_v14 = vld [vmem:[%s5090_s3 + $0x280] sm:$0xff]  ;;  %v4355_v8 = vld [vmem:[#allocation2 + $0xf2] sm:$0xff] }
  0x5f   : > { %2979 = vmatprep.subr.bf16.mxu0 %v5112_v3  ;;  %3114 = vmatpush1.bf16.msra.mxu1 %v4012_v19  ;;  %v1166_v24 = vld [vmem:[%s5090_s3 + $0x288] sm:$0xff] }
  0x60   : > { %1314 = vmatmul.mubr.f32.gmra.mrb[8].mxu1 %v3941_v39  ;;  %3099 = vmatprep.subr.bf16.mxu1 %v5112_v3  ;;  %v1161_v39 = vld [vmem:[%s5090_s3 + $0x260] sm:$0xff] }
  0x61   : > { %1539 = vmatmul.mubr.f32.gmra.mrb[8].mxu0 %v864_v9  ;;  %1318 = vmatprep.mubr.f32.mxu1 %v673_v30  ;;  %v1194_v30 = vld [vmem:[%s5090_s3 + $0x368] sm:$0xff]  ;;  %v2986_v25 = vpack.c.bf16 %v1162_v59, %v1161_v39  ;;  %v1164_v9 = vld [vmem:[%s5090_s3 + $0x278] sm:$0xff]  ;;  %v901_v39 = vld [vmem:[#allocation2 + $0x80] sm:$0xff] }
  0x62   : > { %1543 = vmatprep.mubr.f32.mxu0 %v897_v38  ;;  %2981 = vmatpush1.bf16.msra.mxu0 %v2980_v22  ;;  %v4075_v21 = vpack.c.bf16 %v1194_v30, %v1193_v20  ;;  %v1196_v22 = vld [vmem:[%s5090_s3 + $0x378] sm:$0xff]  ;;  %v1167_v59 = vld [vmem:[%s5090_s3 + $0x290] sm:$0xff] }
  0x63   : > { %2982 = vmatprep.subr.bf16.mxu0 %v5112_v3  ;;  %3115 = vmatpush1.bf16.msra.mxu1 %v4034_v12  ;;  %v1168_v20 = vld [vmem:[%s5090_s3 + $0x298] sm:$0xff] }
  0x64   : > { %1319 = vmatmul.mubr.f32.gmra.mrb[10].mxu1 %v895_v33  ;;  %3100 = vmatprep.subr.bf16.mxu1 %v5112_v3  ;;  %v899_v33 = vld [vmem:[#allocation2 + $0x68] sm:$0xff]  ;;  %v1200_v30 = vld [vmem:[%s5090_s3 + $0x398] sm:$0xff] }
  0x65   : > { %1544 = vmatmul.mubr.f32.gmra.mrb[10].mxu0 %v865_v45  ;;  %1323 = vmatprep.mubr.f32.mxu1 %v674_v31  ;;  %v1195_v31 = vld [vmem:[%s5090_s3 + $0x370] sm:$0xff]  ;;  %v1198_v45 = vld [vmem:[%s5090_s3 + $0x388] sm:$0xff] }
  0x66   : > { %1548 = vmatprep.mubr.f32.mxu0 %v898_v1  ;;  %2984 = vmatpush1.bf16.msra.mxu0 %v2983_v23  ;;  %v4097_v36 = vpack.c.bf16 %v1196_v22, %v1195_v31  ;;  %v4109_v23 = vld [vmem:[#allocation2 + $0x62] sm:$0xff] }
  0x67   : > { %2985 = vmatprep.subr.bf16.mxu0 %v5112_v3  ;;  %3116 = vmatpush1.bf16.msra.mxu1 %v4054_v46  ;;  %v1170_v31 = vld [vmem:[%s5090_s3 + $0x2a8] sm:$0xff] }
  0x68   : > { %1324 = vmatmul.mubr.f32.gmra.mrb[12].mxu1 %v896_v35  ;;  %3101 = vmatprep.subr.bf16.mxu1 %v5112_v3  ;;  %v2989_v35 = vpack.c.bf16 %v1164_v9, %v1163_v57  ;;  %v4133_v57 = vld [vmem:[#allocation2 + $0x90] sm:$0xff]  ;;  %v1169_v9 = vld [vmem:[%s5090_s3 + $0x2a0] sm:$0xff]  ;;  %v1202_v22 = vld [vmem:[%s5090_s3 + $0x3a8] sm:$0xff] }
  0x69   : > { %1549 = vmatmul.mubr.f32.gmra.mrb[12].mxu0 %v4065_v4  ;;  %1328 = vmatprep.mubr.f32.mxu1 %v675_v48  ;;  %v1197_v48 = vld [vmem:[%s5090_s3 + $0x380] sm:$0xff] }
  0x6a   : > { %1553 = vmatprep.mubr.f32.mxu0 %v899_v33  ;;  %2987 = vmatpush1.bf16.msra.mxu0 %v2986_v25  ;;  %v4119_v37 = vpack.c.bf16 %v1198_v45, %v1197_v48  ;;  %v4131_v25 = vld [vmem:[#allocation2 + $0x6a] sm:$0xff]  ;;  %v1172_v48 = vld [vmem:[%s5090_s3 + $0x2b8] sm:$0xff] }
  0x6b   : > { %2988 = vmatprep.subr.bf16.mxu0 %v5112_v3  ;;  %3117 = vmatpush1.bf16.msra.mxu1 %v4075_v21  ;;  %v1204_v45 = vld [vmem:[%s5090_s3 + $0x3b8] sm:$0xff] }
  0x6c   : > { %1329 = vmatmul.mubr.f32.gmra.mrb[14].mxu1 %v897_v38  ;;  %3102 = vmatprep.subr.bf16.mxu1 %v5112_v3  ;;  %v2992_v38 = vpack.c.bf16 %v1166_v24, %v1165_v14  ;;  %v4158_v14 = vld [vmem:[#allocation2 + $0x98] sm:$0xff]  ;;  %v1171_v24 = vld [vmem:[%s5090_s3 + $0x2b0] sm:$0xff] }
  0x6d   : > { %1554 = vmatmul.mubr.f32.gmra.mrb[14].mxu0 %v4087_v0  ;;  %1333 = vmatprep.mubr.f32.mxu1 %v676_v49  ;;  %v1199_v49 = vld [vmem:[%s5090_s3 + $0x390] sm:$0xff] }
  0x6e   : > { %1558 = vmatprep.mubr.f32.mxu0 %v900_v61  ;;  %2990 = vmatpush1.bf16.msra.mxu0 %v2989_v35  ;;  %v4143_v42 = vpack.c.bf16 %v1200_v30, %v1199_v49  ;;  %v4156_v35 = vld [vmem:[#allocation2 + $0x7a] sm:$0xff]  ;;  %v1174_v49 = vld [vmem:[%s5090_s3 + $0x2c8] sm:$0xff] }
  0x6f   : > { %2991 = vmatprep.subr.bf16.mxu0 %v5112_v3  ;;  %3118 = vmatpush1.bf16.msra.mxu1 %v4097_v36  ;;  %v1206_v30 = vld [vmem:[%s5090_s3 + $0x3c8] sm:$0xff] }
  0x70   : > { %1334 = vmatmul.mubr.f32.gmra.mrb[16].mxu1 %v898_v1  ;;  %3103 = vmatprep.subr.bf16.mxu1 %v5112_v3  ;;  %v2995_v1 = vpack.c.bf16 %v1168_v20, %v1167_v59  ;;  %v4183_v59 = vld [vmem:[#allocation2 + $0xa8] sm:$0xff]  ;;  %v1173_v20 = vld [vmem:[%s5090_s3 + $0x2c0] sm:$0xff] }
  0x71   : > { %1559 = vmatmul.mubr.f32.gmra.mrb[16].mxu0 %v4109_v23  ;;  %1338 = vmatprep.mubr.f32.mxu1 %v677_v52  ;;  %v1201_v52 = vld [vmem:[%s5090_s3 + $0x3a0] sm:$0xff] }
  0x72   : > { %1563 = vmatprep.mubr.f32.mxu0 %v901_v39  ;;  %2993 = vmatpush1.bf16.msra.mxu0 %v2992_v38  ;;  %v4168_v50 = vpack.c.bf16 %v1202_v22, %v1201_v52  ;;  %v4181_v38 = vld [vmem:[#allocation2 + $0x82] sm:$0xff]  ;;  %v1176_v52 = vld [vmem:[%s5090_s3 + $0x2d8] sm:$0xff] }
  0x73   : > { %2994 = vmatprep.subr.bf16.mxu0 %v5112_v3  ;;  %3119 = vmatpush1.bf16.msra.mxu1 %v4119_v37  ;;  %v1208_v22 = vld [vmem:[%s5090_s3 + $0x3d8] sm:$0xff] }
  0x74   : > { %1339 = vmatmul.mubr.f32.gmra.mrb[18].mxu1 %v899_v33  ;;  %3104 = vmatprep.subr.bf16.mxu1 %v5112_v3  ;;  %v2998_v33 = vpack.c.bf16 %v1170_v31, %v1169_v9  ;;  %v4208_v9 = vld [vmem:[#allocation2 + $0xb0] sm:$0xff] }
  0x75   : > { %1564 = vmatmul.mubr.f32.gmra.mrb[18].mxu0 %v4131_v25  ;;  %1343 = vmatprep.mubr.f32.mxu1 %v678_v60  ;;  %v1203_v60 = vld [vmem:[%s5090_s3 + $0x3b0] sm:$0xff] }
  0x76   : > { %1568 = vmatprep.mubr.f32.mxu0 %v4133_v57  ;;  %2996 = vmatpush1.bf16.msra.mxu0 %v2995_v1  ;;  %v4193_v53 = vpack.c.bf16 %v1204_v45, %v1203_v60  ;;  %v4206_v1 = vld [vmem:[#allocation2 + $0x92] sm:$0xff]  ;;  %v1177_v60 = vld [vmem:[%s5090_s3 + $0x2e0] sm:$0xff]  ;;  %v1178_v45 = vld [vmem:[%s5090_s3 + $0x2e8] sm:$0xff] }
  0x77   : > { %2997 = vmatprep.subr.bf16.mxu0 %v5112_v3  ;;  %3120 = vmatpush1.bf16.msra.mxu1 %v4143_v42  ;;  %v1175_v31 = vld [vmem:[%s5090_s3 + $0x2d0] sm:$0xff] }
  0x78   : > { %1344 = vmatmul.mubr.f32.gmra.mrb[20].mxu1 %v900_v61  ;;  %3105 = vmatprep.subr.bf16.mxu1 %v5112_v3  ;;  %v3001_v61 = vpack.c.bf16 %v1172_v48, %v1171_v24  ;;  %v3007_v24 = vpack.c.bf16 %v1176_v52, %v1175_v31  ;;  %v4234_v48 = vld [vmem:[#allocation2 + $0xc0] sm:$0xff]  ;;  %v1211_v52 = vld [vmem:[%s5090_s3 + $0x3f0] sm:$0xff] }
  0x79   : > { %1569 = vmatmul.mubr.f32.gmra.mrb[20].mxu0 %v4156_v35  ;;  %1348 = vmatprep.mubr.f32.mxu1 %v679_v2  ;;  %v1205_v2 = vld [vmem:[%s5090_s3 + $0x3c0] sm:$0xff] }
  0x7a   : > { %1573 = vmatprep.mubr.f32.mxu0 %v4158_v14  ;;  %2999 = vmatpush1.bf16.msra.mxu0 %v2998_v33  ;;  %v4218_v54 = vpack.c.bf16 %v1206_v30, %v1205_v2  ;;  %v4232_v33 = vld [vmem:[#allocation2 + $0x9a] sm:$0xff]  ;;  %v3010_v2 = vpack.c.bf16 %v1178_v45, %v1177_v60  ;;  %v4260_v30 = vld [vmem:[#allocation2 + $0xc8] sm:$0xff]  ;;  %v4290_v45 = vld [vmem:[#allocation2 + $0xb2] sm:$0xff] }
  0x7b   : > { %3000 = vmatprep.subr.bf16.mxu0 %v5112_v3  ;;  %3121 = vmatpush1.bf16.msra.mxu1 %v4168_v50  ;;  %v1214_v60 = vld [vmem:[%s5090_s3 + $0x408] sm:$0xff] }
  0x7c   : > { %1349 = vmatmul.mubr.f32.gmra.mrb[22].mxu1 %v901_v39  ;;  %3106 = vmatprep.subr.bf16.mxu1 %v5112_v3  ;;  %v3004_v39 = vpack.c.bf16 %v1174_v49, %v1173_v20  ;;  %v5142_v20 = vmax.f32 %v3707_v11, 0.0  ;;  %v4258_v49 = vld [vmem:[#allocation2 + $0xaa] sm:$0xff]  ;;  %v1180_v11 = vld [vmem:[%s5090_s3 + $0x2f8] sm:$0xff] }
  0x7d   : > { %1574 = vmatmul.mubr.f32.gmra.mrb[22].mxu0 %v4181_v38  ;;  %1353 = vmatprep.mubr.f32.mxu1 %v680_v5  ;;  %v1207_v5 = vld [vmem:[%s5090_s3 + $0x3d0] sm:$0xff] }
  0x7e   : > { %1578 = vmatprep.mubr.f32.mxu0 %v4183_v59  ;;  %3002 = vmatpush1.bf16.msra.mxu0 %v3001_v61  ;;  %v4244_v6 = vpack.c.bf16 %v1208_v22, %v1207_v5  ;;  %v1210_v61 = vld [vmem:[%s5090_s3 + $0x3e8] sm:$0xff]  ;;  %v1212_v5 = vld [vmem:[%s5090_s3 + $0x3f8] sm:$0xff]  ;;  %v5143_v22 = vmax.f32 %v3717_v17, 0.0 }
  0x7f   : > { %3003 = vmatprep.subr.bf16.mxu0 %v5112_v3  ;;  %3122 = vmatpush1.bf16.msra.mxu1 %v4193_v53  ;;  %v4296_v17 = vpack.c.bf16 %v1212_v5, %v1211_v52  ;;  %v4320_v52 = vld [vmem:[#allocation2 + $0xf0] sm:$0xff]  ;;  %v5147_v5 = vmax.f32 %v3750_v41, 0.0  ;;  %v5149_v41 = vmax.f32 %v3757_v47, 0.0  ;;  %v5150_v47 = vmax.f32 %v3774_v63, 0.0 }
  0x80   : > { %1354 = vmatmul.mubr.f32.gmra.mrb[24].mxu1 %v4133_v57  ;;  %3107 = vmatprep.subr.bf16.mxu1 %v5112_v3 }
  0x81   : > { %1579 = vmatmul.mubr.f32.gmra.mrb[24].mxu0 %v4206_v1  ;;  %1358 = vmatprep.mubr.f32.mxu1 %v681_v16  ;;  %v1209_v16 = vld [vmem:[%s5090_s3 + $0x3e0] sm:$0xff]  ;;  %5144 = vst [vmem:[#allocation5_spill] sm:$0xff] %v4296_v17 }
  0x82   : > { %1583 = vmatprep.mubr.f32.mxu0 %v4208_v9  ;;  %3005 = vmatpush1.bf16.msra.mxu0 %v3004_v39  ;;  %v1179_v39 = vld [vmem:[%s5090_s3 + $0x2f0] sm:$0xff]  ;;  %v4270_v31 = vpack.c.bf16 %v1210_v61, %v1209_v16  ;;  %v4292_v61 = vld [vmem:[#allocation2 + $0xd8] sm:$0xff] }
  0x83   : > { %3006 = vmatprep.subr.bf16.mxu0 %v5112_v3  ;;  %3123 = vmatpush1.bf16.msra.mxu1 %v4218_v54  ;;  %v3013_v16 = vpack.c.bf16 %v1180_v11, %v1179_v39  ;;  %v4308_v39 = vld [vmem:[#allocation2 + $0xe0] sm:$0xff]  ;;  %v4318_v11 = vld [vmem:[#allocation2 + $0xca] sm:$0xff] }
  0x84   : > { %1359 = vmatmul.mubr.f32.gmra.mrb[26].mxu1 %v4158_v14  ;;  %3108 = vmatprep.subr.bf16.mxu1 %v5112_v3 }
  0x85   : > { %1584 = vmatmul.mubr.f32.gmra.mrb[26].mxu0 %v4232_v33  ;;  %1363 = vmatprep.mubr.f32.mxu1 %v5142_v20 }
  0x86   : > { %1588 = vmatprep.mubr.f32.mxu0 %v4234_v48  ;;  %3008 = vmatpush1.bf16.msra.mxu0 %v3007_v24  ;;  %v1213_v24 = vld [vmem:[%s5090_s3 + $0x400] sm:$0xff] }
  0x87   : > { %3009 = vmatprep.subr.bf16.mxu0 %v5112_v3  ;;  %3124 = vmatpush1.bf16.msra.mxu1 %v4244_v6  ;;  %v4300_v20 = vpack.c.bf16 %v1214_v60, %v1213_v24  ;;  %v4327_v24 = vld [vmem:[#allocation2 + $0xda] sm:$0xff] }
  0x88   : > { %1364 = vmatmul.mubr.f32.gmra.mrb[28].mxu1 %v4183_v59  ;;  %3109 = vmatprep.subr.bf16.mxu1 %v5112_v3  ;;  %5148 = vst [vmem:[#allocation6_spill] sm:$0xff] %v4327_v24  ;;  %v768_v60 = vld [vmem:[%s473_s13] sm:$0xff] }
  0x89   : > { %1589 = vmatmul.mubr.f32.gmra.mrb[28].mxu0 %v4258_v49  ;;  %1368 = vmatprep.mubr.f32.mxu1 %v5143_v22  ;;  %v5145_v22 = vmax.f32 %v3722_v26, 0.0  ;;  %v5146_v26 = vmax.f32 %v3736_v34, 0.0  ;;  %v4330_v34 = vld [vmem:[#allocation2 + $0xf8] sm:$0xff] }
  0x8a   : > { %1593 = vmatprep.mubr.f32.mxu0 %v4260_v30  ;;  %3011 = vmatpush1.bf16.msra.mxu0 %v3010_v2  ;;  %v4306_v2 = vld [vmem:[#allocation2 + $0xc2] sm:$0xff] }
  0x8b   : > { %3012 = vmatprep.subr.bf16.mxu0 %v5112_v3  ;;  %3125 = vmatpush1.bf16.msra.mxu1 %v4270_v31 }
  0x8c   : > { %1369 = vmatmul.mubr.f32.gmra.mrb[30].mxu1 %v4208_v9  ;;  %3110 = vmatprep.subr.bf16.mxu1 %v5112_v3 }
  0x8d   : > { %1594 = vmatmul.mubr.f32.gmra.mrb[30].mxu0 %v4290_v45  ;;  %1373 = vmatprep.mubr.f32.mxu1 %v5145_v22 }
  0x8e   : > { %1598 = vmatprep.mubr.f32.mxu0 %v4292_v61  ;;  %3014 = vmatpush1.bf16.msra.mxu0 %v3013_v16  ;;  %v2733_v16 = vld [vmem:[%s5091_s4] ss:$0 sm:$0xff] }
  0x8f   : > { %3126 = vmatpush1.bf16.msra.mxu1 %v4296_v17  ;;  %3015 = vmatprep.subr.bf16.mxu0 %v5112_v3  ;;  %v778_v22 = vmul.f32 %v2733_v16, %v768_v60  ;;  %v769_v3 = vld [vmem:[%s473_s13 + $0x8] sm:$0xff] }
  0x90   : > { %1374 = vmatmul.mubr.f32.gmra.mrb[32].mxu1 %v4234_v48  ;;  %3064 = vmatprep.subr.bf16.mxu1 %v4300_v20 }
  0x91   : > { %1599 = vmatmul.mubr.f32.gmra.mrb[32].mxu0 %v4306_v2  ;;  %1378 = vmatprep.mubr.f32.mxu1 %v5146_v26  ;;  %v4343_v26 = vld [vmem:[#allocation2 + $0xe2] sm:$0xff] }
  0x92   : > { %1603 = vmatprep.mubr.f32.mxu0 %v4308_v39 }
  0x94   : > { %1379 = vmatmul.mubr.f32.gmra.mrb[34].mxu1 %v4260_v30 }
  0x95   : > { %1604 = vmatmul.mubr.f32.gmra.mrb[34].mxu0 %v4318_v11  ;;  %1383 = vmatprep.mubr.f32.mxu1 %v5147_v5  ;;  %v2734_v5 = vld [vmem:[%s5092_s5] ss:$0 sm:$0xff] }
  0x96   : > { %1608 = vmatprep.mubr.f32.mxu0 %v4320_v52  ;;  %v786_v40 = vadd.f32 %v2734_v5, %v778_v22  ;;  %v5152_v22 = vmax.f32 %v3808_v32, 0.0  ;;  %v4379_v32 = vld [vmem:[#allocation2 + $0x10a] sm:$0xff] }
  0x97   : > { %5155 = vst [vmem:[#allocation9_spill] sm:$0xff] %v4379_v32 }
  0x98   : > { %1384 = vmatmul.mubr.f32.gmra.mrb[36].mxu1 %v4292_v61  ;;  %v788_v60 = vmax.f32 %v786_v40, 0.0  ;;  %v4369_v40 = vld [vmem:[#allocation2 + $0x120] sm:$0xff] }
  0x99   : > { %1609 = vmatmul.mubr.f32.gmra.mrb[36].mxu0 %v4327_v24  ;;  %1388 = vmatprep.mubr.f32.mxu1 %v5149_v41  ;;  %v779_v41 = vmul.f32 %v2733_v16, %v769_v3  ;;  %v4367_v3 = vld [vmem:[#allocation2 + $0xfa] sm:$0xff] }
  0x9a   : > { %1613 = vmatprep.mubr.f32.mxu0 %v4330_v34  ;;  %v4359_v17 = vmul.f32 0.0, %v788_v60  ;;  %v4388_v60 = vld [vmem:[#allocation2 + $0x112] sm:$0xff] }
  0x9b   : > { %v787_v24 = vadd.f32 %v2734_v5, %v779_v41  ;;  %v5154_v5 = vmax.f32 %v3813_v43, 0.0  ;;  %5157 = vst [vmem:[#allocation10_spill] sm:$0xff] %v4388_v60  ;;  %v4390_v43 = vld [vmem:[#allocation2 + $0x138] sm:$0xff]  ;;  %v5158_v41 = vmax.f32 %v3858_v55, 0.0  ;;  %v5162_v55 = vmax.f32 %v3872_v29, 0.0 }
  0x9c   : > { %1389 = vmatmul.mubr.f32.gmra.mrb[38].mxu1 %v4308_v39  ;;  %5151 = vst [vmem:[#allocation7_spill] sm:$0xff] %v4359_v17  ;;  %794 = vst [vmem:[#allocation2 + $0x199] sm:$0xff] %v4359_v17  ;;  %v5166_v29 = vmax.f32 %v3905_v13, 0.0  ;;  %v4449_v13 = vld [vmem:[#allocation2 + $0x16a] sm:$0xff]  ;;  %v924_v17 = vld [vmem:[#allocation2 + $0x19] sm:$0xff] }
  0x9d   : > { %1614 = vmatmul.mubr.f32.gmra.mrb[38].mxu0 %v4343_v26  ;;  %1393 = vmatprep.mubr.f32.mxu1 %v5150_v47  ;;  %v789_v63 = vmax.f32 %v787_v24, 0.0  ;;  %v4381_v24 = vld [vmem:[#allocation2 + $0x128] sm:$0xff]  ;;  %v5156_v47 = vmax.f32 %v3838_v15, 0.0  ;;  %v5160_v15 = vmax.f32 %v3867_v10, 0.0  ;;  %v5164_v10 = vmax.f32 %v3894_v58, 0.0  ;;  %v4441_v58 = vld [vmem:[#allocation2 + $0x15a] sm:$0xff] }
  0x9e   : > { %1618 = vmatprep.mubr.f32.mxu0 %v4348_v7  ;;  %5169 = vst [vmem:[#allocation17_spill] sm:$0xff] %v4441_v58  ;;  %5171 = vst [vmem:[#allocation19_spill] sm:$0xff] %v4449_v13 }
  0x9f   : > { %v4371_v16 = vmul.f32 0.0, %v789_v63  ;;  %v4399_v63 = vld [vmem:[#allocation2 + $0x140] sm:$0xff] }
  0xa0   : > { %1394 = vmatmul.mubr.f32.gmra.mrb[40].mxu1 %v4320_v52 }
  0xa1   : > { %1619 = vmatmul.mubr.f32.gmra.mrb[40].mxu0 %v4355_v8  ;;  %1398 = vmatprep.mubr.f32.mxu1 %v5152_v22  ;;  %5153 = vst [vmem:[#allocation8_spill] sm:$0xff] %v4371_v16  ;;  %795 = vst [vmem:[#allocation2 + $0x1a1] sm:$0xff] %v4371_v16  ;;  %v4397_v22 = vld [vmem:[#allocation2 + $0x122] sm:$0xff]  ;;  %v4417_v16 = vld [vmem:[#allocation2 + $0x158] sm:$0xff] }
  0xa2   : > { %1623 = vmatprep.mubr.f32.mxu0 %v4357_v51  ;;  %5159 = vst [vmem:[#allocation11_spill] sm:$0xff] %v4397_v22 }
  0xa4   : > { %1399 = vmatmul.mubr.f32.gmra.mrb[42].mxu1 %v4330_v34 }
  0xa5   : > { %1624 = vmatmul.mubr.f32.gmra.mrb[42].mxu0 %v4367_v3  ;;  %1403 = vmatprep.mubr.f32.mxu1 %v5154_v5  ;;  %v4406_v5 = vld [vmem:[#allocation2 + $0x12a] sm:$0xff] }
  0xa6   : > { %1628 = vmatprep.mubr.f32.mxu0 %v4369_v40  ;;  %5161 = vst [vmem:[#allocation12_spill] sm:$0xff] %v4406_v5 }
  0xa8   : > { %1404 = vmatmul.mubr.f32.gmra.mrb[44].mxu1 %v4348_v7 }
  0xa9   : > { %1629 = vmatmul.mubr.f32.gmra.mrb[44].mxu0 %v4379_v32  ;;  %1408 = vmatprep.mubr.f32.mxu1 %v5156_v47  ;;  %v4408_v47 = vld [vmem:[#allocation2 + $0x150] sm:$0xff]  ;;  %v1218_v32 = vld [vmem:[%s5090_s3 + $0x428] sm:$0xff] }
  0xaa   : > { %1633 = vmatprep.mubr.f32.mxu0 %v4381_v24 }
  0xac   : > { %1409 = vmatmul.mubr.f32.gmra.mrb[46].mxu1 %v4357_v51 }
  0xad   : > { %1634 = vmatmul.mubr.f32.gmra.mrb[46].mxu0 %v4388_v60  ;;  %1413 = vmatprep.mubr.f32.mxu1 %v5158_v41  ;;  %v4415_v41 = vld [vmem:[#allocation2 + $0x13a] sm:$0xff] }
  0xae   : > { %1638 = vmatprep.mubr.f32.mxu0 %v4390_v43  ;;  %5163 = vst [vmem:[#allocation13_spill] sm:$0xff] %v4415_v41 }
  0xb0   : > { %1414 = vmatmul.mubr.f32.gmra.mrb[48].mxu1 %v4369_v40 }
  0xb1   : > { %1639 = vmatmul.mubr.f32.gmra.mrb[48].mxu0 %v4397_v22  ;;  %1418 = vmatprep.mubr.f32.mxu1 %v5160_v15  ;;  %v4424_v15 = vld [vmem:[#allocation2 + $0x142] sm:$0xff]  ;;  %v1215_v22 = vld [vmem:[%s5090_s3 + $0x410] sm:$0xff] }
  0xb2   : > { %1643 = vmatprep.mubr.f32.mxu0 %v4399_v63  ;;  %5165 = vst [vmem:[#allocation14_spill] sm:$0xff] %v4424_v15 }
  0xb4   : > { %1419 = vmatmul.mubr.f32.gmra.mrb[50].mxu1 %v4381_v24 }
  0xb5   : > { %1644 = vmatmul.mubr.f32.gmra.mrb[50].mxu0 %v4406_v5  ;;  %1423 = vmatprep.mubr.f32.mxu1 %v5162_v55  ;;  %v4426_v5 = vld [vmem:[#allocation2 + $0x168] sm:$0xff]  ;;  %v4433_v55 = vld [vmem:[#allocation2 + $0x152] sm:$0xff] }
  0xb6   : > { %1648 = vmatprep.mubr.f32.mxu0 %v4408_v47  ;;  %5167 = vst [vmem:[#allocation15_spill] sm:$0xff] %v4433_v55 }
  0xb8   : > { %1424 = vmatmul.mubr.f32.gmra.mrb[52].mxu1 %v4390_v43 }
  0xb9   : > { %1649 = vmatmul.mubr.f32.gmra.mrb[52].mxu0 %v4415_v41  ;;  %1428 = vmatprep.mubr.f32.mxu1 %v5164_v10  ;;  %v4435_v41 = vld [vmem:[#allocation2 + $0x170] sm:$0xff]  ;;  %v4443_v10 = vld [vmem:[#allocation2 + $0x180] sm:$0xff] }
  0xba   : > { %1653 = vmatprep.mubr.f32.mxu0 %v4417_v16  ;;  %5168 = vst [vmem:[#allocation16_spill] sm:$0xff] %v4435_v41  ;;  %5170 = vst [vmem:[#allocation18_spill] sm:$0xff] %v4443_v10 }
  0xbc   : > { %1429 = vmatmul.mubr.f32.gmra.mrb[54].mxu1 %v4399_v63 }
  0xbd   : > { %1654 = vmatmul.mubr.f32.gmra.mrb[54].mxu0 %v4424_v15  ;;  %1433 = vmatprep.mubr.f32.mxu1 %v5166_v29  ;;  %v4451_v29 = vld [vmem:[#allocation2 + $0x188] sm:$0xff]  ;;  %v956_v15 = vld [vmem:[#allocation2 + $0x1a] sm:$0xff] }
  0xbe   : > { %1658 = vmatprep.mubr.f32.mxu0 %v4426_v5  ;;  %5172 = vst [vmem:[#allocation20_spill] sm:$0xff] %v4451_v29 }
  0xc0   : > { %1434 = vmatmul.mubr.f32.gmra.mrb[56].mxu1 %v4408_v47 }
  0xc1   : > { %1659 = vmatmul.mubr.f32.gmra.mrb[56].mxu0 %v4433_v55  ;;  %1438 = vmatprep.mubr.f32.mxu1 %v3937_v62  ;;  %v4457_v55 = vld [vmem:[#allocation2 + $0x172] sm:$0xff] }
  0xc2   : > { %1663 = vmatprep.mubr.f32.mxu0 %v4435_v41  ;;  %5173 = vst [vmem:[#allocation21_spill] sm:$0xff] %v4457_v55 }
  0xc4   : > { %1439 = vmatmul.mubr.f32.gmra.mrb[58].mxu1 %v4417_v16 }
  0xc5   : > { %1664 = vmatmul.mubr.f32.gmra.mrb[58].mxu0 %v4441_v58  ;;  %1443 = vmatprep.mubr.f32.mxu1 %v3953_v27  ;;  %v4461_v58 = vld [vmem:[#allocation2 + $0x91] sm:$0xff] }
  0xc6   : > { %1668 = vmatprep.mubr.f32.mxu0 %v4443_v10  ;;  %v1217_v10 = vld [vmem:[%s5090_s3 + $0x420] sm:$0xff] }
  0xc8   : > { %1444 = vmatmul.mubr.f32.gmra.mrb[60].mxu1 %v4426_v5 }
  0xc9   : > { %1669 = vmatmul.mubr.f32.gmra.mrb[60].mxu0 %v4449_v13  ;;  %1448 = vmatprep.mubr.f32.mxu1 %v3973_v56  ;;  %v1216_v13 = vld [vmem:[%s5090_s3 + $0x418] sm:$0xff] }
  0xca   : > { %1673 = vmatprep.mubr.f32.mxu0 %v4451_v29  ;;  %v957_v29 = vld [vmem:[#allocation2 + $0x22] sm:$0xff]  ;;  %v3067_v60 = vpack.c.bf16 %v1216_v13, %v1215_v22  ;;  %v1220_v13 = vld [vmem:[%s5090_s3 + $0x438] sm:$0xff] }
  0xcb   : > { %v4486_v22 = vld [vmem:[#allocation2 + $0xa9] sm:$0xff] }
  0xcc   : > { %1449 = vmatmul.mubr.f32.gmra.mrb[62].mxu1 %v4435_v41  ;;  %v4481_v41 = vld [vmem:[#allocation2 + $0x32] sm:$0xff] }
  0xcd   : > { %1674 = vmatmul.mubr.f32.gmra.mrb[62].mxu0 %v4457_v55  ;;  %2008 = vmatprep.mubr.f32.mxu1 %v4461_v58  ;;  %v4471_v55 = vld [vmem:[#allocation2 + $0x99] sm:$0xff] }
  0xce   : > { %1743 = vmatprep.mubr.f32.mxu0 %v956_v15  ;;  %v925_v15 = vld [vmem:[#allocation2 + $0x21] sm:$0xff] }
  0xd0   : > { %2009 = vmatmul.mubr.f32.vlgmr.msra.gmra.mrb[64].mxu1 %v4133_v57  ;;  %v5174_v57 = vmov 0.0|0.0  }
  0xd1   : > { %1744 = vmatmul.mubr.f32.vlgmr.msra.gmra.mrb[0].mxu0 %v924_v17  ;;  %2013 = vmatprep.mubr.f32.mxu1 %v4471_v55  ;;  %v3071_v17 = vpack.c.bf16 %v1218_v32, %v1217_v10  ;;  %v4504_v10 = vld [vmem:[#allocation2 + $0xb1] sm:$0xff] }
  0xd2   : > { %3017 = vmatpush1.bf16.msra.mxu0 %v3918_v28  ;;  %1748 = vmatprep.mubr.f32.mxu0 %v957_v29  ;;  %v1219_v28 = vld [vmem:[%s5090_s3 + $0x430] sm:$0xff]  ;;  %v1221_v29 = vld [vmem:[%s5090_s3 + $0x440] sm:$0xff] }
  0xd3   : > { %3018 = vmatprep.subr.bf16.mxu0 %v5174_v57  ;;  %3066 = vmatpush3.bf16.msra.mxu1 %v4300_v20  ;;  %v4496_v20 = vld [vmem:[#allocation2 + $0x31] sm:$0xff]  ;;  %v3075_v32 = vpack.c.bf16 %v1220_v13, %v1219_v28  ;;  %v4536_v13 = vld [vmem:[#allocation2 + $0xc9] sm:$0xff] }
  0xd4   : > { %2014 = vmatmul.mubr.f32.gmra.mrb[66].mxu1 %v4158_v14  ;;  %3068 = vmatprep.subr.bf16.mxu1 %v3067_v60  ;;  %v4499_v14 = vld [vmem:[#allocation2 + $0x3a] sm:$0xff]  ;;  %v1223_v28 = vld [vmem:[%s5090_s3 + $0x450] sm:$0xff] }
  0xd5   : > { %1749 = vmatmul.mubr.f32.gmra.mrb[2].mxu0 %v925_v15  ;;  %2018 = vmatprep.mubr.f32.mxu1 %v4486_v22  ;;  %v4520_v15 = vld [vmem:[#allocation2 + $0xc1] sm:$0xff] }
  0xd6   : > { %1753 = vmatprep.mubr.f32.mxu0 %v4481_v41  ;;  %3020 = vmatpush1.bf16.msra.mxu0 %v3951_v18  ;;  %v1222_v18 = vld [vmem:[%s5090_s3 + $0x448] sm:$0xff] }
  0xd7   : > { %3021 = vmatprep.subr.bf16.mxu0 %v5174_v57  ;;  %3070 = vmatpush3.bf16.msra.mxu1 %v3067_v60  ;;  %v4514_v60 = vld [vmem:[#allocation2 + $0x39] sm:$0xff] }
  0xd8   : > { %2019 = vmatmul.mubr.f32.gmra.mrb[68].mxu1 %v4183_v59  ;;  %3072 = vmatprep.subr.bf16.mxu1 %v3071_v17  ;;  %v3079_v59 = vpack.c.bf16 %v1222_v18, %v1221_v29  ;;  %v4552_v29 = vld [vmem:[#allocation2 + $0xd9] sm:$0xff]  ;;  %v4562_v18 = vld [vmem:[#allocation2 + $0x61] sm:$0xff] }
  0xd9   : > { %1754 = vmatmul.mubr.f32.gmra.mrb[4].mxu0 %v4496_v20  ;;  %2023 = vmatprep.mubr.f32.mxu1 %v4504_v10 }
  0xda   : > { %1758 = vmatprep.mubr.f32.mxu0 %v4499_v14  ;;  %3023 = vmatpush1.bf16.msra.mxu0 %v3984_v44  ;;  %v1224_v44 = vld [vmem:[%s5090_s3 + $0x458] sm:$0xff] }
  0xdb   : > { %3024 = vmatprep.subr.bf16.mxu0 %v5174_v57  ;;  %3074 = vmatpush3.bf16.msra.mxu1 %v3071_v17  ;;  %v4530_v17 = vld [vmem:[#allocation2 + $0x49] sm:$0xff] }
  0xdc   : > { %2024 = vmatmul.mubr.f32.gmra.mrb[70].mxu1 %v4208_v9  ;;  %3076 = vmatprep.subr.bf16.mxu1 %v3075_v32  ;;  %v3083_v9 = vpack.c.bf16 %v1224_v44, %v1223_v28  ;;  %v1059_v28 = vld [vmem:[#allocation2 + $0x7a] sm:$0xff] }
  0xdd   : > { %1759 = vmatmul.mubr.f32.gmra.mrb[6].mxu0 %v4514_v60  ;;  %2028 = vmatprep.mubr.f32.mxu1 %v4520_v15 }
  0xde   : > { %1763 = vmatprep.mubr.f32.mxu0 %v4065_v4  ;;  %3026 = vmatpush1.bf16.msra.mxu0 %v4012_v19  ;;  %v1225_v4 = vld [vmem:[%s5090_s3 + $0x460] sm:$0xff]  ;;  %v1226_v19 = vld [vmem:[%s5090_s3 + $0x468] sm:$0xff] }
  0xdf   : > { %3027 = vmatprep.subr.bf16.mxu0 %v5174_v57  ;;  %3078 = vmatpush3.bf16.msra.mxu1 %v3075_v32  ;;  %v4546_v32 = vld [vmem:[#allocation2 + $0x51] sm:$0xff] }
  0xe0   : > { %2029 = vmatmul.mubr.f32.gmra.mrb[72].mxu1 %v4234_v48  ;;  %3080 = vmatprep.subr.bf16.mxu1 %v3079_v59  ;;  %v3087_v48 = vpack.c.bf16 %v1226_v19, %v1225_v4  ;;  %v1061_v4 = vld [vmem:[#allocation2 + $0x92] sm:$0xff] }
  0xe1   : > { %1764 = vmatmul.mubr.f32.gmra.mrb[8].mxu0 %v4530_v17  ;;  %2033 = vmatprep.mubr.f32.mxu1 %v4536_v13 }
  0xe2   : > { %1768 = vmatprep.mubr.f32.mxu0 %v4087_v0  ;;  %3029 = vmatpush1.bf16.msra.mxu0 %v4034_v12  ;;  %v1227_v0 = vld [vmem:[%s5090_s3 + $0x470] sm:$0xff]  ;;  %v1228_v12 = vld [vmem:[%s5090_s3 + $0x478] sm:$0xff] }
  0xe3   : > { %3030 = vmatprep.subr.bf16.mxu0 %v5174_v57  ;;  %3082 = vmatpush3.bf16.msra.mxu1 %v3079_v59  ;;  %v4568_v59 = vld [vmem:[#allocation2 + $0xe1] sm:$0xff] }
  0xe4   : > { %2034 = vmatmul.mubr.f32.gmra.mrb[74].mxu1 %v4260_v30  ;;  %3084 = vmatprep.subr.bf16.mxu1 %v3083_v9  ;;  %v3091_v30 = vpack.c.bf16 %v1228_v12, %v1227_v0  ;;  %v1062_v0 = vld [vmem:[#allocation2 + $0x9a] sm:$0xff]  ;;  %v5194_v12 = vld [vmem:[#allocation19_spill] sm:$0xff] }
  0xe5   : > { %1769 = vmatmul.mubr.f32.gmra.mrb[10].mxu0 %v4546_v32  ;;  %2038 = vmatprep.mubr.f32.mxu1 %v4552_v29 }
  0xe6   : > { %1773 = vmatprep.mubr.f32.mxu0 %v4109_v23  ;;  %3032 = vmatpush1.bf16.msra.mxu0 %v4054_v46  ;;  %v4572_v23 = vld [vmem:[#allocation2 + $0x69] sm:$0xff]  ;;  %v4578_v46 = vld [vmem:[#allocation2 + $0xf1] sm:$0xff] }
  0xe7   : > { %3033 = vmatprep.subr.bf16.mxu0 %v5174_v57  ;;  %3086 = vmatpush3.bf16.msra.mxu1 %v3083_v9  ;;  %v1060_v9 = vld [vmem:[#allocation2 + $0x82] sm:$0xff] }
  0xe8   : > { %2039 = vmatmul.mubr.f32.gmra.mrb[76].mxu1 %v4292_v61  ;;  %3088 = vmatprep.subr.bf16.mxu1 %v3087_v48  ;;  %v4582_v61 = vld [vmem:[#allocation2 + $0x79] sm:$0xff] }
  0xe9   : > { %1774 = vmatmul.mubr.f32.gmra.mrb[12].mxu0 %v4562_v18  ;;  %2043 = vmatprep.mubr.f32.mxu1 %v4568_v59 }
  0xea   : > { %1778 = vmatprep.mubr.f32.mxu0 %v4131_v25  ;;  %3035 = vmatpush1.bf16.msra.mxu0 %v4075_v21  ;;  %v4588_v21 = vld [vmem:[#allocation2 + $0xf9] sm:$0xff]  ;;  %v4592_v25 = vld [vmem:[#allocation2 + $0x81] sm:$0xff] }
  0xeb   : > { %3036 = vmatprep.subr.bf16.mxu0 %v5174_v57  ;;  %3090 = vmatpush3.bf16.msra.mxu1 %v3087_v48 }
  0xec   : > { %2044 = vmatmul.mubr.f32.gmra.mrb[78].mxu1 %v4308_v39  ;;  %3092 = vmatprep.subr.bf16.mxu1 %v3091_v30  ;;  %v1019_v39 = vld [vmem:[#allocation2 + $0x198] sm:$0xff] }
  0xed   : > { %1779 = vmatmul.mubr.f32.gmra.mrb[14].mxu0 %v4572_v23  ;;  %2048 = vmatprep.mubr.f32.mxu1 %v4578_v46 }
  0xee   : > { %1783 = vmatprep.mubr.f32.mxu0 %v4156_v35  ;;  %3038 = vmatpush1.bf16.msra.mxu0 %v4097_v36  ;;  %v3299_v36 = vld [vmem:[#allocation2 + $0x109] sm:$0xff]  ;;  %v3300_v35 = vld [vmem:[#allocation2 + $0x111] sm:$0xff] }
  0xef   : > { %3039 = vmatprep.subr.bf16.mxu0 %v5174_v57  ;;  %3094 = vmatpush3.bf16.msra.mxu1 %v3091_v30  ;;  %v1063_v30 = vld [vmem:[#allocation2 + $0xaa] sm:$0xff] }
  0xf0   : > { %2049 = vmatmul.mubr.f32.gmra.mrb[80].mxu1 %v4320_v52 }
  0xf1   : > { %1784 = vmatmul.mubr.f32.gmra.mrb[16].mxu0 %v4582_v61  ;;  %2053 = vmatprep.mubr.f32.mxu1 %v4588_v21 }
  0xf2   : > { %1788 = vmatprep.mubr.f32.mxu0 %v4181_v38  ;;  %3041 = vmatpush1.bf16.msra.mxu0 %v4119_v37  ;;  %v3301_v37 = vld [vmem:[#allocation2 + $0x121] sm:$0xff] }
  0xf3   : > { %3042 = vmatprep.subr.bf16.mxu0 %v5174_v57  ;;  %v5175_v38 = vld [vmem:[#allocation6_spill] sm:$0xff] }
  0xf4   : > { %2054 = vmatmul.mubr.f32.gmra.mrb[82].mxu1 %v4330_v34 }
  0xf5   : > { %1789 = vmatmul.mubr.f32.gmra.mrb[18].mxu0 %v4592_v25  ;;  %2058 = vmatprep.mubr.f32.mxu1 %v3299_v36 }
  0xf6   : > { %1793 = vmatprep.mubr.f32.mxu0 %v4206_v1  ;;  %3044 = vmatpush1.bf16.msra.mxu0 %v4143_v42  ;;  %v3304_v42 = vld [vmem:[#allocation2 + $0x141] sm:$0xff]  ;;  %v5177_v1 = vld [vmem:[#allocation16_spill] sm:$0xff] }
  0xf7   : > { %3045 = vmatprep.subr.bf16.mxu0 %v5174_v57 }
  0xf8   : > { %2059 = vmatmul.mubr.f32.gmra.mrb[84].mxu1 %v4348_v7  ;;  %v3302_v7 = vld [vmem:[#allocation2 + $0x129] sm:$0xff] }
  0xf9   : > { %1794 = vmatmul.mubr.f32.gmra.mrb[20].mxu0 %v4461_v58  ;;  %2063 = vmatprep.mubr.f32.mxu1 %v3300_v35  ;;  %v5191_v58 = vld [vmem:[#allocation14_spill] sm:$0xff] }
  0xfa   : > { %1798 = vmatprep.mubr.f32.mxu0 %v4232_v33  ;;  %3047 = vmatpush1.bf16.msra.mxu0 %v4168_v50  ;;  %v4628_v50 = vld [vmem:[#allocation2 + $0x151] sm:$0xff]  ;;  %v5180_v33 = vld [vmem:[#allocation9_spill] sm:$0xff] }
  0xfb   : > { %3048 = vmatprep.subr.bf16.mxu0 %v5174_v57 }
  0xfc   : > { %2064 = vmatmul.mubr.f32.gmra.mrb[86].mxu1 %v4357_v51  ;;  %v3303_v51 = vld [vmem:[#allocation2 + $0x139] sm:$0xff] }
  0xfd   : > { %1799 = vmatmul.mubr.f32.gmra.mrb[22].mxu0 %v4471_v55  ;;  %2068 = vmatprep.mubr.f32.mxu1 %v3301_v37  ;;  %v1056_v55 = vld [vmem:[#allocation2 + $0x52] sm:$0xff] }
  0xfe   : > { %1803 = vmatprep.mubr.f32.mxu0 %v4258_v49  ;;  %3050 = vmatpush1.bf16.msra.mxu0 %v4193_v53  ;;  %v5176_v53 = vld [vmem:[#allocation5_spill] sm:$0xff]  ;;  %v5184_v49 = vld [vmem:[#allocation10_spill] sm:$0xff] }
  0xff   : > { %3051 = vmatprep.subr.bf16.mxu0 %v5174_v57 }
 0x100   : > { %2069 = vmatmul.mubr.f32.gmra.mrb[88].mxu1 %v4369_v40  ;;  %v5189_v40 = vld [vmem:[#allocation12_spill] sm:$0xff] }
 0x101   : > { %1804 = vmatmul.mubr.f32.gmra.mrb[24].mxu0 %v4486_v22  ;;  %2073 = vmatprep.mubr.f32.mxu1 %v3302_v7 }
 0x102   : > { %1808 = vmatprep.mubr.f32.mxu0 %v4290_v45  ;;  %3053 = vmatpush1.bf16.msra.mxu0 %v4218_v54 }
 0x103   : > { %3054 = vmatprep.subr.bf16.mxu0 %v5174_v57 }
 0x104   : > { %2074 = vmatmul.mubr.f32.gmra.mrb[90].mxu1 %v4381_v24 }
 0x105   : > { %1809 = vmatmul.mubr.f32.gmra.mrb[26].mxu0 %v4504_v10  ;;  %2078 = vmatprep.mubr.f32.mxu1 %v3303_v51 }
 0x106   : > { %1813 = vmatprep.mubr.f32.mxu0 %v4306_v2  ;;  %3056 = vmatpush1.bf16.msra.mxu0 %v4244_v6  ;;  %v5186_v2 = vld [vmem:[#allocation7_spill] sm:$0xff] }
 0x107   : > { %3057 = vmatprep.subr.bf16.mxu0 %v5174_v57 }
 0x108   : > { %2079 = vmatmul.mubr.f32.gmra.mrb[92].mxu1 %v4390_v43  ;;  %v5190_v43 = vld [vmem:[#allocation13_spill] sm:$0xff] }
 0x109   : > { %1814 = vmatmul.mubr.f32.gmra.mrb[28].mxu0 %v4520_v15  ;;  %2083 = vmatprep.mubr.f32.mxu1 %v3304_v42  ;;  %v5192_v15 = vld [vmem:[#allocation15_spill] sm:$0xff] }
 0x10a   : > { %1818 = vmatprep.mubr.f32.mxu0 %v4318_v11  ;;  %3059 = vmatpush1.bf16.msra.mxu0 %v4270_v31  ;;  %v5185_v31 = vld [vmem:[#allocation20_spill] sm:$0xff]  ;;  %v5187_v11 = vld [vmem:[#allocation11_spill] sm:$0xff] }
 0x10b   : > { %3060 = vmatprep.subr.bf16.mxu0 %v5174_v57  ;;  %v1057_v57 = vld [vmem:[#allocation2 + $0x62] sm:$0xff] }
 0x10c   : > { %2084 = vmatmul.mubr.f32.gmra.mrb[94].mxu1 %v4399_v63  ;;  %v1055_v63 = vld [vmem:[#allocation2 + $0x4a] sm:$0xff] }
 0x10d   : > { %1819 = vmatmul.mubr.f32.gmra.mrb[30].mxu0 %v4536_v13  ;;  %2088 = vmatprep.mubr.f32.mxu1 %v4628_v50  ;;  %v5193_v13 = vld [vmem:[#allocation17_spill] sm:$0xff] }
 0x10e   : > { %1823 = vmatprep.mubr.f32.mxu0 %v5175_v38  ;;  %3062 = vmatpush1.bf16.msra.mxu0 %v5176_v53  ;;  %v1066_v38 = vld [vmem:[#allocation2 + $0xca] sm:$0xff]  ;;  %v1067_v53 = vld [vmem:[#allocation2 + $0xda] sm:$0xff] }
 0x110   : > { %2089 = vmatmul.mubr.f32.gmra.mrb[96].mxu1 %v4408_v47 }
 0x111   : > { %1824 = vmatmul.mubr.f32.gmra.mrb[32].mxu0 %v4552_v29  ;;  %2093 = vmatprep.mubr.f32.mxu1 %v3937_v62  ;;  %v5178_v62 = vld [vmem:[#allocation3_spill] sm:$0xff]  ;;  %v3306_v29 = vld [vmem:[#allocation2 + $0x159] sm:$0xff] }
 0x112   : > { %1828 = vmatprep.mubr.f32.mxu0 %v4343_v26  ;;  %v5179_v54 = vmax.f32 %v5178_v62, 0.0  ;;  %v5188_v26 = vld [vmem:[#allocation8_spill] sm:$0xff] }
 0x114   : > { %2094 = vmatmul.mubr.f32.gmra.mrb[98].mxu1 %v4417_v16 }
 0x115   : > { %1829 = vmatmul.mubr.f32.gmra.mrb[34].mxu0 %v4568_v59  ;;  %2098 = vmatprep.mubr.f32.mxu1 %v3953_v27  ;;  %v5181_v27 = vld [vmem:[#allocation18_spill] sm:$0xff] }
 0x116   : > { %1833 = vmatprep.mubr.f32.mxu0 %v4355_v8  ;;  %v5182_v8 = vld [vmem:[#allocation4_spill] sm:$0xff] }
 0x117   : > { %v5183_v6 = vmax.f32 %v5182_v8, 0.0  ;;  %v1069_v8 = vld [vmem:[#allocation2 + $0xf2] sm:$0xff] }
 0x118   : > { %2099 = vmatmul.mubr.f32.gmra.mrb[100].mxu1 %v4426_v5 }
 0x119   : > { %1834 = vmatmul.mubr.f32.gmra.mrb[36].mxu0 %v4578_v46  ;;  %2103 = vmatprep.mubr.f32.mxu1 %v3973_v56 }
 0x11a   : > { %1838 = vmatprep.mubr.f32.mxu0 %v4367_v3  ;;  %v1020_v3 = vld [vmem:[#allocation2 + $0x1a0] sm:$0xff] }
 0x11c   : > { %2104 = vmatmul.mubr.f32.gmra.mrb[102].mxu1 %v5177_v1  ;;  %v4689_v1 = vld [vmem:[#allocation2 + $0x18a] sm:$0xff] }
 0x11d   : > { %1839 = vmatmul.mubr.f32.gmra.mrb[38].mxu0 %v4588_v21  ;;  %2108 = vmatprep.mubr.f32.mxu1 %v5179_v54  ;;  %v3307_v21 = vld [vmem:[#allocation2 + $0x169] sm:$0xff] }
 0x11e   : > { %1843 = vmatprep.mubr.f32.mxu0 %v5180_v33  ;;  %v3309_v33 = vld [vmem:[#allocation2 + $0x181] sm:$0xff] }
 0x120   : > { %2109 = vmatmul.mubr.f32.gmra.mrb[104].mxu1 %v5181_v27  ;;  %v1068_v27 = vld [vmem:[#allocation2 + $0xe2] sm:$0xff] }
 0x121   : > { %1844 = vmatmul.mubr.f32.gmra.mrb[40].mxu0 %v3299_v36  ;;  %2113 = vmatprep.mubr.f32.mxu1 %v5183_v6  ;;  %v1064_v36 = vld [vmem:[#allocation2 + $0xb2] sm:$0xff] }
 0x122   : > { %1848 = vmatprep.mubr.f32.mxu0 %v5184_v49 }
 0x123   : > { %v4654_v56 = vpop.f32.mrb[0].mxu1 }
 0x124   : > { %2114 = vmatmul.mubr.f32.gmra.mrb[106].mxu1 %v5185_v31  ;;  %v1297_v45 = vpop.f32.mrb[1].mxu1  ;;  %v3310_v31 = vld [vmem:[#allocation2 + $0x189] sm:$0xff] }
 0x125   : > { %1849 = vmatmul.mubr.f32.gmra.mrb[42].mxu0 %v3300_v35  ;;  %2118 = vmatprep.mubr.f32.mxu1 %v5186_v2  ;;  %v5195_v35 = vld [vmem:[#allocation21_spill] sm:$0xff]  ;;  %v989_v2 = vld [vmem:[#allocation2 + $0x30] sm:$0xff] }
 0x126   : > { %1853 = vmatprep.mubr.f32.mxu0 %v5187_v11  ;;  %v1070_v45 = vld [vmem:[#allocation2 + $0xfa] sm:$0xff] }
 0x127   : > { %v4659_v52 = vpop.f32.mrb[2].mxu1 }
 0x128   : > { %2119 = vmatmul.mubr.f32.gmra.mrb[108].mxu1 %v1019_v39  ;;  %v1302_v34 = vpop.f32.mrb[3].mxu1  ;;  %v1071_v39 = vld [vmem:[#allocation2 + $0x10a] sm:$0xff] }
 0x129   : > { %1854 = vmatmul.mubr.f32.gmra.mrb[44].mxu0 %v3301_v37  ;;  %2123 = vmatprep.mubr.f32.mxu1 %v5188_v26  ;;  %v1065_v37 = vld [vmem:[#allocation2 + $0xc2] sm:$0xff]  ;;  %v1072_v26 = vld [vmem:[#allocation2 + $0x112] sm:$0xff] }
 0x12a   : > { %1858 = vmatprep.mubr.f32.mxu0 %v5189_v40 }
 0x12b   : > { %v4663_v16 = vpop.f32.mrb[4].mxu1 }
 0x12c   : > { %2124 = vmatmul.mubr.f32.gmra.mrb[110].mxu1 %v1020_v3  ;;  %v1307_v24 = vpop.f32.mrb[5].mxu1  ;;  %v990_v3 = vld [vmem:[#allocation2 + $0x38] sm:$0xff] }
 0x12d   : > { %1859 = vmatmul.mubr.f32.gmra.mrb[46].mxu0 %v3302_v7  ;;  %2823 = vmatprep.mubr.f32.mxu1 %v4481_v41  ;;  %v1058_v41 = vld [vmem:[#allocation2 + $0x6a] sm:$0xff]  ;;  %v4684_v7 = vld [vmem:[#allocation2 + $0x182] sm:$0xff] }
 0x12e   : > { %1863 = vmatprep.mubr.f32.mxu0 %v5190_v43  ;;  %v1073_v24 = vld [vmem:[#allocation2 + $0x122] sm:$0xff] }
 0x12f   : > { %v4667_v5 = vpop.f32.mrb[6].mxu1 }
 0x130   : > { %2824 = vmatmul.mubr.f32.vlgmr.msra.gmra.mrb[112].mxu1 %v4499_v14  ;;  %v1312_v47 = vpop.f32.mrb[7].mxu1 }
 0x131   : > { %1864 = vmatmul.mubr.f32.gmra.mrb[48].mxu0 %v3303_v51  ;;  %2826 = vmatprep.mubr.f32.mxu1 %v1055_v63 }
 0x132   : > { %1868 = vmatprep.mubr.f32.mxu0 %v5191_v58 }
 0x133   : > { %v4671_v22 = vpop.f32.mrb[8].mxu1 }
 0x134   : > { %2827 = vmatmul.mubr.f32.gmra.mrb[114].mxu1 %v1056_v55  ;;  %v1317_v10 = vpop.f32.mrb[9].mxu1 }
 0x135   : > { %1869 = vmatmul.mubr.f32.gmra.mrb[50].mxu0 %v3304_v42  ;;  %2829 = vmatprep.mubr.f32.mxu1 %v1057_v57 }
 0x136   : > { %1873 = vmatprep.mubr.f32.mxu0 %v5192_v15 }
 0x137   : > { %v4674_v44 = vpop.f32.mrb[10].mxu1 }
 0x138   : > { %2830 = vmatmul.mubr.f32.gmra.mrb[116].mxu1 %v1058_v41  ;;  %v1322_v14 = vpop.f32.mrb[11].mxu1 }
 0x139   : > { %1874 = vmatmul.mubr.f32.gmra.mrb[52].mxu0 %v4628_v50  ;;  %2832 = vmatprep.mubr.f32.mxu1 %v1059_v28  ;;  %v3308_v50 = vld [vmem:[#allocation2 + $0x171] sm:$0xff] }
 0x13a   : > { %1878 = vmatprep.mubr.f32.mxu0 %v5193_v13 }
 0x13b   : > { %v4678_v19 = vpop.f32.mrb[12].mxu1 }
 0x13c   : > { %2833 = vmatmul.mubr.f32.gmra.mrb[118].mxu1 %v1060_v9  ;;  %v1327_v48 = vpop.f32.mrb[13].mxu1 }
 0x13d   : > { %1879 = vmatmul.mubr.f32.gmra.mrb[54].mxu0 %v3306_v29  ;;  %2835 = vmatprep.mubr.f32.mxu1 %v1061_v4 }
 0x13e   : > { %1883 = vmatprep.mubr.f32.mxu0 %v5194_v12 }
 0x13f   : > { %v4681_v59 = vpop.f32.mrb[14].mxu1 }
 0x140   : > { %2836 = vmatmul.mubr.f32.gmra.mrb[120].mxu1 %v1062_v0  ;;  %v1332_v46 = vpop.f32.mrb[15].mxu1 }
 0x141   : > { %1884 = vmatmul.mubr.f32.gmra.mrb[56].mxu0 %v3307_v21  ;;  %2838 = vmatprep.mubr.f32.mxu1 %v1063_v30 }
 0x142   : > { %1888 = vmatprep.mubr.f32.mxu0 %v5195_v35 }
 0x143   : > { %v4686_v51 = vpop.f32.mrb[16].mxu1 }
 0x144   : > { %2839 = vmatmul.mubr.f32.gmra.mrb[122].mxu1 %v1064_v36  ;;  %v1337_v42 = vpop.f32.mrb[17].mxu1 }
 0x145   : > { %1889 = vmatmul.mubr.f32.gmra.mrb[58].mxu0 %v3308_v50  ;;  %2841 = vmatprep.mubr.f32.mxu1 %v1065_v37 }
 0x146   : > { %1893 = vmatprep.mubr.f32.mxu0 %v4684_v7 }
 0x147   : > { %v4691_v62 = vpop.f32.mrb[18].mxu1 }
 0x148   : > { %2842 = vmatmul.mubr.f32.gmra.mrb[124].mxu1 %v1066_v38  ;;  %v1342_v54 = vpop.f32.mrb[19].mxu1 }
 0x149   : > { %1894 = vmatmul.mubr.f32.gmra.mrb[60].mxu0 %v3309_v33  ;;  %2844 = vmatprep.mubr.f32.mxu1 %v1067_v53 }
 0x14a   : > { %1898 = vmatprep.mubr.f32.mxu0 %v4689_v1 }
 0x14b   : > { %v4694_v6 = vpop.f32.mrb[20].mxu1 }
 0x14c   : > { %2845 = vmatmul.mubr.f32.gmra.mrb[126].mxu1 %v1068_v27  ;;  %v1347_v49 = vpop.f32.mrb[21].mxu1 }
 0x14d   : > { %1899 = vmatmul.mubr.f32.gmra.mrb[62].mxu0 %v3310_v31  ;;  %2847 = vmatprep.mubr.f32.mxu1 %v1069_v8 }
 0x14e   : > { %1968 = vmatprep.mubr.f32.mxu0 %v4496_v20  ;;  %v991_v20 = vld [vmem:[#allocation2 + $0x48] sm:$0xff] }
 0x14f   : > { %v4697_v11 = vpop.f32.mrb[22].mxu1 }
 0x150   : > { %2848 = vmatmul.mubr.f32.gmra.mrb[128].mxu1 %v1070_v45  ;;  %v1352_v34 = vpop.f32.mrb[23].mxu1 }
 0x151   : > { %1969 = vmatmul.mubr.f32.vlgmr.msra.gmra.mrb[0].mxu0 %v989_v2  ;;  %2850 = vmatprep.mubr.f32.mxu1 %v1071_v39 }
 0x152   : > { %1973 = vmatprep.mubr.f32.mxu0 %v4514_v60  ;;  %v992_v60 = vld [vmem:[#allocation2 + $0x50] sm:$0xff] }
 0x153   : > { %v4700_v63 = vpop.f32.mrb[24].mxu1 }
 0x154   : > { %2851 = vmatmul.mubr.f32.gmra.mrb[130].mxu1 %v1072_v26  ;;  %v1357_v47 = vpop.f32.mrb[25].mxu1 }
 0x155   : > { %1974 = vmatmul.mubr.f32.gmra.mrb[2].mxu0 %v990_v3  ;;  %2853 = vmatprep.mubr.f32.mxu1 %v1073_v24 }
 0x156   : > { %1978 = vmatprep.mubr.f32.mxu0 %v4530_v17  ;;  %v993_v17 = vld [vmem:[#allocation2 + $0x60] sm:$0xff] }
 0x157   : > { %v4703_v55 = vpop.f32.mrb[26].mxu1 }
 0x158   : > { %2854 = vmatmul.mubr.f32.gmra.mrb[132].mxu1 %v5189_v40  ;;  %v1362_v57 = vpop.f32.mrb[27].mxu1 }
 0x159   : > { %1979 = vmatmul.mubr.f32.gmra.mrb[4].mxu0 %v991_v20  ;;  %2856 = vmatprep.mubr.f32.mxu1 %v5190_v43 }
 0x15a   : > { %1983 = vmatprep.mubr.f32.mxu0 %v4546_v32  ;;  %v994_v32 = vld [vmem:[#allocation2 + $0x68] sm:$0xff] }
 0x15b   : > { %v4708_v10 = vpop.f32.mrb[28].mxu1 }
 0x15c   : > { %2857 = vmatmul.mubr.f32.gmra.mrb[134].mxu1 %v5191_v58  ;;  %v1367_v41 = vpop.f32.mrb[29].mxu1 }
 0x15d   : > { %1984 = vmatmul.mubr.f32.gmra.mrb[6].mxu0 %v992_v60  ;;  %2859 = vmatprep.mubr.f32.mxu1 %v5192_v15  ;;  %v1083_v15 = vld [vmem:[#allocation2 + $0x19a] sm:$0xff] }
 0x15e   : > { %1988 = vmatprep.mubr.f32.mxu0 %v4562_v18  ;;  %v995_v18 = vld [vmem:[#allocation2 + $0x78] sm:$0xff] }
 0x15f   : > { %v4713_v28 = vpop.f32.mrb[30].mxu1 }
 0x160   : > { %2860 = vmatmul.mubr.f32.gmra.mrb[136].mxu1 %v5193_v13  ;;  %v1372_v40 = vpop.f32.mrb[31].mxu1  ;;  %v996_v13 = vld [vmem:[#allocation2 + $0x80] sm:$0xff] }
 0x161   : > { %1989 = vmatmul.mubr.f32.gmra.mrb[8].mxu0 %v993_v17  ;;  %2862 = vmatprep.mubr.f32.mxu1 %v5194_v12 }
 0x162   : > { %1993 = vmatprep.mubr.f32.mxu0 %v4572_v23  ;;  %v1084_v23 = vld [vmem:[#allocation2 + $0x1a2] sm:$0xff] }
 0x163   : > { %v4718_v43 = vpop.f32.mrb[32].mxu1 }
 0x164   : > { %2863 = vmatmul.mubr.f32.gmra.mrb[138].mxu1 %v5195_v35  ;;  %v1377_v58 = vpop.f32.mrb[33].mxu1 }
 0x165   : > { %1994 = vmatmul.mubr.f32.gmra.mrb[10].mxu0 %v994_v32  ;;  %2865 = vmatprep.mubr.f32.mxu1 %v4684_v7 }
 0x166   : > { %1998 = vmatprep.mubr.f32.mxu0 %v4582_v61 }
 0x167   : > { %v4723_v14 = vpop.f32.mrb[34].mxu1 }
 0x168   : > { %2866 = vmatmul.mubr.f32.gmra.mrb[140].mxu1 %v4689_v1  ;;  %v1382_v9 = vpop.f32.mrb[35].mxu1 }
 0x169   : > { %1999 = vmatmul.mubr.f32.gmra.mrb[12].mxu0 %v995_v18  ;;  %2868 = vmatprep.mubr.f32.mxu1 %v1083_v15 }
 0x16a   : > { %2003 = vmatprep.mubr.f32.mxu0 %v4592_v25 }
 0x16b   : > { %v4727_v4 = vpop.f32.mrb[36].mxu1 }
 0x16c   : > { %2869 = vmatmul.mubr.f32.gmra.mrb[142].mxu1 %v1084_v23  ;;  %v1387_v48 = vpop.f32.mrb[37].mxu1 }
 0x16d   : > { %2004 = vmatmul.mubr.f32.gmra.mrb[14].mxu0 %v996_v13 }
 0x16f   : > { %v4729_v29 = vpop.f32.mrb[38].mxu1 }
 0x170   : > { %v1392_v61 = vpop.f32.mrb[39].mxu1 }
 0x173   : > { %v4731_v0 = vpop.f32.mrb[40].mxu1 }
 0x174   : > { %v1397_v12 = vpop.f32.mrb[41].mxu1 }
 0x177   : > { %v4733_v30 = vpop.f32.mrb[42].mxu1 }
 0x178   : > { %v1402_v46 = vpop.f32.mrb[43].mxu1 }
 0x17b   : > { %v4735_v21 = vpop.f32.mrb[44].mxu1 }
 0x17c   : > { %v1407_v36 = vpop.f32.mrb[45].mxu1 }
 0x17f   : > { %v4737_v35 = vpop.f32.mrb[46].mxu1 }
 0x180   : > { %v1412_v25 = vpop.f32.mrb[47].mxu1 }
 0x183   : > { %v4739_v37 = vpop.f32.mrb[48].mxu1 }
 0x184   : > { %v1417_v7 = vpop.f32.mrb[49].mxu1 }
 0x187   : > { %v4741_v42 = vpop.f32.mrb[50].mxu1 }
 0x188   : > { %v1422_v50 = vpop.f32.mrb[51].mxu1 }
 0x18b   : > { %v4743_v38 = vpop.f32.mrb[52].mxu1 }
 0x18c   : > { %v1427_v53 = vpop.f32.mrb[53].mxu1 }
 0x18f   : > { %v4745_v1 = vpop.f32.mrb[54].mxu1 }
 0x190   : > { %v1432_v54 = vpop.f32.mrb[55].mxu1 }
 0x193   : > { %v4747_v33 = vpop.f32.mrb[56].mxu1 }
 0x194   : > { %v1437_v27 = vpop.f32.mrb[57].mxu1 }
 0x197   : > { %v4749_v8 = vpop.f32.mrb[58].mxu1 }
 0x198   : > { %v1442_v49 = vpop.f32.mrb[59].mxu1 }
 0x19b   : > { %v4751_v31 = vpop.f32.mrb[60].mxu1 }
 0x19c   : > { %v1447_v45 = vpop.f32.mrb[61].mxu1 }
 0x19f   : > { %v4753_v2 = vpop.f32.mrb[62].mxu1 }
 0x1a0   : > { %v1452_v39 = vpop.f32.mrb[63].mxu1 }
 0x1a3   : > { %v2010_v34 = vpop.f32.mrb[64].mxu1 }
 0x1a4   : > { %v2012_v26 = vpop.f32.mrb[65].mxu1 }
 0x1a7   : > { %v2015_v3 = vpop.f32.mrb[66].mxu1 }
 0x1a8   : > { %v2017_v24 = vpop.f32.mrb[67].mxu1 }
 0x1ab   : > { %v2020_v47 = vpop.f32.mrb[68].mxu1 }
 0x1ac   : > { %v2022_v20 = vpop.f32.mrb[69].mxu1 }
 0x1af   : > { %v2025_v57 = vpop.f32.mrb[70].mxu1 }
 0x1b0   : > { %v2027_v60 = vpop.f32.mrb[71].mxu1 }
 0x1b3   : > { %v2030_v41 = vpop.f32.mrb[72].mxu1 }
 0x1b4   : > { %v2032_v17 = vpop.f32.mrb[73].mxu1 }
 0x1b7   : > { %v2035_v40 = vpop.f32.mrb[74].mxu1 }
 0x1b8   : > { %v2037_v32 = vpop.f32.mrb[75].mxu1 }
 0x1bb   : > { %v2040_v58 = vpop.f32.mrb[76].mxu1 }
 0x1bc   : > { %v2042_v18 = vpop.f32.mrb[77].mxu1 }
 0x1bf   : > { %v2045_v15 = vpop.f32.mrb[78].mxu1 }
 0x1c0   : > { %v2047_v9 = vpop.f32.mrb[79].mxu1 }
 0x1c3   : > { %v2050_v23 = vpop.f32.mrb[80].mxu1 }
 0x1c4   : > { %v1785_v13 = vpop.f32.mrb[16].mxu0  ;;  %v2052_v48 = vpop.f32.mrb[81].mxu1 }
 0x1c5   : > { %v3135_v61 = vadd.f32 %v1785_v13, %v4686_v51  ;;  %v1787_v12 = vpop.f32.mrb[17].mxu0 }
 0x1c7   : > { %v4756_v46 = vadd.f32 %v3135_v61, %v2010_v34  ;;  %v2055_v36 = vpop.f32.mrb[82].mxu1 }
 0x1c8   : > { %v1790_v25 = vpop.f32.mrb[18].mxu0  ;;  %v2057_v7 = vpop.f32.mrb[83].mxu1 }
 0x1c9   : > { %v3137_v50 = vadd.f32 %v1790_v25, %v4691_v62  ;;  %v1792_v53 = vpop.f32.mrb[19].mxu0 }
 0x1cb   : > { %v4759_v54 = vadd.f32 %v3137_v50, %v2015_v3  ;;  %v2060_v27 = vpop.f32.mrb[84].mxu1 }
 0x1cc   : > { %v1795_v49 = vpop.f32.mrb[20].mxu0  ;;  %v2062_v45 = vpop.f32.mrb[85].mxu1 }
 0x1cd   : > { %v3139_v39 = vadd.f32 %v1795_v49, %v4694_v6  ;;  %v1797_v26 = vpop.f32.mrb[21].mxu0 }
 0x1cf   : > { %v4762_v24 = vadd.f32 %v3139_v39, %v2020_v47  ;;  %v2065_v51 = vpop.f32.mrb[86].mxu1 }
 0x1d0   : > { %v1800_v20 = vpop.f32.mrb[22].mxu0  ;;  %v2067_v34 = vpop.f32.mrb[87].mxu1 }
 0x1d1   : > { %v3141_v60 = vadd.f32 %v1800_v20, %v4697_v11  ;;  %v1802_v17 = vpop.f32.mrb[23].mxu0 }
 0x1d3   : > { %v4765_v32 = vadd.f32 %v3141_v60, %v2025_v57  ;;  %v2070_v62 = vpop.f32.mrb[88].mxu1 }
 0x1d4   : > { %v1805_v18 = vpop.f32.mrb[24].mxu0  ;;  %v2072_v3 = vpop.f32.mrb[89].mxu1 }
 0x1d5   : > { %v3143_v9 = vadd.f32 %v1805_v18, %v4700_v63  ;;  %v1807_v13 = vpop.f32.mrb[25].mxu0 }
 0x1d7   : > { %v4768_v48 = vadd.f32 %v3143_v9, %v2030_v41  ;;  %v2075_v6 = vpop.f32.mrb[90].mxu1 }
 0x1d8   : > { %v1810_v61 = vpop.f32.mrb[26].mxu0  ;;  %v2077_v47 = vpop.f32.mrb[91].mxu1 }
 0x1d9   : > { %v3145_v12 = vadd.f32 %v1810_v61, %v4703_v55  ;;  %v1812_v25 = vpop.f32.mrb[27].mxu0 }
 0x1db   : > { %v4771_v7 = vadd.f32 %v3145_v12, %v2035_v40  ;;  %v2080_v11 = vpop.f32.mrb[92].mxu1 }
 0x1dc   : > { %v1815_v50 = vpop.f32.mrb[28].mxu0  ;;  %v2082_v57 = vpop.f32.mrb[93].mxu1 }
 0x1dd   : > { %v3147_v53 = vadd.f32 %v1815_v50, %v4708_v10  ;;  %v1817_v49 = vpop.f32.mrb[29].mxu0 }
 0x1df   : > { %v4774_v45 = vadd.f32 %v3147_v53, %v2040_v58  ;;  %v2085_v63 = vpop.f32.mrb[94].mxu1 }
 0x1e0   : > { %v1820_v39 = vpop.f32.mrb[30].mxu0  ;;  %v2087_v41 = vpop.f32.mrb[95].mxu1 }
 0x1e1   : > { %v3149_v26 = vadd.f32 %v1820_v39, %v4713_v28  ;;  %v1822_v20 = vpop.f32.mrb[31].mxu0 }
 0x1e3   : > { %v4777_v34 = vadd.f32 %v3149_v26, %v2045_v15  ;;  %v2090_v55 = vpop.f32.mrb[96].mxu1 }
 0x1e4   : > { %v1825_v60 = vpop.f32.mrb[32].mxu0  ;;  %v2092_v40 = vpop.f32.mrb[97].mxu1 }
 0x1e5   : > { %v3151_v17 = vadd.f32 %v1825_v60, %v4718_v43  ;;  %v1827_v18 = vpop.f32.mrb[33].mxu0 }
 0x1e7   : > { %v4780_v3 = vadd.f32 %v3151_v17, %v2050_v23  ;;  %v2095_v10 = vpop.f32.mrb[98].mxu1 }
 0x1e8   : > { %v1830_v9 = vpop.f32.mrb[34].mxu0  ;;  %v2097_v58 = vpop.f32.mrb[99].mxu1 }
 0x1e9   : > { %v3153_v13 = vadd.f32 %v1830_v9, %v4723_v14  ;;  %v1832_v61 = vpop.f32.mrb[35].mxu0 }
 0x1eb   : > { %v4783_v47 = vadd.f32 %v3153_v13, %v2055_v36  ;;  %v2100_v28 = vpop.f32.mrb[100].mxu1 }
 0x1ec   : > { %v1835_v12 = vpop.f32.mrb[36].mxu0  ;;  %v2102_v15 = vpop.f32.mrb[101].mxu1 }
 0x1ed   : > { %v3155_v25 = vadd.f32 %v1835_v12, %v4727_v4  ;;  %v1837_v50 = vpop.f32.mrb[37].mxu0 }
 0x1ef   : > { %v4786_v57 = vadd.f32 %v3155_v25, %v2060_v27  ;;  %v2105_v43 = vpop.f32.mrb[102].mxu1 }
 0x1f0   : > { %v1840_v53 = vpop.f32.mrb[38].mxu0  ;;  %v2107_v23 = vpop.f32.mrb[103].mxu1 }
 0x1f1   : > { %v3157_v49 = vadd.f32 %v1840_v53, %v4729_v29  ;;  %v1842_v39 = vpop.f32.mrb[39].mxu0 }
 0x1f3   : > { %v4789_v41 = vadd.f32 %v3157_v49, %v2065_v51  ;;  %v2110_v14 = vpop.f32.mrb[104].mxu1 }
 0x1f4   : > { %v1845_v26 = vpop.f32.mrb[40].mxu0  ;;  %v2112_v36 = vpop.f32.mrb[105].mxu1 }
 0x1f5   : > { %v3159_v20 = vadd.f32 %v1845_v26, %v4731_v0  ;;  %v1847_v60 = vpop.f32.mrb[41].mxu0 }
 0x1f7   : > { %v4792_v40 = vadd.f32 %v3159_v20, %v2070_v62  ;;  %v4794_v4 = vpop.f32.mrb[106].mxu1 }
 0x1f8   : > { %v1850_v27 = vpop.f32.mrb[42].mxu0  ;;  %v2117_v17 = vpop.f32.mrb[107].mxu1 }
 0x1f9   : > { %v3161_v18 = vadd.f32 %v1850_v27, %v4733_v30  ;;  %v1852_v9 = vpop.f32.mrb[43].mxu0 }
 0x1fb   : > { %v4797_v58 = vpop.f32.mrb[108].mxu1  ;;  %v4799_v29 = vadd.f32 %v3161_v18, %v2075_v6 }
 0x1fc   : > { %v1855_v51 = vpop.f32.mrb[44].mxu0  ;;  %v2122_v13 = vpop.f32.mrb[109].mxu1 }
 0x1fd   : > { %v3163_v61 = vadd.f32 %v1855_v51, %v4735_v21  ;;  %v1857_v12 = vpop.f32.mrb[45].mxu0 }
 0x1ff   : > { %v4802_v0 = vpop.f32.mrb[110].mxu1  ;;  %v4804_v62 = vadd.f32 %v3163_v61, %v2080_v11 }
 0x200   : > { %v1860_v15 = vpop.f32.mrb[46].mxu0  ;;  %v2127_v25 = vpop.f32.mrb[111].mxu1 }
 0x201   : > { %v3165_v50 = vadd.f32 %v1860_v15, %v4737_v35  ;;  %v1862_v53 = vpop.f32.mrb[47].mxu0 }
 0x203   : > { %v4807_v30 = vpop.f32.mrb[112].mxu1  ;;  %v4809_v23 = vadd.f32 %v3165_v50, %v2085_v63 }
 0x204   : > { %v1865_v6 = vpop.f32.mrb[48].mxu0  ;;  %v4811_v49 = vpop.f32.mrb[113].mxu1 }
 0x205   : > { %v3167_v39 = vadd.f32 %v1865_v6, %v4739_v37  ;;  %v1867_v21 = vpop.f32.mrb[49].mxu0 }
 0x207   : > { %v4814_v26 = vpop.f32.mrb[114].mxu1  ;;  %v4816_v36 = vadd.f32 %v3167_v39, %v2090_v55 }
 0x208   : > { %v1870_v11 = vpop.f32.mrb[50].mxu0  ;;  %v4818_v20 = vpop.f32.mrb[115].mxu1 }
 0x209   : > { %v3169_v35 = vadd.f32 %v1870_v11, %v4741_v42  ;;  %v1872_v60 = vpop.f32.mrb[51].mxu0 }
 0x20b   : > { %v4821_v27 = vpop.f32.mrb[116].mxu1  ;;  %v4823_v63 = vadd.f32 %v3169_v35, %v2095_v10 }
 0x20c   : > { %v1875_v17 = vpop.f32.mrb[52].mxu0  ;;  %v4825_v18 = vpop.f32.mrb[117].mxu1 }
 0x20d   : > { %v3171_v37 = vadd.f32 %v1875_v17, %v4743_v38  ;;  %v1877_v9 = vpop.f32.mrb[53].mxu0 }
 0x20f   : > { %v4828_v51 = vpop.f32.mrb[118].mxu1  ;;  %v4830_v55 = vadd.f32 %v3171_v37, %v2100_v28 }
 0x210   : > { %v1880_v13 = vpop.f32.mrb[54].mxu0  ;;  %v4832_v61 = vpop.f32.mrb[119].mxu1 }
 0x211   : > { %v3173_v42 = vadd.f32 %v1880_v13, %v4745_v1  ;;  %v1882_v12 = vpop.f32.mrb[55].mxu0 }
 0x213   : > { %v2837_v10 = vpop.f32.mrb[120].mxu1  ;;  %v4841_v38 = vadd.f32 %v3173_v42, %v2105_v43 }
 0x214   : > { %v1885_v15 = vpop.f32.mrb[56].mxu0  ;;  %v4844_v28 = vadd.f32 %v4759_v54, %v2837_v10  ;;  %v2235_v25 = vpop.f32.mrb[121].mxu1 }
 0x215   : > { %v3175_v1 = vadd.f32 %v1885_v15, %v4747_v33  ;;  %v1887_v50 = vpop.f32.mrb[57].mxu0  ;;  %v4848_v53 = vadd.f32 %v4756_v46, %v2235_v25 }
 0x216   : > { %2363 = vst [vmem:[%s4839_s12 + $0x48] sm:$0xff] %v4844_v28 }
 0x217   : > { %2362 = vst [vmem:[%s4839_s12 + $0x40] sm:$0xff] %v4848_v53  ;;  %v2840_v6 = vpop.f32.mrb[122].mxu1  ;;  %v4854_v43 = vadd.f32 %v3175_v1, %v2110_v14 }
 0x218   : > { %v1890_v39 = vpop.f32.mrb[58].mxu0  ;;  %v4857_v54 = vadd.f32 %v4765_v32, %v2840_v6  ;;  %v2245_v21 = vpop.f32.mrb[123].mxu1 }
 0x219   : > { %v3177_v33 = vadd.f32 %v1890_v39, %v4749_v8  ;;  %v1892_v11 = vpop.f32.mrb[59].mxu0  ;;  %v4861_v46 = vadd.f32 %v4762_v24, %v2245_v21 }
 0x21a   : > { %2365 = vst [vmem:[%s4839_s12 + $0x58] sm:$0xff] %v4857_v54 }
 0x21b   : > { %2364 = vst [vmem:[%s4839_s12 + $0x50] sm:$0xff] %v4861_v46  ;;  %v2843_v35 = vpop.f32.mrb[124].mxu1  ;;  %v4868_v14 = vadd.f32 %v3177_v33, %v4794_v4 }
 0x21c   : > { %v1895_v60 = vpop.f32.mrb[60].mxu0  ;;  %v4871_v32 = vadd.f32 %v4771_v7, %v2843_v35  ;;  %v2255_v17 = vpop.f32.mrb[125].mxu1 }
 0x21d   : > { %v3179_v8 = vadd.f32 %v1895_v60, %v4751_v31  ;;  %v1897_v37 = vpop.f32.mrb[61].mxu0  ;;  %v4875_v24 = vadd.f32 %v4768_v48, %v2255_v17 }
 0x21e   : > { %2367 = vst [vmem:[%s4839_s12 + $0x68] sm:$0xff] %v4871_v32 }
 0x21f   : > { %2366 = vst [vmem:[%s4839_s12 + $0x60] sm:$0xff] %v4875_v24  ;;  %v2846_v9 = vpop.f32.mrb[126].mxu1  ;;  %v4882_v4 = vadd.f32 %v3179_v8, %v4797_v58 }
 0x220   : > { %v1900_v13 = vpop.f32.mrb[62].mxu0  ;;  %v4885_v7 = vadd.f32 %v4777_v34, %v2846_v9  ;;  %v2265_v42 = vpop.f32.mrb[127].mxu1 }
 0x221   : > { %v3181_v31 = vadd.f32 %v1900_v13, %v4753_v2  ;;  %v1902_v12 = vpop.f32.mrb[63].mxu0  ;;  %v4889_v48 = vadd.f32 %v4774_v45, %v2265_v42 }
 0x222   : > { %2369 = vst [vmem:[%s4839_s12 + $0x78] sm:$0xff] %v4885_v7 }
 0x223   : > { %2368 = vst [vmem:[%s4839_s12 + $0x70] sm:$0xff] %v4889_v48  ;;  %v2849_v58 = vpop.f32.mrb[128].mxu1  ;;  %v4896_v10 = vadd.f32 %v3181_v31, %v4802_v0 }
 0x224   : > { %v1970_v15 = vpop.f32.mrb[0].mxu0  ;;  %v4899_v34 = vadd.f32 %v4783_v47, %v2849_v58  ;;  %v2275_v25 = vpop.f32.mrb[129].mxu1 }
 0x225   : > { %v3127_v2 = vadd.f32 %v1970_v15, %v4654_v56  ;;  %v1972_v45 = vpop.f32.mrb[1].mxu0  ;;  %v4903_v1 = vadd.f32 %v4780_v3, %v2275_v25 }
 0x226   : > { %2371 = vst [vmem:[%s4839_s12 + $0x88] sm:$0xff] %v4899_v34 }
 0x227   : > { %v2196_v50 = vadd.f32 %v3127_v2, %v4811_v49  ;;  %2370 = vst [vmem:[%s4839_s12 + $0x80] sm:$0xff] %v4903_v1  ;;  %v2852_v0 = vpop.f32.mrb[130].mxu1 }
 0x228   : > { %v1975_v6 = vpop.f32.mrb[2].mxu0  ;;  %v4911_v47 = vadd.f32 %v4789_v41, %v2852_v0  ;;  %v2285_v39 = vpop.f32.mrb[131].mxu1 }
 0x229   : > { %2354 = vst [vmem:[%s4839_s12] sm:$0xff] %v2196_v50  ;;  %v3128_v56 = vadd.f32 %v1975_v6, %v4659_v52  ;;  %v1977_v21 = vpop.f32.mrb[3].mxu0  ;;  %v4916_v3 = vadd.f32 %v4786_v57, %v2285_v39  ;;  %v2423_v11 = vmul.f32 %v2196_v50, %v2196_v50 }
 0x22a   : > { %2373 = vst [vmem:[%s4839_s12 + $0x98] sm:$0xff] %v4911_v47 }
 0x22b   : > { %v2201_v49 = vadd.f32 %v3128_v56, %v4807_v30  ;;  %2372 = vst [vmem:[%s4839_s12 + $0x90] sm:$0xff] %v4916_v3  ;;  %v2855_v33 = vpop.f32.mrb[132].mxu1 }
 0x22c   : > { %v1980_v41 = vpop.f32.mrb[4].mxu0  ;;  %v4924_v35 = vadd.f32 %v4799_v29, %v2855_v33  ;;  %v2295_v52 = vpop.f32.mrb[133].mxu1 }
 0x22d   : > { %2355 = vst [vmem:[%s4839_s12 + $0x8] sm:$0xff] %v2201_v49  ;;  %v2386_v60 = vadd.f32 %v2201_v49, %v2196_v50  ;;  %v2424_v17 = vmul.f32 %v2201_v49, %v2201_v49  ;;  %v3129_v57 = vadd.f32 %v1980_v41, %v4663_v16  ;;  %v1982_v8 = vpop.f32.mrb[5].mxu0  ;;  %v4929_v30 = vadd.f32 %v4792_v40, %v2295_v52 }
 0x22e   : > { %2375 = vst [vmem:[%s4839_s12 + $0xa8] sm:$0xff] %v4924_v35 }
 0x22f   : > { %v2455_v37 = vadd.f32 %v2424_v17, %v2423_v11  ;;  %v2206_v9 = vadd.f32 %v3129_v57, %v4818_v20  ;;  %2374 = vst [vmem:[%s4839_s12 + $0xa0] sm:$0xff] %v4929_v30  ;;  %v2858_v29 = vpop.f32.mrb[134].mxu1 }
 0x230   : > { %v1985_v13 = vpop.f32.mrb[6].mxu0  ;;  %v4937_v42 = vadd.f32 %v4809_v23, %v2858_v29  ;;  %v2305_v16 = vpop.f32.mrb[135].mxu1 }
 0x231   : > { %2356 = vst [vmem:[%s4839_s12 + $0x10] sm:$0xff] %v2206_v9  ;;  %v2387_v31 = vadd.f32 %v2386_v60, %v2206_v9  ;;  %v2425_v12 = vmul.f32 %v2206_v9, %v2206_v9  ;;  %v3130_v40 = vadd.f32 %v1985_v13, %v4667_v5  ;;  %v1987_v58 = vpop.f32.mrb[7].mxu0  ;;  %v4942_v15 = vadd.f32 %v4804_v62, %v2305_v16 }
 0x232   : > { %2377 = vst [vmem:[%s4839_s12 + $0xb8] sm:$0xff] %v4937_v42 }
 0x233   : > { %v2456_v20 = vadd.f32 %v2455_v37, %v2425_v12  ;;  %v2211_v25 = vadd.f32 %v3130_v40, %v4814_v26  ;;  %2376 = vst [vmem:[%s4839_s12 + $0xb0] sm:$0xff] %v4942_v15  ;;  %v2861_v23 = vpop.f32.mrb[136].mxu1 }
 0x234   : > { %v1990_v2 = vpop.f32.mrb[8].mxu0  ;;  %v4950_v45 = vadd.f32 %v4823_v63, %v2861_v23  ;;  %v2315_v5 = vpop.f32.mrb[137].mxu1 }
 0x235   : > { %2357 = vst [vmem:[%s4839_s12 + $0x18] sm:$0xff] %v2211_v25  ;;  %v2388_v50 = vadd.f32 %v2387_v31, %v2211_v25  ;;  %v2426_v0 = vmul.f32 %v2211_v25, %v2211_v25  ;;  %v3131_v62 = vadd.f32 %v1990_v2, %v4671_v22  ;;  %v1992_v6 = vpop.f32.mrb[9].mxu0  ;;  %v4955_v39 = vadd.f32 %v4816_v36, %v2315_v5 }
 0x236   : > { %2379 = vst [vmem:[%s4839_s12 + $0xc8] sm:$0xff] %v4950_v45  ;;  %v2431_v2 = vmul.f32 %v4848_v53, %v4848_v53 }
 0x237   : > { %v2457_v26 = vadd.f32 %v2456_v20, %v2426_v0  ;;  %v2216_v56 = vadd.f32 %v3131_v62, %v4825_v18  ;;  %2378 = vst [vmem:[%s4839_s12 + $0xc0] sm:$0xff] %v4955_v39  ;;  %v2864_v63 = vpop.f32.mrb[138].mxu1 }
 0x238   : > { %v1995_v21 = vpop.f32.mrb[10].mxu0  ;;  %v4963_v49 = vadd.f32 %v4841_v38, %v2864_v63  ;;  %v2325_v22 = vpop.f32.mrb[139].mxu1 }
 0x239   : > { %2358 = vst [vmem:[%s4839_s12 + $0x20] sm:$0xff] %v2216_v56  ;;  %v2389_v33 = vadd.f32 %v2388_v50, %v2216_v56  ;;  %v2427_v11 = vmul.f32 %v2216_v56, %v2216_v56  ;;  %v3132_v36 = vadd.f32 %v1995_v21, %v4674_v44  ;;  %v1997_v41 = vpop.f32.mrb[11].mxu0  ;;  %v4968_v52 = vadd.f32 %v4830_v55, %v2325_v22 }
 0x23a   : > { %2381 = vst [vmem:[%s4839_s12 + $0xd8] sm:$0xff] %v4963_v49 }
 0x23b   : > { %v2458_v18 = vadd.f32 %v2457_v26, %v2427_v11  ;;  %v2221_v60 = vadd.f32 %v3132_v36, %v4821_v27  ;;  %2380 = vst [vmem:[%s4839_s12 + $0xd0] sm:$0xff] %v4968_v52  ;;  %v2867_v38 = vpop.f32.mrb[140].mxu1  ;;  %v2434_v26 = vmul.f32 %v4857_v54, %v4857_v54 }
 0x23c   : > { %v2000_v17 = vpop.f32.mrb[12].mxu0  ;;  %v4976_v57 = vadd.f32 %v4868_v14, %v2867_v38  ;;  %v2335_v44 = vpop.f32.mrb[141].mxu1 }
 0x23d   : > { %2359 = vst [vmem:[%s4839_s12 + $0x28] sm:$0xff] %v2221_v60  ;;  %v2390_v8 = vadd.f32 %v2389_v33, %v2221_v60  ;;  %v2428_v37 = vmul.f32 %v2221_v60, %v2221_v60  ;;  %v3133_v55 = vadd.f32 %v2000_v17, %v4678_v19  ;;  %v2002_v9 = vpop.f32.mrb[13].mxu0  ;;  %v4981_v29 = vadd.f32 %v4854_v43, %v2335_v44 }
 0x23e   : > { %2383 = vst [vmem:[%s4839_s12 + $0xe8] sm:$0xff] %v4976_v57 }
 0x23f   : > { %v2459_v27 = vadd.f32 %v2458_v18, %v2428_v37  ;;  %v2226_v13 = vadd.f32 %v3133_v55, %v4832_v61  ;;  %2382 = vst [vmem:[%s4839_s12 + $0xe0] sm:$0xff] %v4981_v29  ;;  %v2870_v14 = vpop.f32.mrb[142].mxu1 }
 0x240   : > { %v2005_v16 = vpop.f32.mrb[14].mxu0  ;;  %v4989_v31 = vadd.f32 %v4896_v10, %v2870_v14  ;;  %v2345_v19 = vpop.f32.mrb[143].mxu1 }
 0x241   : > { %2360 = vst [vmem:[%s4839_s12 + $0x30] sm:$0xff] %v2226_v13  ;;  %v2391_v12 = vadd.f32 %v2390_v8, %v2226_v13  ;;  %v2429_v40 = vmul.f32 %v2226_v13, %v2226_v13  ;;  %v3134_v43 = vadd.f32 %v2005_v16, %v4681_v59  ;;  %v2007_v58 = vpop.f32.mrb[15].mxu0  ;;  %v4994_v20 = vadd.f32 %v4882_v4, %v2345_v19 }
 0x242   : > { %2385 = vst [vmem:[%s4839_s12 + $0xf8] sm:$0xff] %v4989_v31  ;;  %v2432_v4 = vmul.f32 %v4844_v28, %v4844_v28 }
 0x243   : > { %v2460_v61 = vadd.f32 %v2459_v27, %v2429_v40  ;;  %v2231_v25 = vadd.f32 %v3134_v43, %v4828_v51  ;;  %2384 = vst [vmem:[%s4839_s12 + $0xf0] sm:$0xff] %v4994_v20  ;;  %v2433_v51 = vmul.f32 %v4861_v46, %v4861_v46 }
 0x245   : > { %2361 = vst [vmem:[%s4839_s12 + $0x38] sm:$0xff] %v2231_v25  ;;  %v2392_v10 = vadd.f32 %v2391_v12, %v2231_v25  ;;  %v2430_v23 = vmul.f32 %v2231_v25, %v2231_v25 }
 0x247   : > { %v2393_v5 = vadd.f32 %v2392_v10, %v4848_v53  ;;  %v2461_v59 = vadd.f32 %v2460_v61, %v2430_v23  ;;  %v2435_v53 = vmul.f32 %v4875_v24, %v4875_v24 }
 0x249   : > { %v2394_v50 = vadd.f32 %v2393_v5, %v4844_v28  ;;  %v2462_v0 = vadd.f32 %v2461_v59, %v2431_v2  ;;  %v2436_v28 = vmul.f32 %v4871_v32, %v4871_v32 }
 0x24b   : > { %v2395_v62 = vadd.f32 %v2394_v50, %v4861_v46  ;;  %v2463_v6 = vadd.f32 %v2462_v0, %v2432_v4  ;;  %v2437_v46 = vmul.f32 %v4889_v48, %v4889_v48 }
 0x24d   : > { %v2396_v56 = vadd.f32 %v2395_v62, %v4857_v54  ;;  %v2464_v63 = vadd.f32 %v2463_v6, %v2433_v51  ;;  %v2438_v54 = vmul.f32 %v4885_v7, %v4885_v7  ;;  %v2453_v6 = vmul.f32 %v4994_v20, %v4994_v20 }
 0x24f   : > { %v2397_v21 = vadd.f32 %v2396_v56, %v4875_v24  ;;  %v2465_v22 = vadd.f32 %v2464_v63, %v2434_v26  ;;  %v2439_v24 = vmul.f32 %v4903_v1, %v4903_v1  ;;  %v2454_v26 = vmul.f32 %v4989_v31, %v4989_v31 }
 0x251   : > { %v2398_v33 = vadd.f32 %v2397_v21, %v4871_v32  ;;  %v2466_v11 = vadd.f32 %v2465_v22, %v2435_v53  ;;  %v2440_v32 = vmul.f32 %v4899_v34, %v4899_v34 }
 0x253   : > { %v2399_v36 = vadd.f32 %v2398_v33, %v4889_v48  ;;  %v2467_v41 = vadd.f32 %v2466_v11, %v2436_v28  ;;  %v2441_v48 = vmul.f32 %v4916_v3, %v4916_v3 }
 0x255   : > { %v2400_v18 = vadd.f32 %v2399_v36, %v4885_v7  ;;  %v2468_v60 = vadd.f32 %v2467_v41, %v2437_v46  ;;  %v2442_v7 = vmul.f32 %v4911_v47, %v4911_v47 }
 0x257   : > { %v2401_v38 = vadd.f32 %v2400_v18, %v4903_v1  ;;  %v2469_v17 = vadd.f32 %v2468_v60, %v2438_v54  ;;  %v2443_v1 = vmul.f32 %v4929_v30, %v4929_v30 }
 0x259   : > { %v2402_v44 = vadd.f32 %v2401_v38, %v4899_v34  ;;  %v2470_v8 = vadd.f32 %v2469_v17, %v2439_v24  ;;  %v2444_v34 = vmul.f32 %v4924_v35, %v4924_v35 }
 0x25b   : > { %v2471_v37 = vadd.f32 %v2470_v8, %v2440_v32  ;;  %v2403_v55 = vadd.f32 %v2402_v44, %v4916_v3  ;;  %v2445_v3 = vmul.f32 %v4942_v15, %v4942_v15 }
 0x25d   : > { %v2404_v9 = vadd.f32 %v2403_v55, %v4911_v47  ;;  %v2472_v27 = vadd.f32 %v2471_v37, %v2441_v48  ;;  %v2446_v47 = vmul.f32 %v4937_v42, %v4937_v42 }
 0x25f   : > { %v2405_v13 = vadd.f32 %v2404_v9, %v4929_v30  ;;  %v2473_v14 = vadd.f32 %v2472_v27, %v2442_v7  ;;  %v2447_v30 = vmul.f32 %v4955_v39, %v4955_v39 }
 0x261   : > { %v2406_v16 = vadd.f32 %v2405_v13, %v4924_v35  ;;  %v2474_v19 = vadd.f32 %v2473_v14, %v2443_v1  ;;  %v2448_v35 = vmul.f32 %v4950_v45, %v4950_v45 }
 0x263   : > { %v2407_v12 = vadd.f32 %v2406_v16, %v4942_v15  ;;  %v2475_v40 = vadd.f32 %v2474_v19, %v2444_v34  ;;  %v2449_v15 = vmul.f32 %v4968_v52, %v4968_v52 }
 0x265   : > { %v2408_v43 = vadd.f32 %v2407_v12, %v4937_v42  ;;  %v2476_v58 = vadd.f32 %v2475_v40, %v2445_v3  ;;  %v2450_v42 = vmul.f32 %v4963_v49, %v4963_v49 }
 0x267   : > { %v2409_v61 = vadd.f32 %v2408_v43, %v4955_v39  ;;  %v2477_v25 = vadd.f32 %v2476_v58, %v2446_v47  ;;  %v2451_v39 = vmul.f32 %v4981_v29, %v4981_v29 }
 0x269   : > { %v2410_v10 = vadd.f32 %v2409_v61, %v4950_v45  ;;  %v2478_v23 = vadd.f32 %v2477_v25, %v2447_v30  ;;  %v2452_v45 = vmul.f32 %v4976_v57, %v4976_v57 }
 0x26b   : > { %v2411_v2 = vadd.f32 %v2410_v10, %v4968_v52  ;;  %v2479_v5 = vadd.f32 %v2478_v23, %v2448_v35 }
 0x26d   : > { %v2412_v59 = vadd.f32 %v2411_v2, %v4963_v49  ;;  %v2480_v4 = vadd.f32 %v2479_v5, %v2449_v15 }
 0x26f   : > { %v2413_v50 = vadd.f32 %v2412_v59, %v4981_v29  ;;  %v2481_v0 = vadd.f32 %v2480_v4, %v2450_v42 }
 0x271   : > { %v2414_v51 = vadd.f32 %v2413_v50, %v4976_v57  ;;  %v2482_v62 = vadd.f32 %v2481_v0, %v2451_v39 }
 0x273   : > { %v2415_v52 = vadd.f32 %v2414_v51, %v4994_v20  ;;  %v2483_v49 = vadd.f32 %v2482_v62, %v2452_v45 }
 0x275   : > { %v2416_v56 = vadd.f32 %v2415_v52, %v4989_v31  ;;  %v2484_v29 = vadd.f32 %v2483_v49, %v2453_v6 }
 0x277   : > { %v2417_v63 = vrot.slane %v2416_v56, 4  ;;  %v2485_v53 = vadd.f32 %v2484_v29, %v2454_v26 }
 0x279   : > { %v2418_v21 = vadd.f32 %v2417_v63, %v2416_v56  ;;  %v2486_v22 = vrot.slane %v2485_v53, 4 }
 0x27b   : > { %v2419_v28 = vrot.slane %v2418_v21, 2  ;;  %v2487_v57 = vadd.f32 %v2486_v22, %v2485_v53 }
 0x27d   : > { %v2420_v33 = vadd.f32 %v2419_v28, %v2418_v21  ;;  %v2488_v11 = vrot.slane %v2487_v57, 2 }
 0x27f   : > { %v2421_v46 = vrot.slane %v2420_v33, 1  ;;  %v2489_v36 = vadd.f32 %v2488_v11, %v2487_v57 }
 0x281   : > { %v2490_v41 = vrot.slane %v2489_v36, 1  ;;  %v2422_v20 = vadd.f32 %v2421_v46, %v2420_v33 }
 0x283   : > { %v2491_v54 = vadd.f32 %v2490_v41, %v2489_v36 }
 0x285   : > { %v2493_v31 = vsel %vm2492_vm0, %v2422_v20, %v2491_v54 }
 0x286   : > { %v2495_v18 = vsel %vm2494_vm1, %v2493_v31, 0.0 }
 0x287   : > { %2496 = vst [vmem:[%s505_s14] sm:$0xff] %v2495_v18 }
 0x288 PF: > { %s18_s26 = sadd.s32 1, %s3333_s26   ;;  %s5196_s24 = smov %s3329_s25 }
 0x289   : > { %p15_p5 = scmp.ge.s32.totalorder %s18_s26, 4   ;;  %s5197_s25 = smov %s5199_s27 }
 0x28b   :  { %17 = sbr.rel (!%p15_p5) target bundleno = 2 (0x2), region = 98 }

</bundles_post_ra>
